<compile_context>
chip_gen: v5e
topology: v5e:2x2
jax: 0.10.0
libtpu: 0.0.40
codegen_flags: <defaults>
</compile_context>

<pallas_src>
import functools

import jax
import jax.numpy as jnp
from jax.experimental import pallas as pl
from jax.experimental.pallas import tpu as pltpu

NEG_INF = -1e30   # edge-mask sentinel; keep well inside bf16 range
F_PAD = 8         # node-feature dim padded to 8 rows for a clean slab layout


# ----------------------------------------------------------------------------
# Fused kernel: GAT layer 1 -> GAT layer 2 -> pool -> fc head (per mini-batch).
# ----------------------------------------------------------------------------
def gat_net_kernel(p512_ref, p128_ref, pf32_ref, x_ref, adj_ref, mm_ref, mt_ref,
                   o_ref, *, heads, head_dim, num_graphs, num_classes):
    f32, bf16 = jnp.float32, jnp.bfloat16
    hc = heads * head_dim              # concat feature width (128)
    n = adj_ref.shape[1]               # nodes per mini-batch (64)
    hn = heads * n                     # lane-stacked attention width (512)

    # ---- static views into the packed parameter slabs ----------------------
    a1_dst_big = p512_ref[0:hc, :]                     # [HC, HN] bf16
    a2_dst_big = p512_ref[hc:2 * hc, :]                # [HC, HN] bf16

    hm_exp = p128_ref[0:hn, :]                         # [HN, HC] 0/1 head selector
    w2     = p128_ref[hn:hn + hc, :]                   # [HC, HC]
    fc1_m  = p128_ref[hn + hc:hn + 2 * hc, :]          # [HC, HC]
    fc1_x  = p128_ref[hn + 2 * hc:hn + 3 * hc, :]      # [HC, HC]
    fc2    = p128_ref[hn + 3 * hc:hn + 4 * hc, :]      # [HC, HC] (classes zero-padded)
    a1_src = p128_ref[hn + 4 * hc:hn + 4 * hc + heads, :]            # [H, HC]
    a2_src = p128_ref[hn + 4 * hc + 16:hn + 4 * hc + 16 + heads, :]  # [H, HC]

    w1    = pf32_ref[0:x_ref.shape[2], :]              # [F_PAD, HC] f32
    b1    = pf32_ref[8:9, :]
    b2    = pf32_ref[9:10, :]
    b_fc1 = pf32_ref[10:11, :]
    b_fc2 = pf32_ref[11:12, :]

    # 0 on edges (incl. self loops), -1e30 elsewhere, already replicated per
    # head along lanes: [N, H*N].  Cast once, reused by both layers.
    adj = adj_ref[0].astype(f32)

    def gat_layer(x_in, w, a_dst_big, a_src_blk, bias_row):
        # Feature transform (f32 accumulation on the MXU).
        xw = jnp.dot(x_in.astype(w.dtype), w, preferred_element_type=f32)   # [N, HC]
        xw_b = xw.astype(bf16)

        # Destination scores, replicated over each head's lane block.
        s_dst_big = jnp.dot(xw_b, a_dst_big, preferred_element_type=f32)    # [N, HN]
        # Source scores per head: s_src_t[h, j] = a_src_h . xw_j(head h).
        s_src_t = jax.lax.dot_general(a_src_blk, xw_b, (((1,), (1,)), ((), ())),
                                      preferred_element_type=f32)           # [H, N]
        # Head-major flatten to the lane-stacked layout [1, H*N].
        s_src_flat = jnp.concatenate(
            [s_src_t[h:h + 1, :] for h in range(heads)], axis=1)            # [1, HN]

        # e[i, h*N + j] = LeakyReLU(a_dst.xw_i + a_src.xw_j)   (i = target)
        e = s_dst_big + s_src_flat
        e = jnp.where(e > 0, e, 0.2 * e)
        # Stable shift: leaky(s_dst_i + max_src) >= every logit in the row
        # (LeakyReLU monotone, adj <= 0); block-constant so it cancels in alpha.
        m_src = jnp.max(jnp.max(s_src_t, axis=1, keepdims=True),
                        axis=0, keepdims=True)                              # [1, 1]
        m_big = s_dst_big + m_src
        m_big = jnp.where(m_big > 0, m_big, 0.2 * m_big)
        p = jnp.exp(e + adj - m_big)                                        # [N, HN]
        p_b = p.astype(bf16)

        # Softmax denominators, broadcast straight to the output head columns.
        denom = jnp.dot(p_b, hm_exp, preferred_element_type=f32)            # [N, HC]
        inv = pl.reciprocal(denom, approx=True)

        # ONE fused K = H*N value matmul over all heads.
        xw_rep = jnp.concatenate([xw_b] * heads, axis=0)                    # [HN, HC]
        x_big = xw_rep * hm_exp                                             # per-head mask
        acc = jnp.dot(p_b, x_big, preferred_element_type=f32)               # [N, HC]

        z = acc * inv + bias_row
        # ELU (alpha = 1), safe on both branches.
        return jnp.where(z > 0, z, jnp.exp(jnp.minimum(z, 0.0)) - 1.0)

    h1 = gat_layer(x_ref[0], w1, a1_dst_big, a1_src, b1)                    # [N, HC]
    h2 = gat_layer(h1, w2, a2_dst_big, a2_src, b2)                          # [N, HC]

    # ---- per-graph pooling --------------------------------------------------
    mm = mm_ref[0]                                      # [B, N] mean weights (1/|V_g|)
    mt = mt_ref[0]                                      # [N, B] membership
    mean_pool = jnp.dot(mm, h2, preferred_element_type=f32)                 # [B, HC]

    rows = []
    for g in range(num_graphs):                         # B is tiny -> static unroll
        col = mt[:, g:g + 1]                            # [N, 1]
        r = jnp.max(jnp.where(col > 0, h2, NEG_INF), axis=0, keepdims=True)
        rows.append(jnp.where(r > 0.5 * NEG_INF, r, 0.0))   # guard empty graphs
    max_pool = jnp.concatenate(rows, axis=0)                                # [B, HC]

    # fc1 split into mean/max halves -> no lane-axis concat of the pools.
    z1 = (jnp.dot(mean_pool.astype(jnp.bfloat16), fc1_m, preferred_element_type=f32)
          + jnp.dot(max_pool.astype(jnp.bfloat16), fc1_x, preferred_element_type=f32)
          + b_fc1)
    z1 = jnp.maximum(z1, 0.0)                                               # ReLU

    z2 = jnp.dot(z1.astype(jnp.bfloat16), fc2, preferred_element_type=f32) + b_fc2
    z2 = z2[:, 0:num_classes]                                               # [B, C]

    m = jnp.max(z2, axis=1, keepdims=True)
    lse = jnp.log(jnp.sum(jnp.exp(z2 - m), axis=1, keepdims=True)) + m
    o_ref[0] = z2 - lse


def gat_net_pallas(params, x_b, adj_b, mm_b, mt_b, *, heads=8, head_dim=16,
                   num_graphs=2, num_classes=2):
    nb = x_b.shape[0]
    kernel = functools.partial(gat_net_kernel, heads=heads, head_dim=head_dim,
                               num_graphs=num_graphs, num_classes=num_classes)
    const2 = lambda i: (0, 0)                 # parameters: VMEM-resident
    perb3 = lambda i: (i, 0, 0)               # per-batch tensors / output

    def per_batch_spec(a):
        return pl.BlockSpec((1,) + a.shape[1:], perb3)

    return pl.pallas_call(
        kernel,
        out_shape=jax.ShapeDtypeStruct((nb, num_graphs, num_classes), jnp.float32),
        grid=(nb,),
        in_specs=[
            pl.BlockSpec(params["p512"].shape, const2),
            pl.BlockSpec(params["p128"].shape, const2),
            pl.BlockSpec(params["pf32"].shape, const2),
            per_batch_spec(x_b),
            per_batch_spec(adj_b),
            per_batch_spec(mm_b),
            per_batch_spec(mt_b),
        ],
        out_specs=pl.BlockSpec((1, num_graphs, num_classes), perb3),
        compiler_params=pltpu.CompilerParams(dimension_semantics=("parallel",)),
    )(params["p512"], params["p128"], params["pf32"], x_b, adj_b, mm_b, mt_b)


# ----------------------------------------------------------------------------
# Plain-JAX glue: dense edge-bias (with self loops, head-replicated) + masks.
# ----------------------------------------------------------------------------
def prepare_inputs(x, edge_index, batch, num_graphs, *, heads=8):
    n = x.shape[0]
    # A[i, j] = 1 iff edge j -> i (PyG: edge_index[0]=src, [1]=dst) + self loops.
    adj = jnp.zeros((n, n), jnp.float32).at[edge_index[1], edge_index[0]].set(1.0)
    adj = jnp.maximum(adj, jnp.eye(n, dtype=jnp.float32))
    adj_bias = jnp.where(adj > 0, 0.0, NEG_INF)
    adj_rep = jnp.tile(adj_bias, (1, heads)).astype(jnp.bfloat16)   # [N, H*N]

    mask = (batch[None, :] == jnp.arange(num_graphs)[:, None]).astype(jnp.float32)
    counts = jnp.maximum(jnp.sum(mask, axis=1, keepdims=True), 1.0)
    mask_mean = mask / counts          # [B, N] mean-pool weights
    mask_t = mask.T                    # [N, B] membership for max-pool

    x_pad = jnp.pad(x.astype(jnp.float32), ((0, 0), (0, F_PAD - x.shape[1])))
    return x_pad, adj_rep, mask_mean, mask_t


# ----------------------------------------------------------------------------
# Deterministic synthetic parameters, packed into 3 TPU-friendly slabs.
# ----------------------------------------------------------------------------
def make_params(key, num_features, *, heads=8, head_dim=16, n_nodes=64,
                fc_hidden=100, num_classes=2):
    f32, bf16 = jnp.float32, jnp.bfloat16
    hc = heads * head_dim
    hn = heads * n_nodes
    ks = jax.random.split(key, 12)

    w1 = 0.3 * jax.random.normal(ks[0], (num_features, hc), f32)
    a1_src = 0.3 * jax.random.normal(ks[1], (heads, head_dim), f32)
    a1_dst = 0.3 * jax.random.normal(ks[2], (heads, head_dim), f32)
    b1 = 0.05 * jax.random.normal(ks[3], (1, hc), f32)
    w2 = 0.1 * jax.random.normal(ks[4], (hc, hc), f32)
    a2_src = 0.3 * jax.random.normal(ks[5], (heads, head_dim), f32)
    a2_dst = 0.3 * jax.random.normal(ks[6], (heads, head_dim), f32)
    b2 = 0.05 * jax.random.normal(ks[7], (1, hc), f32)
    w_fc1 = 0.1 * jax.random.normal(ks[8], (2 * hc, fc_hidden), f32)
    b_fc1 = 0.05 * jax.random.normal(ks[9], (1, fc_hidden), f32)
    w_fc2 = 0.1 * jax.random.normal(ks[10], (fc_hidden, num_classes), f32)
    b_fc2 = 0.05 * jax.random.normal(ks[11], (1, num_classes), f32)

    head_of_col = jnp.repeat(jnp.arange(heads), head_dim)     # [HC] head per feature col
    head_of_lane = jnp.repeat(jnp.arange(heads), n_nodes)     # [HN] head per attn lane

    def blockify(att):   # [H, C] -> [H, HC]: row h holds att[h] in head-h columns
        out = jnp.zeros((heads, hc), f32)
        return out.at[head_of_col, jnp.arange(hc)].set(att.reshape(-1))

    def dst_big(att):    # [H, C] -> [HC, HN]: A[h*C+c, h*N+j] = att[h, c]
        vals = att.reshape(-1)
        sel = (head_of_col[:, None] == head_of_lane[None, :]).astype(f32)
        return vals[:, None] * sel

    head_mask_exp = (head_of_lane[:, None] == head_of_col[None, :]).astype(f32)  # [HN, HC]

    # slab 1: lane width H*N (bf16) — destination-attention projections per layer
    p512 = jnp.concatenate([dst_big(a1_dst), dst_big(a2_dst)], axis=0).astype(bf16)

    # slab 2: lane width HC (bf16) — head selector + all big weight matrices
    pad_c = hc - fc_hidden
    fc1_mean = jnp.pad(w_fc1[:hc, :], ((0, 0), (0, pad_c)))
    fc1_max = jnp.pad(w_fc1[hc:, :], ((0, 0), (0, pad_c)))
    fc2_pad = jnp.pad(w_fc2, ((0, pad_c), (0, hc - num_classes)))

    def pad_rows(a, rows):
        return jnp.pad(a, ((0, rows - a.shape[0]), (0, 0)))

    p128 = jnp.concatenate([
        head_mask_exp,                       # rows 0         : HN
        w2,                                  #      HN        : HN+HC
        fc1_mean,                            #      HN+HC     : HN+2HC
        fc1_max,                             #      HN+2HC    : HN+3HC
        fc2_pad,                             #      HN+3HC    : HN+4HC
        pad_rows(blockify(a1_src), 16),      #      HN+4HC    : HN+4HC+16
        pad_rows(blockify(a2_src), 16),      #      HN+4HC+16 : HN+4HC+32
    ], axis=0).astype(bf16)

    # slab 3: small f32 pieces — w1 (tiny K) + all biases (fc pads are zero,
    # so padded lanes of z1/z2 stay exactly zero and are sliced away).
    pf32 = jnp.concatenate([
        pad_rows(w1, F_PAD),                                   # rows 0:8
        b1,                                                    # 8
        b2,                                                    # 9
        jnp.pad(b_fc1, ((0, 0), (0, pad_c))),                  # 10
        jnp.pad(b_fc2, ((0, 0), (0, hc - num_classes))),       # 11
        jnp.zeros((4, hc), f32),                               # pad to 16 rows
    ], axis=0)

    return {"p512": p512, "p128": p128, "pf32": pf32}


if __name__ == "__main__":
    NUM_BATCHES = 2      # graph mini-batches streamed through the grid axis
    NUM_NODES = 64       # nodes per mini-batch
    NUM_FEATURES = 4     # SpectralDesign(adddegree=True) -> small feature dim
    NUM_GRAPHS = 2       # graphs per mini-batch
    half = NUM_NODES // NUM_GRAPHS

    key = jax.random.PRNGKey(0)
    k_params, k_data = jax.random.split(key)
    params = make_params(k_params, NUM_FEATURES, n_nodes=NUM_NODES)

    xs, adjs, mms, mts = [], [], [], []
    for _ in range(NUM_BATCHES):
        k_x, k_a, k_data = jax.random.split(k_data, 3)
        x = jax.random.normal(k_x, (NUM_NODES, NUM_FEATURES), jnp.float32)

        # random symmetric block-diagonal adjacency (no self loops)
        a = (jax.random.uniform(k_a, (NUM_NODES, NUM_NODES)) < 0.15).astype(jnp.float32)
        a = jnp.maximum(a, a.T)
        a = a * (1.0 - jnp.eye(NUM_NODES, dtype=jnp.float32))
        blk = (jnp.arange(NUM_NODES)[:, None] // half) == (jnp.arange(NUM_NODES)[None, :] // half)
        a = a * blk.astype(jnp.float32)

        # edge_index [2, E_pad]; padded (0, 0) entries only add a (0, 0) self
        # edge, absorbed by the self loops GATConv adds anyway.
        src, dst = jnp.nonzero(a, size=NUM_NODES * NUM_NODES, fill_value=0)
        edge_index = jnp.stack([src, dst], axis=0)
        batch_vec = (jnp.arange(NUM_NODES) // half).astype(jnp.int32)

        xp, adj_rep, mask_mean, mask_t = prepare_inputs(x, edge_index, batch_vec, NUM_GRAPHS)
        xs.append(xp)
        adjs.append(adj_rep)
        mms.append(mask_mean)
        mts.append(mask_t)

    x_b, adj_b = jnp.stack(xs), jnp.stack(adjs)
    mm_b, mt_b = jnp.stack(mms), jnp.stack(mts)

    out = gat_net_pallas(params, x_b, adj_b, mm_b, mt_b, num_graphs=NUM_GRAPHS)
    out = jax.block_until_ready(out)

    assert out.shape == (NUM_BATCHES, NUM_GRAPHS, 2)
    assert bool(jnp.all(jnp.isfinite(out)))
    # rows of log_softmax must exponentiate-sum to ~1
    assert jnp.allclose(jnp.sum(jnp.exp(out), axis=-1), 1.0, atol=1e-4)
    print("KERNEL_OK")
</pallas_src>

<mosaic_0001>
module attributes {stable_mosaic.version = 11 : i64} {
  func.func @gat_net_kernel(%arg0: i32, %arg1: memref<256x512xbf16, #tpu.memory_space<vmem>>, %arg2: memref<1056x128xbf16, #tpu.memory_space<vmem>>, %arg3: memref<16x128xf32, #tpu.memory_space<vmem>>, %arg4: memref<1x64x8xf32, #tpu.memory_space<vmem>>, %arg5: memref<1x64x512xbf16, #tpu.memory_space<vmem>>, %arg6: memref<1x2x64xf32, #tpu.memory_space<vmem>>, %arg7: memref<1x64x2xf32, #tpu.memory_space<vmem>>, %arg8: memref<1x2x2xf32, #tpu.memory_space<vmem>>) attributes {dimension_semantics = [#tpu.dimension_semantics<parallel>], iteration_bounds = array<i64: 2>, scalar_prefetch = 0 : i64, scratch_operands = 0 : i64, tpu.core_type = #tpu.core_type<tc>, window_params = [{pipeline_mode = #tpu.pipeline_mode<synchronous>, transform_indices = @transform_0, window_bounds = array<i64: 256, 512>}, {pipeline_mode = #tpu.pipeline_mode<synchronous>, transform_indices = @transform_1, window_bounds = array<i64: 1056, 128>}, {pipeline_mode = #tpu.pipeline_mode<synchronous>, transform_indices = @transform_2, window_bounds = array<i64: 16, 128>}, {transform_indices = @transform_3, window_bounds = array<i64: 1, 64, 8>}, {transform_indices = @transform_4, window_bounds = array<i64: 1, 64, 512>}, {transform_indices = @transform_5, window_bounds = array<i64: 1, 2, 64>}, {transform_indices = @transform_6, window_bounds = array<i64: 1, 64, 2>}, {transform_indices = @transform_7, window_bounds = array<i64: 1, 2, 2>}]} {
    %c0 = arith.constant 0 : index
    %c0_0 = arith.constant 0 : index
    %0 = vector.load %arg1[%c0, %c0_0] : memref<256x512xbf16, #tpu.memory_space<vmem>>, vector<128x512xbf16>
    %c128 = arith.constant 128 : index
    %c0_1 = arith.constant 0 : index
    %1 = vector.load %arg1[%c128, %c0_1] : memref<256x512xbf16, #tpu.memory_space<vmem>>, vector<128x512xbf16>
    %c0_2 = arith.constant 0 : index
    %c0_3 = arith.constant 0 : index
    %2 = vector.load %arg2[%c0_2, %c0_3] : memref<1056x128xbf16, #tpu.memory_space<vmem>>, vector<512x128xbf16>
    %c512 = arith.constant 512 : index
    %c0_4 = arith.constant 0 : index
    %3 = vector.load %arg2[%c512, %c0_4] : memref<1056x128xbf16, #tpu.memory_space<vmem>>, vector<128x128xbf16>
    %c640 = arith.constant 640 : index
    %c0_5 = arith.constant 0 : index
    %4 = vector.load %arg2[%c640, %c0_5] : memref<1056x128xbf16, #tpu.memory_space<vmem>>, vector<128x128xbf16>
    %c768 = arith.constant 768 : index
    %c0_6 = arith.constant 0 : index
    %5 = vector.load %arg2[%c768, %c0_6] : memref<1056x128xbf16, #tpu.memory_space<vmem>>, vector<128x128xbf16>
    %c896 = arith.constant 896 : index
    %c0_7 = arith.constant 0 : index
    %6 = vector.load %arg2[%c896, %c0_7] : memref<1056x128xbf16, #tpu.memory_space<vmem>>, vector<128x128xbf16>
    %c1024 = arith.constant 1024 : index
    %c0_8 = arith.constant 0 : index
    %7 = vector.load %arg2[%c1024, %c0_8] : memref<1056x128xbf16, #tpu.memory_space<vmem>>, vector<8x128xbf16>
    %c1040 = arith.constant 1040 : index
    %c0_9 = arith.constant 0 : index
    %8 = vector.load %arg2[%c1040, %c0_9] : memref<1056x128xbf16, #tpu.memory_space<vmem>>, vector<8x128xbf16>
    %c0_10 = arith.constant 0 : index
    %c0_11 = arith.constant 0 : index
    %9 = vector.load %arg3[%c0_10, %c0_11] : memref<16x128xf32, #tpu.memory_space<vmem>>, vector<8x128xf32>
    %c8 = arith.constant 8 : index
    %c0_12 = arith.constant 0 : index
    %10 = vector.load %arg3[%c8, %c0_12] : memref<16x128xf32, #tpu.memory_space<vmem>>, vector<1x128xf32>
    %c9 = arith.constant 9 : index
    %c0_13 = arith.constant 0 : index
    %11 = vector.load %arg3[%c9, %c0_13] : memref<16x128xf32, #tpu.memory_space<vmem>>, vector<1x128xf32>
    %c10 = arith.constant 10 : index
    %c0_14 = arith.constant 0 : index
    %12 = vector.load %arg3[%c10, %c0_14] : memref<16x128xf32, #tpu.memory_space<vmem>>, vector<1x128xf32>
    %c11 = arith.constant 11 : index
    %c0_15 = arith.constant 0 : index
    %13 = vector.load %arg3[%c11, %c0_15] : memref<16x128xf32, #tpu.memory_space<vmem>>, vector<1x128xf32>
    %c0_16 = arith.constant 0 : index
    %c0_17 = arith.constant 0 : index
    %c0_18 = arith.constant 0 : index
    %14 = vector.load %arg5[%c0_16, %c0_17, %c0_18] : memref<1x64x512xbf16, #tpu.memory_space<vmem>>, vector<1x64x512xbf16>
    %15 = vector.shape_cast %14 : vector<1x64x512xbf16> to vector<64x512xbf16>
    %16 = arith.extf %15 : vector<64x512xbf16> to vector<64x512xf32>
    %c0_19 = arith.constant 0 : index
    %c0_20 = arith.constant 0 : index
    %c0_21 = arith.constant 0 : index
    %17 = vector.load %arg4[%c0_19, %c0_20, %c0_21] : memref<1x64x8xf32, #tpu.memory_space<vmem>>, vector<1x64x8xf32>
    %18 = vector.shape_cast %17 : vector<1x64x8xf32> to vector<64x8xf32>
    %cst = arith.constant dense<0.000000e+00> : vector<64x128xf32>
    %19 = tpu.matmul %18, %9, %cst {dimension_numbers = #tpu.dot_dimension_numbers<[1], [0], [0], [1], [0, 0, 1, 1], [], []>} : vector<64x8xf32>, vector<8x128xf32>, vector<64x128xf32> -> vector<64x128xf32>
    %20 = arith.truncf %19 : vector<64x128xf32> to vector<64x128xbf16>
    %cst_22 = arith.constant dense<0.000000e+00> : vector<64x512xf32>
    %21 = tpu.matmul %20, %0, %cst_22 {dimension_numbers = #tpu.dot_dimension_numbers<[1], [0], [0], [1], [0, 0, 1, 1], [], []>} : vector<64x128xbf16>, vector<128x512xbf16>, vector<64x512xf32> -> vector<64x512xf32>
    %cst_23 = arith.constant dense<0.000000e+00> : vector<8x64xf32>
    %22 = tpu.matmul %7, %20, %cst_23 {dimension_numbers = #tpu.dot_dimension_numbers<[1], [1], [0], [0], [0, 0, 1, 0], [], []>} : vector<8x128xbf16>, vector<64x128xbf16>, vector<8x64xf32> -> vector<8x64xf32>
    %23 = vector.extract_strided_slice %22 {offsets = [0, 0], sizes = [1, 64], strides = [1, 1]} : vector<8x64xf32> to vector<1x64xf32>
    %24 = vector.extract_strided_slice %22 {offsets = [1, 0], sizes = [1, 64], strides = [1, 1]} : vector<8x64xf32> to vector<1x64xf32>
    %25 = vector.extract_strided_slice %22 {offsets = [2, 0], sizes = [1, 64], strides = [1, 1]} : vector<8x64xf32> to vector<1x64xf32>
    %26 = vector.extract_strided_slice %22 {offsets = [3, 0], sizes = [1, 64], strides = [1, 1]} : vector<8x64xf32> to vector<1x64xf32>
    %27 = vector.extract_strided_slice %22 {offsets = [4, 0], sizes = [1, 64], strides = [1, 1]} : vector<8x64xf32> to vector<1x64xf32>
    %28 = vector.extract_strided_slice %22 {offsets = [5, 0], sizes = [1, 64], strides = [1, 1]} : vector<8x64xf32> to vector<1x64xf32>
    %29 = vector.extract_strided_slice %22 {offsets = [6, 0], sizes = [1, 64], strides = [1, 1]} : vector<8x64xf32> to vector<1x64xf32>
    %30 = vector.extract_strided_slice %22 {offsets = [7, 0], sizes = [1, 64], strides = [1, 1]} : vector<8x64xf32> to vector<1x64xf32>
    %31 = tpu.concatenate %23, %24, %25, %26, %27, %28, %29, %30 in 1 : vector<1x64xf32>, vector<1x64xf32>, vector<1x64xf32>, vector<1x64xf32>, vector<1x64xf32>, vector<1x64xf32>, vector<1x64xf32>, vector<1x64xf32> -> vector<1x512xf32>
    %32 = vector.broadcast %31 : vector<1x512xf32> to vector<64x512xf32>
    %33 = arith.addf %21, %32 : vector<64x512xf32>
    %cst_24 = arith.constant 0.000000e+00 : f32
    %34 = vector.broadcast %cst_24 : f32 to vector<64x512xf32>
    %35 = arith.cmpf ogt, %33, %34 : vector<64x512xf32>
    %cst_25 = arith.constant 2.000000e-01 : f32
    %36 = vector.broadcast %cst_25 : f32 to vector<64x512xf32>
    %37 = arith.mulf %36, %33 : vector<64x512xf32>
    %38 = arith.select %35, %33, %37 : vector<64x512xi1>, vector<64x512xf32>
    %cst_26 = arith.constant dense<0xFF800000> : vector<8xf32>
    %39 = vector.multi_reduction <maximumf>, %22, %cst_26 [1] : vector<8x64xf32> to vector<8xf32>
    %40 = vector.shape_cast %39 : vector<8xf32> to vector<8x1xf32>
    %cst_27 = arith.constant dense<0xFF800000> : vector<1xf32>
    %41 = vector.multi_reduction <maximumf>, %40, %cst_27 [0] : vector<8x1xf32> to vector<1xf32>
    %42 = vector.shape_cast %41 : vector<1xf32> to vector<1x1xf32>
    %43 = vector.broadcast %42 : vector<1x1xf32> to vector<64x512xf32>
    %44 = arith.addf %21, %43 : vector<64x512xf32>
    %cst_28 = arith.constant 0.000000e+00 : f32
    %45 = vector.broadcast %cst_28 : f32 to vector<64x512xf32>
    %46 = arith.cmpf ogt, %44, %45 : vector<64x512xf32>
    %cst_29 = arith.constant 2.000000e-01 : f32
    %47 = vector.broadcast %cst_29 : f32 to vector<64x512xf32>
    %48 = arith.mulf %47, %44 : vector<64x512xf32>
    %49 = arith.select %46, %44, %48 : vector<64x512xi1>, vector<64x512xf32>
    %50 = arith.addf %38, %16 : vector<64x512xf32>
    %51 = arith.subf %50, %49 : vector<64x512xf32>
    %52 = math.exp %51 : vector<64x512xf32>
    %53 = arith.truncf %52 : vector<64x512xf32> to vector<64x512xbf16>
    %cst_30 = arith.constant dense<0.000000e+00> : vector<64x128xf32>
    %54 = tpu.matmul %53, %2, %cst_30 {dimension_numbers = #tpu.dot_dimension_numbers<[1], [0], [0], [1], [0, 0, 1, 1], [], []>} : vector<64x512xbf16>, vector<512x128xbf16>, vector<64x128xf32> -> vector<64x128xf32>
    %55 = tpu.reciprocal %54 {approx = true} : vector<64x128xf32> -> vector<64x128xf32>
    %56 = tpu.concatenate %20, %20, %20, %20, %20, %20, %20, %20 in 0 : vector<64x128xbf16>, vector<64x128xbf16>, vector<64x128xbf16>, vector<64x128xbf16>, vector<64x128xbf16>, vector<64x128xbf16>, vector<64x128xbf16>, vector<64x128xbf16> -> vector<512x128xbf16>
    %57 = arith.mulf %56, %2 : vector<512x128xbf16>
    %cst_31 = arith.constant dense<0.000000e+00> : vector<64x128xf32>
    %58 = tpu.matmul %53, %57, %cst_31 {dimension_numbers = #tpu.dot_dimension_numbers<[1], [0], [0], [1], [0, 0, 1, 1], [], []>} : vector<64x512xbf16>, vector<512x128xbf16>, vector<64x128xf32> -> vector<64x128xf32>
    %59 = arith.mulf %58, %55 : vector<64x128xf32>
    %60 = vector.broadcast %10 : vector<1x128xf32> to vector<64x128xf32>
    %61 = arith.addf %59, %60 : vector<64x128xf32>
    %cst_32 = arith.constant 0.000000e+00 : f32
    %62 = vector.broadcast %cst_32 : f32 to vector<64x128xf32>
    %63 = arith.cmpf ogt, %61, %62 : vector<64x128xf32>
    %cst_33 = arith.constant 0.000000e+00 : f32
    %64 = vector.broadcast %cst_33 : f32 to vector<64x128xf32>
    %65 = arith.minimumf %61, %64 : vector<64x128xf32>
    %66 = math.exp %65 : vector<64x128xf32>
    %cst_34 = arith.constant 1.000000e+00 : f32
    %67 = vector.broadcast %cst_34 : f32 to vector<64x128xf32>
    %68 = arith.subf %66, %67 : vector<64x128xf32>
    %69 = arith.select %63, %61, %68 : vector<64x128xi1>, vector<64x128xf32>
    %70 = arith.truncf %69 : vector<64x128xf32> to vector<64x128xbf16>
    %cst_35 = arith.constant dense<0.000000e+00> : vector<64x128xf32>
    %71 = tpu.matmul %70, %3, %cst_35 {dimension_numbers = #tpu.dot_dimension_numbers<[1], [0], [0], [1], [0, 0, 1, 1], [], []>} : vector<64x128xbf16>, vector<128x128xbf16>, vector<64x128xf32> -> vector<64x128xf32>
    %72 = arith.truncf %71 : vector<64x128xf32> to vector<64x128xbf16>
    %cst_36 = arith.constant dense<0.000000e+00> : vector<64x512xf32>
    %73 = tpu.matmul %72, %1, %cst_36 {dimension_numbers = #tpu.dot_dimension_numbers<[1], [0], [0], [1], [0, 0, 1, 1], [], []>} : vector<64x128xbf16>, vector<128x512xbf16>, vector<64x512xf32> -> vector<64x512xf32>
    %cst_37 = arith.constant dense<0.000000e+00> : vector<8x64xf32>
    %74 = tpu.matmul %8, %72, %cst_37 {dimension_numbers = #tpu.dot_dimension_numbers<[1], [1], [0], [0], [0, 0, 1, 0], [], []>} : vector<8x128xbf16>, vector<64x128xbf16>, vector<8x64xf32> -> vector<8x64xf32>
    %75 = vector.extract_strided_slice %74 {offsets = [0, 0], sizes = [1, 64], strides = [1, 1]} : vector<8x64xf32> to vector<1x64xf32>
    %76 = vector.extract_strided_slice %74 {offsets = [1, 0], sizes = [1, 64], strides = [1, 1]} : vector<8x64xf32> to vector<1x64xf32>
    %77 = vector.extract_strided_slice %74 {offsets = [2, 0], sizes = [1, 64], strides = [1, 1]} : vector<8x64xf32> to vector<1x64xf32>
    %78 = vector.extract_strided_slice %74 {offsets = [3, 0], sizes = [1, 64], strides = [1, 1]} : vector<8x64xf32> to vector<1x64xf32>
    %79 = vector.extract_strided_slice %74 {offsets = [4, 0], sizes = [1, 64], strides = [1, 1]} : vector<8x64xf32> to vector<1x64xf32>
    %80 = vector.extract_strided_slice %74 {offsets = [5, 0], sizes = [1, 64], strides = [1, 1]} : vector<8x64xf32> to vector<1x64xf32>
    %81 = vector.extract_strided_slice %74 {offsets = [6, 0], sizes = [1, 64], strides = [1, 1]} : vector<8x64xf32> to vector<1x64xf32>
    %82 = vector.extract_strided_slice %74 {offsets = [7, 0], sizes = [1, 64], strides = [1, 1]} : vector<8x64xf32> to vector<1x64xf32>
    %83 = tpu.concatenate %75, %76, %77, %78, %79, %80, %81, %82 in 1 : vector<1x64xf32>, vector<1x64xf32>, vector<1x64xf32>, vector<1x64xf32>, vector<1x64xf32>, vector<1x64xf32>, vector<1x64xf32>, vector<1x64xf32> -> vector<1x512xf32>
    %84 = vector.broadcast %83 : vector<1x512xf32> to vector<64x512xf32>
    %85 = arith.addf %73, %84 : vector<64x512xf32>
    %cst_38 = arith.constant 0.000000e+00 : f32
    %86 = vector.broadcast %cst_38 : f32 to vector<64x512xf32>
    %87 = arith.cmpf ogt, %85, %86 : vector<64x512xf32>
    %cst_39 = arith.constant 2.000000e-01 : f32
    %88 = vector.broadcast %cst_39 : f32 to vector<64x512xf32>
    %89 = arith.mulf %88, %85 : vector<64x512xf32>
    %90 = arith.select %87, %85, %89 : vector<64x512xi1>, vector<64x512xf32>
    %cst_40 = arith.constant dense<0xFF800000> : vector<8xf32>
    %91 = vector.multi_reduction <maximumf>, %74, %cst_40 [1] : vector<8x64xf32> to vector<8xf32>
    %92 = vector.shape_cast %91 : vector<8xf32> to vector<8x1xf32>
    %cst_41 = arith.constant dense<0xFF800000> : vector<1xf32>
    %93 = vector.multi_reduction <maximumf>, %92, %cst_41 [0] : vector<8x1xf32> to vector<1xf32>
    %94 = vector.shape_cast %93 : vector<1xf32> to vector<1x1xf32>
    %95 = vector.broadcast %94 : vector<1x1xf32> to vector<64x512xf32>
    %96 = arith.addf %73, %95 : vector<64x512xf32>
    %cst_42 = arith.constant 0.000000e+00 : f32
    %97 = vector.broadcast %cst_42 : f32 to vector<64x512xf32>
    %98 = arith.cmpf ogt, %96, %97 : vector<64x512xf32>
    %cst_43 = arith.constant 2.000000e-01 : f32
    %99 = vector.broadcast %cst_43 : f32 to vector<64x512xf32>
    %100 = arith.mulf %99, %96 : vector<64x512xf32>
    %101 = arith.select %98, %96, %100 : vector<64x512xi1>, vector<64x512xf32>
    %102 = arith.addf %90, %16 : vector<64x512xf32>
    %103 = arith.subf %102, %101 : vector<64x512xf32>
    %104 = math.exp %103 : vector<64x512xf32>
    %105 = arith.truncf %104 : vector<64x512xf32> to vector<64x512xbf16>
    %cst_44 = arith.constant dense<0.000000e+00> : vector<64x128xf32>
    %106 = tpu.matmul %105, %2, %cst_44 {dimension_numbers = #tpu.dot_dimension_numbers<[1], [0], [0], [1], [0, 0, 1, 1], [], []>} : vector<64x512xbf16>, vector<512x128xbf16>, vector<64x128xf32> -> vector<64x128xf32>
    %107 = tpu.reciprocal %106 {approx = true} : vector<64x128xf32> -> vector<64x128xf32>
    %108 = tpu.concatenate %72, %72, %72, %72, %72, %72, %72, %72 in 0 : vector<64x128xbf16>, vector<64x128xbf16>, vector<64x128xbf16>, vector<64x128xbf16>, vector<64x128xbf16>, vector<64x128xbf16>, vector<64x128xbf16>, vector<64x128xbf16> -> vector<512x128xbf16>
    %109 = arith.mulf %108, %2 : vector<512x128xbf16>
    %cst_45 = arith.constant dense<0.000000e+00> : vector<64x128xf32>
    %110 = tpu.matmul %105, %109, %cst_45 {dimension_numbers = #tpu.dot_dimension_numbers<[1], [0], [0], [1], [0, 0, 1, 1], [], []>} : vector<64x512xbf16>, vector<512x128xbf16>, vector<64x128xf32> -> vector<64x128xf32>
    %111 = arith.mulf %110, %107 : vector<64x128xf32>
    %112 = vector.broadcast %11 : vector<1x128xf32> to vector<64x128xf32>
    %113 = arith.addf %111, %112 : vector<64x128xf32>
    %cst_46 = arith.constant 0.000000e+00 : f32
    %114 = vector.broadcast %cst_46 : f32 to vector<64x128xf32>
    %115 = arith.cmpf ogt, %113, %114 : vector<64x128xf32>
    %cst_47 = arith.constant 0.000000e+00 : f32
    %116 = vector.broadcast %cst_47 : f32 to vector<64x128xf32>
    %117 = arith.minimumf %113, %116 : vector<64x128xf32>
    %118 = math.exp %117 : vector<64x128xf32>
    %cst_48 = arith.constant 1.000000e+00 : f32
    %119 = vector.broadcast %cst_48 : f32 to vector<64x128xf32>
    %120 = arith.subf %118, %119 : vector<64x128xf32>
    %121 = arith.select %115, %113, %120 : vector<64x128xi1>, vector<64x128xf32>
    %c0_49 = arith.constant 0 : index
    %c0_50 = arith.constant 0 : index
    %c0_51 = arith.constant 0 : index
    %122 = vector.load %arg6[%c0_49, %c0_50, %c0_51] : memref<1x2x64xf32, #tpu.memory_space<vmem>>, vector<1x2x64xf32>
    %123 = vector.shape_cast %122 : vector<1x2x64xf32> to vector<2x64xf32>
    %c0_52 = arith.constant 0 : index
    %c0_53 = arith.constant 0 : index
    %c0_54 = arith.constant 0 : index
    %124 = vector.load %arg7[%c0_52, %c0_53, %c0_54] : memref<1x64x2xf32, #tpu.memory_space<vmem>>, vector<1x64x2xf32>
    %125 = vector.shape_cast %124 : vector<1x64x2xf32> to vector<64x2xf32>
    %cst_55 = arith.constant dense<0.000000e+00> : vector<2x128xf32>
    %126 = tpu.matmul %123, %121, %cst_55 {dimension_numbers = #tpu.dot_dimension_numbers<[1], [0], [0], [1], [0, 0, 1, 1], [], []>} : vector<2x64xf32>, vector<64x128xf32>, vector<2x128xf32> -> vector<2x128xf32>
    %127 = vector.extract_strided_slice %125 {offsets = [0, 0], sizes = [64, 1], strides = [1, 1]} : vector<64x2xf32> to vector<64x1xf32>
    %cst_56 = arith.constant 0.000000e+00 : f32
    %128 = vector.broadcast %cst_56 : f32 to vector<64x1xf32>
    %129 = arith.cmpf ogt, %127, %128 : vector<64x1xf32>
    %cst_57 = arith.constant -1.000000e+30 : f32
    %130 = vector.shape_cast %129 : vector<64x1xi1> to vector<64x1xi1>
    %131 = vector.broadcast %130 : vector<64x1xi1> to vector<64x128xi1>
    %132 = vector.broadcast %cst_57 : f32 to vector<64x128xf32>
    %133 = arith.select %131, %121, %132 : vector<64x128xi1>, vector<64x128xf32>
    %cst_58 = arith.constant dense<0xFF800000> : vector<128xf32>
    %134 = vector.multi_reduction <maximumf>, %133, %cst_58 [0] : vector<64x128xf32> to vector<128xf32>
    %135 = vector.shape_cast %134 : vector<128xf32> to vector<1x128xf32>
    %cst_59 = arith.constant -5.000000e+29 : f32
    %136 = vector.broadcast %cst_59 : f32 to vector<1x128xf32>
    %137 = arith.cmpf ogt, %135, %136 : vector<1x128xf32>
    %cst_60 = arith.constant 0.000000e+00 : f32
    %138 = vector.broadcast %cst_60 : f32 to vector<1x128xf32>
    %139 = arith.select %137, %135, %138 : vector<1x128xi1>, vector<1x128xf32>
    %140 = vector.extract_strided_slice %125 {offsets = [0, 1], sizes = [64, 1], strides = [1, 1]} : vector<64x2xf32> to vector<64x1xf32>
    %cst_61 = arith.constant 0.000000e+00 : f32
    %141 = vector.broadcast %cst_61 : f32 to vector<64x1xf32>
    %142 = arith.cmpf ogt, %140, %141 : vector<64x1xf32>
    %cst_62 = arith.constant -1.000000e+30 : f32
    %143 = vector.shape_cast %142 : vector<64x1xi1> to vector<64x1xi1>
    %144 = vector.broadcast %143 : vector<64x1xi1> to vector<64x128xi1>
    %145 = vector.broadcast %cst_62 : f32 to vector<64x128xf32>
    %146 = arith.select %144, %121, %145 : vector<64x128xi1>, vector<64x128xf32>
    %cst_63 = arith.constant dense<0xFF800000> : vector<128xf32>
    %147 = vector.multi_reduction <maximumf>, %146, %cst_63 [0] : vector<64x128xf32> to vector<128xf32>
    %148 = vector.shape_cast %147 : vector<128xf32> to vector<1x128xf32>
    %cst_64 = arith.constant -5.000000e+29 : f32
    %149 = vector.broadcast %cst_64 : f32 to vector<1x128xf32>
    %150 = arith.cmpf ogt, %148, %149 : vector<1x128xf32>
    %cst_65 = arith.constant 0.000000e+00 : f32
    %151 = vector.broadcast %cst_65 : f32 to vector<1x128xf32>
    %152 = arith.select %150, %148, %151 : vector<1x128xi1>, vector<1x128xf32>
    %153 = tpu.concatenate %139, %152 in 0 : vector<1x128xf32>, vector<1x128xf32> -> vector<2x128xf32>
    %154 = arith.truncf %126 : vector<2x128xf32> to vector<2x128xbf16>
    %cst_66 = arith.constant dense<0.000000e+00> : vector<2x128xf32>
    %155 = tpu.matmul %154, %4, %cst_66 {dimension_numbers = #tpu.dot_dimension_numbers<[1], [0], [0], [1], [0, 0, 1, 1], [], []>} : vector<2x128xbf16>, vector<128x128xbf16>, vector<2x128xf32> -> vector<2x128xf32>
    %156 = arith.truncf %153 : vector<2x128xf32> to vector<2x128xbf16>
    %cst_67 = arith.constant dense<0.000000e+00> : vector<2x128xf32>
    %157 = tpu.matmul %156, %5, %cst_67 {dimension_numbers = #tpu.dot_dimension_numbers<[1], [0], [0], [1], [0, 0, 1, 1], [], []>} : vector<2x128xbf16>, vector<128x128xbf16>, vector<2x128xf32> -> vector<2x128xf32>
    %158 = arith.addf %155, %157 : vector<2x128xf32>
    %159 = vector.broadcast %12 : vector<1x128xf32> to vector<2x128xf32>
    %160 = arith.addf %158, %159 : vector<2x128xf32>
    %cst_68 = arith.constant 0.000000e+00 : f32
    %161 = vector.broadcast %cst_68 : f32 to vector<2x128xf32>
    %162 = arith.maximumf %160, %161 : vector<2x128xf32>
    %163 = arith.truncf %162 : vector<2x128xf32> to vector<2x128xbf16>
    %cst_69 = arith.constant dense<0.000000e+00> : vector<2x128xf32>
    %164 = tpu.matmul %163, %6, %cst_69 {dimension_numbers = #tpu.dot_dimension_numbers<[1], [0], [0], [1], [0, 0, 1, 1], [], []>} : vector<2x128xbf16>, vector<128x128xbf16>, vector<2x128xf32> -> vector<2x128xf32>
    %165 = vector.broadcast %13 : vector<1x128xf32> to vector<2x128xf32>
    %166 = arith.addf %164, %165 : vector<2x128xf32>
    %167 = vector.extract_strided_slice %166 {offsets = [0, 0], sizes = [2, 2], strides = [1, 1]} : vector<2x128xf32> to vector<2x2xf32>
    %cst_70 = arith.constant dense<0xFF800000> : vector<2xf32>
    %168 = vector.multi_reduction <maximumf>, %167, %cst_70 [1] : vector<2x2xf32> to vector<2xf32>
    %169 = vector.shape_cast %168 : vector<2xf32> to vector<2x1xf32>
    %170 = vector.broadcast %169 : vector<2x1xf32> to vector<2x2xf32>
    %171 = arith.subf %167, %170 : vector<2x2xf32>
    %172 = math.exp %171 : vector<2x2xf32>
    %cst_71 = arith.constant dense<0.000000e+00> : vector<2xf32>
    %173 = vector.multi_reduction <add>, %172, %cst_71 [1] : vector<2x2xf32> to vector<2xf32>
    %174 = vector.shape_cast %173 : vector<2xf32> to vector<2x1xf32>
    %175 = math.log %174 : vector<2x1xf32>
    %176 = arith.addf %175, %169 : vector<2x1xf32>
    %177 = vector.broadcast %176 : vector<2x1xf32> to vector<2x2xf32>
    %178 = arith.subf %167, %177 : vector<2x2xf32>
    %c0_72 = arith.constant 0 : index
    %c0_73 = arith.constant 0 : index
    %c0_74 = arith.constant 0 : index
    %179 = vector.load %arg8[%c0_72, %c0_73, %c0_74] : memref<1x2x2xf32, #tpu.memory_space<vmem>>, vector<1x2x2xf32>
    %180 = vector.shape_cast %179 : vector<1x2x2xf32> to vector<2x2xf32>
    %181 = vector.shape_cast %178 : vector<2x2xf32> to vector<1x2x2xf32>
    tpu.vector_store %arg8[%c0_72, %c0_73, %c0_74], %181 {strides = array<i32>} : memref<1x2x2xf32, #tpu.memory_space<vmem>>, vector<1x2x2xf32>,
    return
  }
  func.func @transform_0(%arg0: i32) -> (i32, i32) {
    %c0_i32 = arith.constant 0 : i32
    %c0_i32_0 = arith.constant 0 : i32
    %c0_i32_1 = arith.constant 0 : i32
    return %c0_i32, %c0_i32_0 : i32, i32
  }
  func.func @transform_1(%arg0: i32) -> (i32, i32) {
    %c0_i32 = arith.constant 0 : i32
    %c0_i32_0 = arith.constant 0 : i32
    %c0_i32_1 = arith.constant 0 : i32
    return %c0_i32, %c0_i32_0 : i32, i32
  }
  func.func @transform_2(%arg0: i32) -> (i32, i32) {
    %c0_i32 = arith.constant 0 : i32
    %c0_i32_0 = arith.constant 0 : i32
    %c0_i32_1 = arith.constant 0 : i32
    return %c0_i32, %c0_i32_0 : i32, i32
  }
  func.func @transform_3(%arg0: i32) -> (i32, i32, i32) {
    %c0_i32 = arith.constant 0 : i32
    %c0_i32_0 = arith.constant 0 : i32
    %c0_i32_1 = arith.constant 0 : i32
    return %arg0, %c0_i32, %c0_i32_0 : i32, i32, i32
  }
  func.func @transform_4(%arg0: i32) -> (i32, i32, i32) {
    %c0_i32 = arith.constant 0 : i32
    %c0_i32_0 = arith.constant 0 : i32
    %c0_i32_1 = arith.constant 0 : i32
    return %arg0, %c0_i32, %c0_i32_0 : i32, i32, i32
  }
  func.func @transform_5(%arg0: i32) -> (i32, i32, i32) {
    %c0_i32 = arith.constant 0 : i32
    %c0_i32_0 = arith.constant 0 : i32
    %c0_i32_1 = arith.constant 0 : i32
    return %arg0, %c0_i32, %c0_i32_0 : i32, i32, i32
  }
  func.func @transform_6(%arg0: i32) -> (i32, i32, i32) {
    %c0_i32 = arith.constant 0 : i32
    %c0_i32_0 = arith.constant 0 : i32
    %c0_i32_1 = arith.constant 0 : i32
    return %arg0, %c0_i32, %c0_i32_0 : i32, i32, i32
  }
  func.func @transform_7(%arg0: i32) -> (i32, i32, i32) {
    %c0_i32 = arith.constant 0 : i32
    %c0_i32_0 = arith.constant 0 : i32
    %c0_i32_1 = arith.constant 0 : i32
    return %arg0, %c0_i32, %c0_i32_0 : i32, i32, i32
  }
}

</mosaic_0001>

<bundles_post_ra>
// kernel: tpu_custom_call.1
= control target key start
LH: loop header
LB: loop body
LE: loop exit
PB: predicated region body
PF: predicated region fallthrough
CT: control target
= control target key end

     0   :  { %s7567_s0 = inlined_call_operand.hbm [shape: bf16[256,512], index: 0, kind: input, shape index: {}]   ;;  %s7568_s1 = inlined_call_operand.hbm [shape: bf16[1056,128], index: 1, kind: input, shape index: {}]   ;;  %s7569_s2 = inlined_call_operand.vmem [shape: f32[16,128], index: 2, kind: input, shape index: {}]   ;;  %s7570_s3 = inlined_call_operand.vmem [shape: f32[2,64,8], index: 3, kind: input, shape index: {}]   ;;  %s7571_s4 = inlined_call_operand.vmem [shape: bf16[2,64,512], index: 4, kind: input, shape index: {}]   ;;  %s7572_s5 = inlined_call_operand.hbm [shape: f32[2,2,64], index: 5, kind: input, shape index: {}]   ;;  %s7573_s6 = inlined_call_operand.vmem [shape: f32[2,64,2], index: 6, kind: input, shape index: {}]   ;;  %s7574_s7 = inlined_call_operand.hbm [shape: f32[2,2,2], index: 7, kind: output, shape index: {}]  }
   0x1   :  { %7818 = sst [smem:[#allocation89_spill]] %s7567_s0 }
   0x2   :  { %7819 = sst [smem:[#allocation90_spill]] %s7568_s1 }
   0x3   :  { %12 = vsyncpa [#allocation3], 0 }
   0x4   :  { %13 = vsyncpa [#allocation6], 0 }
   0x5   :  { %14 = vsyncpa [#allocation4], 0 }
   0x6   :  { %16 = vsyncpa [#allocation4 + $0x1], 0  ;;  %s5110_s24 = smov 0   ;;  %s5112_s25 = smov 0  }
   0x7   :  { %s5114_s26 = smov 0   ;;  %s5116_s27 = smov 0  }
   0x8 LB: > { %s7820_s0 = sld [smem:[#allocation89_spill]]  ;;  %s5134_s8 = sadd.s32 4294967295, %s5059_s27   ;;  %s5059_s27 = sphi %s5116_s27, %s8223_s27   ;;  %s5055_s26 = sphi %s5114_s26, %s8222_s26   ;;  %s5051_s25 = sphi %s5112_s25, %s8221_s25   ;;  %s5047_s24 = sphi %s5110_s24, %s8220_s24  }
   0x9   : > { %p3894_p0 = scmp.ge.s32.totalorder %s5059_s27, 1  ;;  %p158_p1 = scmp.eq.s32.totalorder %s5134_s8, 0 }
   0xa   : > { %p207_p2 = scmp.eq.s32.totalorder %s5134_s8, 1  ;;  %p220_p3 = scmp.lt.s32.totalorder %s5059_s27, 3 }
   0xb   : > { %s5061_s10 = smov [#allocation2]   ;;  %s7822_s1 = sld [smem:[#allocation90_spill]] }
   0xc   : > { %p5140_p4 = pnand %p3894_p0, %p220_p3  ;;  %s233_s11 = sshll.u32 %s5061_s10, 4  ;;  %s234_s11 = int_to_ptr.vmem [resolvable:$true] %s233_s11 }
   0xd   : > { %s5062_s15 = smov [#allocation5]   ;;  %s5063_s17 = smov 256  }
   0xe   : > { %s231_s30 = sshll.u32 %s7820_s0, 4  ;;  %p4595_p5 = pneg %p5140_p4  ;;  %s232_s30 = int_to_ptr.hbm [resolvable:$true] %s231_s30 }
   0xf   : > { %s247_s16 = sshll.u32 %s5062_s15, 4  ;;  %s5064_s18 = smov 16   ;;  %s248_s16 = int_to_ptr.vmem [resolvable:$true] %s247_s16 }
  0x10   : > { %p4596_p7 = pnand %p4595_p5, %p158_p1  ;;  %s5065_s19 = smov 64  }
  0x11   : > { %s245_s14 = sshll.u32 %s7822_s1, 4  ;;  %s5066_s20 = smov 4   ;;  %s246_s14 = int_to_ptr.hbm [resolvable:$true] %s245_s14 }
  0x12   : > { %4598 = dma.hbm_to_vmem [thread:$0]  (!%p4596_p7), %s232_s30, 8192, %s234_s11, [#allocation3], %s5063_s17, %s5063_s17, %s5064_s18  }
  0x13   : > { %4601 = dma.hbm_to_vmem [thread:$0]  (!%p4596_p7), %s246_s14, 8448, %s248_s16, [#allocation6], %s5065_s19, %s5065_s19, %s5066_s20  }
  0x14   : > { %s3893_s21 = sadd.s32 4294967294, %s5059_s27   ;;  %s5154_s22 = sadd.s32 1, %s5059_s27  }
  0x15   : > { %s144_s23 = sadd.s32 1, %s5055_s26  ;;  %s141_s28 = ssub.s32 %s5059_s27, %s5154_s22 }
  0x16   : > { %p151_p8 = scmp.ne.s32.totalorder %s5055_s26, %s5051_s25  ;;  %p142_p9 = scmp.eq.s32.totalorder %s141_s28, 0 }
  0x17   : > { %p152_p10 = scmp.eq.s32.totalorder %s5059_s27, 0  ;;  %p157_p11 = scmp.ne.s32.totalorder %s5051_s25, %s5047_s24 }
  0x18   : > { %p5166_p12 = por %p207_p2, %p151_p8  ;;  %p213_p3 = scmp.eq.s32.totalorder %s3893_s21, 1 }
  0x19   : > { %s5171_s30 = scalar_select %p142_p9, %s5055_s26, %s144_s23  }
  0x1a   : > { %p5175_p13 = por %p158_p1, %p157_p11  ;;  %p5179_p0 = por %p152_p10, %p151_p8 }
  0x1b   : > { %p4612_p5 = scmp.lt.s32.totalorder %s5059_s27, 2  ;;  %s282_s12 = sand.u32 1, %s5055_s26  }
  0x1c   : > { %p5185_p7 = por %p213_p3, %p157_p11  ;;  %s280_s14 = sand.u32 1, %s5059_s27  }
  0x1d   : > { %s3898_s15 = sshll.u32 %s282_s12, 1  ;;  %s3899_s16 = sshll.u32 %s5059_s27, 1 }
  0x1e   : > { %s288_s19 = scalar_lea.hbm %s7572_s5, %s3899_s16  ;;  %s284_s23 = scalar_lea.vmem [#allocation7], %s3898_s15 }
  0x1f   : > { %s290_s20 = sshll.u32 %s288_s19, 4  ;;  %s292_s28 = sshll.u32 %s284_s23, 4  ;;  %s291_s20 = int_to_ptr.hbm [resolvable:$true] %s290_s20  ;;  %s293_s28 = int_to_ptr.vmem [resolvable:$true] %s292_s28 }
  0x20   : > { %p5196_p2 = pnand %p4612_p5, %p5179_p0  ;;  %s281_s0 = scalar_lea.sflag [#allocation3], %s280_s14 }
  0x21   : > { %s4955_s1 = sshra.s32 %s291_s20, 4  ;;  %s4962_s17 = scalar_lea.hbm %s7572_s5, 4  ;;  %s4956_s1 = int_to_ptr.hbm [resolvable:$true] %s4955_s1 }
  0x22   : > { %s4957_s12 = scalar_lea.hbm %s4956_s1, 2  ;;  %p4959_p9 = pneg %p5196_p2 }
  0x23   : > { %p4958_p8 = scmp.ne.s32.totalorder %s4956_s1, %s4957_s12  ;;  %p4963_p0 = scmp.lt.s32.totalorder %s4956_s1, %s7572_s5 }
  0x24   : > { %p4964_p3 = scmp.lt.s32.totalorder %s4962_s17, %s4957_s12 }
  0x25   : > { %p4960_p10 = pnand %p4959_p9, %p4958_p8 }
  0x26   : > { %p4965_p5 = por %p4964_p3, %p4963_p0 }
  0x27   : > { %p4961_p11 = pneg %p4960_p10 }
  0x29   : > { %p4966_p6 = pnand %p4965_p5, %p4961_p11 }
  0x2b   : > { %4969 = shalt.err (!%p4966_p6)
}
  0x2c   : > { %4605 = dma.hbm_to_vmem [thread:$0]  (!%p5196_p2), %s291_s20, 32, %s293_s28, %s281_s0  }
  0x2d   : > { %309 = sbr.rel (%p5140_p4) target bundleno = 2331 (0x91b), region = 48 }
  0x32   : > { %5030 = dma.done.wait (%p158_p1), [#allocation3], 8192  }
  0x33   : > { %5032 = vsyncadd (%p158_p1), [#allocation3], 4294959104 }
  0x34   : > { %5034 = dma.done.wait (%p158_p1), [#allocation6], 8448  }
  0x35   : > { %5036 = vsyncadd (%p158_p1), [#allocation6], 4294958848  ;;  %s321_s0 = sand.u32 1, %s5134_s8   ;;  %s323_s1 = sand.u32 1, %s5051_s25  }
  0x36   : > { %s5224_s9 = sshll.u32 %s323_s1, 1  ;;  %s322_s14 = scalar_lea.sflag [#allocation3], %s321_s0 }
  0x37   : > { %s325_s19 = scalar_lea.vmem [#allocation7], %s5224_s9 }
  0x38   : > { %5038 = dma.done.wait (%p5175_p13), %s322_s14, 32  }
  0x39   : > { %5040 = vsyncadd (%p5175_p13), %s322_s14, 4294967264  ;;  %p372_p1 = scmp.lt.s32.totalorder %s5134_s8, 1  ;;  %vm643_vm0 = vcmask 64512   ;;  %v582_v0 = vld [vmem:[%s7569_s2] sm:$0xff]  ;;  %v4485_v6 = vld [vmem:[#allocation2 + $0xec] sm:$0xf0] }
  0x3a   : > { %683 = vmatpush.msra.mxu0 %v582_v0  ;;  %v4033_v5 = vld [vmem:[#allocation2 + $0xe0] sm:$0xf]  ;;  %v4483_v7 = vld [vmem:[#allocation2 + $0xe4] sm:$0xf]  ;;  %v4035_v9 = vld [vmem:[#allocation2 + $0xf0] sm:$0xf0] }
  0x3b   : > { %s5233_s20 = scalar_select %p372_p1, %s5134_s8, 1  ;;  %v4034_v8 = vor.u32 %v4485_v6, %v4033_v5  ;;  %v4041_v10 = vld [vmem:[#allocation2 + $0xe8] sm:$0xf]  ;;  %v4486_v11 = vld [vmem:[#allocation2 + $0xf4] sm:$0xf0]  ;;  %v4038_v12 = vor.u32 %v4483_v7, %v4035_v9  ;;  %vm7726_vm1 = vcmask 523264  }
  0x3c   : > { %v4042_v13 = vor.u32 %v4486_v11, %v4041_v10  ;;  %v4484_v14 = vld [vmem:[#allocation2 + $0xec] sm:$0xf]  ;;  %v4043_v15 = vld [vmem:[#allocation2 + $0xf8] sm:$0xf0]  ;;  %v4017_v16 = vld [vmem:[#allocation2 + $0xc0] sm:$0xf] }
  0x3d   : > { %s4452_s23 = sshll.u32 %s5233_s20, 6  ;;  %901 = vmatpush.bf16.msra.mxu1 %v4034_v8  ;;  %v4046_v18 = vor.u32 %v4484_v14, %v4043_v15  ;;  %v4481_v19 = vld [vmem:[#allocation2 + $0xcc] sm:$0xf0]  ;;  %v4479_v20 = vld [vmem:[#allocation2 + $0xc4] sm:$0xf]  ;;  %930 = vmatpush.bf16.msra.mxu2 %v4038_v12  ;;  %s5067_s15 = smov 64  }
  0x3e   : > { %s5241_s12 = scalar_lea.vmem %s7570_s3, %s4452_s23  ;;  %v4019_v21 = vld [vmem:[#allocation2 + $0xd0] sm:$0xf0]  ;;  %959 = vmatpush.bf16.msra.mxu3 %v4042_v13  ;;  %v4018_v22 = vor.u32 %v4481_v19, %v4017_v16  ;;  %v4025_v24 = vld [vmem:[#allocation2 + $0xc8] sm:$0xf]  ;;  %v4482_v25 = vld [vmem:[#allocation2 + $0xd4] sm:$0xf0]  ;;  %s7327_s10 = scalar_lea.vmem %s7573_s6, %s4452_s23 }
  0x3f   : > { %v635_v1 = vld [vmem:[%s5241_s12] sm:$0xff]  ;;  %v636_v2 = vld [vmem:[%s5241_s12 + $0x8] sm:$0xff]  ;;  %v637_v3 = vld [vmem:[%s5241_s12 + $0x10] sm:$0xff]  ;;  %v4022_v23 = vor.u32 %v4479_v20, %v4019_v21  ;;  %988 = vmatpush.bf16.msrb.mxu0 %v4046_v18  ;;  %v4026_v27 = vor.u32 %v4482_v25, %v4025_v24  ;;  %s4453_s17 = sshll.u32 %s5233_s20, 7  ;;  %s4449_s18 = sshll.u32 %s5134_s8, 1 }
  0x40   : > { %3911 = vmatmul.msk.f32.vlgmr.msra.gmra.mxu0 %vm643_vm0, %v635_v1  ;;  %v638_v4 = vld [vmem:[%s5241_s12 + $0x18] sm:$0xff]  ;;  %v639_v17 = vld [vmem:[%s5241_s12 + $0x20] sm:$0xff]  ;;  %v4480_v26 = vld [vmem:[#allocation2 + $0xcc] sm:$0xf]  ;;  %s5733_s0 = scalar_lea.vmem %s7571_s4, %s4453_s17  ;;  %s3763_s14 = scalar_lea.hbm %s7574_s7, %s4449_s18 }
  0x41   : > { %v4027_v28 = vld [vmem:[#allocation2 + $0xd8] sm:$0xf0]  ;;  %v4001_v29 = vld [vmem:[#allocation2 + $0xa0] sm:$0xf]  ;;  %v4477_v30 = vld [vmem:[#allocation2 + $0xac] sm:$0xf0]  ;;  %902 = vmatpush.bf16.msra.mxu1 %v4018_v22  ;;  %931 = vmatpush.bf16.msra.mxu2 %v4022_v23 }
  0x42   : > { %v4030_v31 = vor.u32 %v4480_v26, %v4027_v28  ;;  %v4475_v32 = vld [vmem:[#allocation2 + $0xa4] sm:$0xf]  ;;  %v4003_v33 = vld [vmem:[#allocation2 + $0xb0] sm:$0xf0]  ;;  %v4009_v34 = vld [vmem:[#allocation2 + $0xa8] sm:$0xf]  ;;  %v4002_v35 = vor.u32 %v4477_v30, %v4001_v29  ;;  %960 = vmatpush.bf16.msra.mxu3 %v4026_v27 }
  0x43   : > { %v4478_v36 = vld [vmem:[#allocation2 + $0xb4] sm:$0xf0]  ;;  %v4476_v37 = vld [vmem:[#allocation2 + $0xac] sm:$0xf]  ;;  %v4011_v38 = vld [vmem:[#allocation2 + $0xb8] sm:$0xf0]  ;;  %v4006_v39 = vor.u32 %v4475_v32, %v4003_v33 }
  0x44   : > { %v3985_v40 = vld [vmem:[#allocation2 + $0x80] sm:$0xf]  ;;  %v4473_v41 = vld [vmem:[#allocation2 + $0x8c] sm:$0xf0]  ;;  %989 = vmatpush.bf16.msrb.mxu0 %v4030_v31  ;;  %v4010_v42 = vor.u32 %v4478_v36, %v4009_v34  ;;  %v4014_v43 = vor.u32 %v4476_v37, %v4011_v38  ;;  %v4471_v44 = vld [vmem:[#allocation2 + $0x84] sm:$0xf] }
  0x45   : > { %v3987_v45 = vld [vmem:[#allocation2 + $0x90] sm:$0xf0]  ;;  %v3993_v46 = vld [vmem:[#allocation2 + $0x88] sm:$0xf]  ;;  %v4474_v47 = vld [vmem:[#allocation2 + $0x94] sm:$0xf0]  ;;  %903 = vmatpush.bf16.msra.mxu1 %v4002_v35  ;;  %v3986_v50 = vor.u32 %v4473_v41, %v3985_v40  ;;  %932 = vmatpush.bf16.msra.mxu2 %v4006_v39 }
  0x46   : > { %v4472_v48 = vld [vmem:[#allocation2 + $0x8c] sm:$0xf]  ;;  %v3995_v49 = vld [vmem:[#allocation2 + $0x98] sm:$0xf0]  ;;  %v3990_v51 = vor.u32 %v4471_v44, %v3987_v45  ;;  %961 = vmatpush.bf16.msra.mxu3 %v4010_v42  ;;  %v3994_v53 = vor.u32 %v4474_v47, %v3993_v46  ;;  %v641_v55 = vld [vmem:[%s5241_s12 + $0x30] sm:$0xff]  ;;  %s371_s28 = scalar_lea.vmem [#allocation8], %s5224_s9 }
  0x47   : > { %v640_v52 = vld [vmem:[%s5241_s12 + $0x28] sm:$0xff]  ;;  %v3998_v54 = vor.u32 %v4472_v48, %v3995_v49  ;;  %v642_v56 = vld [vmem:[%s5241_s12 + $0x38] sm:$0xff]  ;;  %v3969_v57 = vld [vmem:[#allocation2 + $0x60] sm:$0xf]  ;;  %s3765_s21 = sshll.u32 %s371_s28, 4  ;;  %s3767_s12 = sshll.u32 %s3763_s14, 4  ;;  %s3766_s21 = int_to_ptr.vmem [resolvable:$true] %s3765_s21  ;;  %s3768_s12 = int_to_ptr.hbm [resolvable:$true] %s3767_s12 }
  0x48   : > { %3912 = vmatmul.msk.f32.gmra.mxu0 %vm643_vm0, %v636_v2  ;;  %v4469_v58 = vld [vmem:[#allocation2 + $0x6c] sm:$0xf0]  ;;  %v4467_v59 = vld [vmem:[#allocation2 + $0x64] sm:$0xf]  ;;  %v3971_v61 = vld [vmem:[#allocation2 + $0x70] sm:$0xf0] }
  0x49   : > { %990 = vmatpush.bf16.msrb.mxu0 %v4014_v43  ;;  %904 = vmatpush.bf16.msra.mxu1 %v3986_v50  ;;  %v3970_v60 = vor.u32 %v4469_v58, %v3969_v57  ;;  %v3977_v62 = vld [vmem:[#allocation2 + $0x68] sm:$0xf]  ;;  %v4470_v63 = vld [vmem:[#allocation2 + $0x74] sm:$0xf0]  ;;  %v3974_v0 = vor.u32 %v4467_v59, %v3971_v61  ;;  %v4468_v2 = vld [vmem:[#allocation2 + $0x6c] sm:$0xf] }
  0x4a   : > { %933 = vmatpush.bf16.msra.mxu2 %v3990_v51  ;;  %962 = vmatpush.bf16.msra.mxu3 %v3994_v53  ;;  %v3978_v1 = vor.u32 %v4470_v63, %v3977_v62  ;;  %v3953_v5 = vld [vmem:[#allocation2 + $0x40] sm:$0xf]  ;;  %v4465_v6 = vld [vmem:[#allocation2 + $0x4c] sm:$0xf0]  ;;  %v4463_v7 = vld [vmem:[#allocation2 + $0x44] sm:$0xf] }
  0x4b   : > { %v3954_v8 = vor.u32 %v4465_v6, %v3953_v5  ;;  %v3955_v9 = vld [vmem:[#allocation2 + $0x50] sm:$0xf0]  ;;  %v3961_v10 = vld [vmem:[#allocation2 + $0x48] sm:$0xf]  ;;  %v4466_v11 = vld [vmem:[#allocation2 + $0x54] sm:$0xf0] }
  0x4c   : > { %v3958_v12 = vor.u32 %v4463_v7, %v3955_v9  ;;  %v3962_v13 = vor.u32 %v4466_v11, %v3961_v10  ;;  %v4464_v14 = vld [vmem:[#allocation2 + $0x4c] sm:$0xf]  ;;  %v3963_v15 = vld [vmem:[#allocation2 + $0x58] sm:$0xf0]  ;;  %v4461_v18 = vld [vmem:[#allocation2 + $0x2c] sm:$0xf0] }
  0x4d   : > { %991 = vmatpush.bf16.msrb.mxu0 %v3998_v54  ;;  %905 = vmatpush.bf16.msra.mxu1 %v3970_v60  ;;  %v3966_v16 = vor.u32 %v4464_v14, %v3963_v15  ;;  %v4459_v19 = vld [vmem:[#allocation2 + $0x24] sm:$0xf]  ;;  %v3939_v21 = vld [vmem:[#allocation2 + $0x30] sm:$0xf0]  ;;  %v3945_v22 = vld [vmem:[#allocation2 + $0x28] sm:$0xf] }
  0x4e   : > { %934 = vmatpush.bf16.msra.mxu2 %v3974_v0  ;;  %963 = vmatpush.bf16.msra.mxu3 %v3978_v1  ;;  %v4462_v23 = vld [vmem:[#allocation2 + $0x34] sm:$0xf0]  ;;  %v3942_v24 = vor.u32 %v4459_v19, %v3939_v21  ;;  %v4460_v26 = vld [vmem:[#allocation2 + $0x2c] sm:$0xf]  ;;  %v3947_v27 = vld [vmem:[#allocation2 + $0x38] sm:$0xf0] }
  0x4f   : > { %v3946_v25 = vor.u32 %v4462_v23, %v3945_v22  ;;  %v3950_v28 = vor.u32 %v4460_v26, %v3947_v27  ;;  %v3921_v29 = vld [vmem:[#allocation2] sm:$0xf]  ;;  %v4457_v30 = vld [vmem:[#allocation2 + $0xc] sm:$0xf0]  ;;  %v4455_v31 = vld [vmem:[#allocation2 + $0x4] sm:$0xf] }
  0x50   : > { %3913 = vmatmul.msk.f32.gmra.mxu0 %vm643_vm0, %v637_v3  ;;  %v3979_v3 = vld [vmem:[#allocation2 + $0x78] sm:$0xf0]  ;;  %v3922_v32 = vor.u32 %v4457_v30, %v3921_v29  ;;  %v3923_v33 = vld [vmem:[#allocation2 + $0x10] sm:$0xf0]  ;;  %v3929_v34 = vld [vmem:[#allocation2 + $0x8] sm:$0xf] }
  0x51   : > { %906 = vmatpush.bf16.msra.mxu1 %v3954_v8  ;;  %v4458_v35 = vld [vmem:[#allocation2 + $0x14] sm:$0xf0]  ;;  %v3926_v36 = vor.u32 %v4455_v31, %v3923_v33  ;;  %v4456_v38 = vld [vmem:[#allocation2 + $0xc] sm:$0xf]  ;;  %v3931_v39 = vld [vmem:[#allocation2 + $0x18] sm:$0xf0] }
  0x52   : > { %935 = vmatpush.bf16.msra.mxu2 %v3958_v12  ;;  %964 = vmatpush.bf16.msra.mxu3 %v3962_v13  ;;  %v3930_v37 = vor.u32 %v4458_v35, %v3929_v34  ;;  %v3934_v40 = vor.u32 %v4456_v38, %v3931_v39  ;;  %v4526_v43 = vld [vmem:[#allocation5 + $0x38] sm:$0xff]  ;;  %v4525_v50 = vld [vmem:[#allocation5 + $0x30] sm:$0xff]  ;;  %v4524_v54 = vld [vmem:[#allocation5 + $0x28] sm:$0xff]  ;;  %s4999_s20 = sshra.s32 %s3768_s12, 4  ;;  %s5005_s9 = scalar_lea.hbm %s7574_s7, 4  ;;  %s5000_s20 = int_to_ptr.hbm [resolvable:$true] %s4999_s20 }
  0x53   : > { %v4534_v44 = vld [vmem:[#allocation5 + $0x78] sm:$0xff]  ;;  %v4533_v51 = vld [vmem:[#allocation5 + $0x70] sm:$0xff]  ;;  %v5268_v58 = vld [vmem:[#allocation5 + $0x80] sm:$0xff]   ;;  %s5001_s8 = scalar_lea.hbm %s5000_s20, 2  ;;  %p5006_p2 = scmp.lt.s32.totalorder %s5000_s20, %s7574_s7 }
  0x54   : > { %v4550_v45 = vld [vmem:[#allocation5 + $0xf8] sm:$0xff]  ;;  %7828 = vst [vmem:[#allocation13_spill] sm:$0xff] %v5268_v58  ;;  %v4523_v59 = vld [vmem:[#allocation5 + $0x20] sm:$0xff]  ;;  %v7576_v63 = vunpack.c.l.bf16 %v5268_v58  ;;  %v7575_v5 = vunpack.c.h.bf16 %v5268_v58  ;;  %v4521_v11 = vld [vmem:[#allocation5 + $0x10] sm:$0xff]  ;;  %p5002_p4 = scmp.ne.s32.totalorder %s5000_s20, %s5001_s8  ;;  %p5007_p8 = scmp.lt.s32.totalorder %s5005_s9, %s5001_s8 }
  0x55   : > { %v4531_v60 = vld [vmem:[#allocation5 + $0x60] sm:$0xff]  ;;  %v4529_v12 = vld [vmem:[#allocation5 + $0x50] sm:$0xff]  ;;  %v4528_v19 = vld [vmem:[#allocation5 + $0x48] sm:$0xff] }
  0x56   : > { %936 = vmatpush.bf16.msra.mxu2 %v3942_v24  ;;  %965 = vmatpush.bf16.msra.mxu3 %v3946_v25  ;;  %v4547_v61 = vld [vmem:[#allocation5 + $0xe0] sm:$0xff]  ;;  %v4545_v13 = vld [vmem:[#allocation5 + $0xd0] sm:$0xff]  ;;  %v5296_v24 = vld [vmem:[#allocation5 + $0x88] sm:$0xff]   ;;  %p5003_p6 = pnand %p5002_p4, %p5166_p12  ;;  %p5008_p9 = por %p5007_p8, %p5006_p2 }
  0x57   : > { %v4519_v21 = vld [vmem:[#allocation5] sm:$0xff]  ;;  %7829 = vst [vmem:[#allocation14_spill] sm:$0xff] %v5296_v24  ;;  %v7578_v25 = vunpack.c.l.bf16 %v5296_v24  ;;  %v7577_v29 = vunpack.c.h.bf16 %v5296_v24  ;;  %v5322_v38 = vld [vmem:[#allocation5 + $0x90] sm:$0xff]  }
  0x58   : > { %3914 = vmatmul.msk.f32.gmra.mxu0 %vm643_vm0, %v638_v4  ;;  %v3982_v4 = vor.u32 %v4468_v2, %v3979_v3  ;;  %v4522_v2 = vld [vmem:[#allocation5 + $0x18] sm:$0xff]  ;;  %v4527_v22 = vld [vmem:[#allocation5 + $0x40] sm:$0xff]  ;;  %7830 = vst [vmem:[#allocation15_spill] sm:$0xff] %v5322_v38  ;;  %p5004_p13 = pneg %p5003_p6 }
  0x59   : > { %v4530_v3 = vld [vmem:[#allocation5 + $0x58] sm:$0xff]  ;;  %v4543_v23 = vld [vmem:[#allocation5 + $0xc0] sm:$0xff] }
  0x5a   : > { %992 = vmatpush.bf16.msrb.mxu0 %v3982_v4  ;;  %937 = vmatpush.bf16.msra.mxu2 %v3926_v36  ;;  %v4546_v4 = vld [vmem:[#allocation5 + $0xd8] sm:$0xff]  ;;  %p5009_p10 = pnand %p5008_p9, %p5004_p13 }
  0x5b   : > { %966 = vmatpush.bf16.msra.mxu3 %v3930_v37 }
  0x5e   : > { %993 = vmatpush.bf16.msrb.mxu0 %v3966_v16  ;;  %1663 = vmatpush.bf16.msrb.mxu2 %v4526_v43  ;;  %v7579_v43 = vunpack.c.h.bf16 %v5322_v38 }
  0x5f   : > { %1692 = vmatpush.bf16.msrb.mxu3 %v4534_v44 }
  0x60   : > { %3915 = vmatmul.msk.f32.gmra.mxu0 %vm643_vm0, %v639_v17  ;;  %v3937_v17 = vld [vmem:[#allocation2 + $0x20] sm:$0xf] }
  0x61   : > { %v3938_v20 = vor.u32 %v4461_v18, %v3937_v17  ;;  %v4520_v18 = vld [vmem:[#allocation5 + $0x8] sm:$0xff] }
  0x62   : > { %994 = vmatpush.bf16.msrb.mxu0 %v3950_v28  ;;  %1664 = vmatpush.bf16.msrb.mxu2 %v4525_v50  ;;  %v5348_v50 = vld [vmem:[#allocation5 + $0x28] sm:$0xff]  }
  0x63   : > { %907 = vmatpush.bf16.msra.mxu1 %v3938_v20  ;;  %1693 = vmatpush.bf16.msrb.mxu3 %v4533_v51  ;;  %v4544_v20 = vld [vmem:[#allocation5 + $0xc8] sm:$0xff]  ;;  %7833 = vst [vmem:[#allocation18_spill] sm:$0xff] %v5348_v50 }
  0x66   : > { %995 = vmatpush.bf16.msrb.mxu0 %v3934_v40  ;;  %1665 = vmatpush.bf16.msrb.mxu2 %v4524_v54  ;;  %v5352_v54 = vld [vmem:[#allocation5 + $0x38] sm:$0xff]  }
  0x67   : > { %908 = vmatpush.bf16.msra.mxu1 %v3922_v32  ;;  %7834 = vst [vmem:[#allocation19_spill] sm:$0xff] %v5352_v54 }
  0x68   : > { %3916 = vmatmul.msk.f32.gmra.mxu0 %vm643_vm0, %v640_v52  ;;  %v4549_v52 = vld [vmem:[#allocation5 + $0xf0] sm:$0xff] }
  0x6a   : > { %1750 = vmatpush.bf16.msra.mxu0 %v4550_v45  ;;  %1666 = vmatpush.bf16.msrb.mxu2 %v4523_v59 }
  0x6e   : > { %1751 = vmatpush.bf16.msra.mxu0 %v4549_v52  ;;  %1667 = vmatpush.bf16.msrb.mxu2 %v4522_v2 }
  0x70   : > { %3917 = vmatmul.msk.f32.gmra.mxu0 %vm643_vm0, %v641_v55  ;;  %v4532_v55 = vld [vmem:[#allocation5 + $0x68] sm:$0xff] }
  0x71   : > { %1694 = vmatpush.bf16.msrb.mxu3 %v4532_v55  ;;  %v5354_v55 = vld [vmem:[#allocation5 + $0x68] sm:$0xff]  }
  0x72   : > { %1668 = vmatpush.bf16.msrb.mxu2 %v4521_v11  ;;  %7835 = vst [vmem:[#allocation20_spill] sm:$0xff] %v5354_v55  ;;  %v7591_v11 = vunpack.c.l.bf16 %v5354_v55 }
  0x75   : > { %1695 = vmatpush.bf16.msrb.mxu3 %v4531_v60 }
  0x76   : > { %1669 = vmatpush.bf16.msrb.mxu2 %v4520_v18  ;;  %v7581_v18 = vunpack.c.h.bf16 %v5352_v54 }
  0x78   : > { %3918 = vmatmul.msk.f32.gmra.mxu0 %vm643_vm0, %v642_v56  ;;  %v4548_v56 = vld [vmem:[#allocation5 + $0xe8] sm:$0xff] }
  0x79   : > { %1752 = vmatpush.bf16.msra.mxu0 %v4548_v56  ;;  %1696 = vmatpush.bf16.msrb.mxu3 %v4530_v3  ;;  %v5356_v56 = vld [vmem:[#allocation5 + $0xe8] sm:$0xff]   ;;  %v5363_v3 = vld [vmem:[#allocation5 + $0xf8] sm:$0xff]  }
  0x7a   : > { %1670 = vmatpush.bf16.msrb.mxu2 %v4519_v21  ;;  %7836 = vst [vmem:[#allocation21_spill] sm:$0xff] %v5356_v56  ;;  %v5378_v21 = vld [vmem:[#allocation5 + $0xf0] sm:$0xff]  }
  0x7b   : > { %7838 = vst [vmem:[#allocation23_spill] sm:$0xff] %v5363_v3 }
  0x7c   : > { %7841 = vst [vmem:[#allocation26_spill] sm:$0xff] %v5378_v21 }
  0x7d   : > { %1753 = vmatpush.bf16.msra.mxu0 %v4547_v61  ;;  %1697 = vmatpush.bf16.msrb.mxu3 %v4529_v12  ;;  %v7596_v12 = vunpack.c.h.bf16 %v5354_v55 }
  0x81   : > { %1754 = vmatpush.bf16.msra.mxu0 %v4546_v4  ;;  %1698 = vmatpush.bf16.msrb.mxu3 %v4528_v19  ;;  %v5365_v4 = vld [vmem:[#allocation5 + $0x30] sm:$0xff]  }
  0x82   : > { %7839 = vst [vmem:[#allocation24_spill] sm:$0xff] %v5365_v4 }
  0x85   : > { %1755 = vmatpush.bf16.msra.mxu0 %v4545_v13  ;;  %1699 = vmatpush.bf16.msrb.mxu3 %v4527_v22  ;;  %v7602_v13 = vunpack.c.l.bf16 %v5356_v56  ;;  %v5380_v22 = vld [vmem:[#allocation5 + $0x98] sm:$0xff]  }
  0x86   : > { %7842 = vst [vmem:[#allocation27_spill] sm:$0xff] %v5380_v22 }
  0x89   : > { %1756 = vmatpush.bf16.msra.mxu0 %v4544_v20 }
  0x8d   : > { %1757 = vmatpush.bf16.msra.mxu0 %v4543_v23  ;;  %v7585_v23 = vunpack.c.l.bf16 %v5363_v3 }
  0xbd   : > { %v685_v41 = vpop.f32.mrf.mxu0 }
  0xbe   : > { %v709_v42 = vpack.c.bf16 %v685_v41, %v685_v41 }
  0xc0   : > { %v725_v48 = vunpack.c.l.b16 %v709_v42  ;;  %v7580_v42 = vunpack.c.l.bf16 %v5322_v38 }
  0xc5   : > { %v688_v46 = vpop.f32.mrf.mxu0 }
  0xc6   : > { %v710_v47 = vpack.c.bf16 %v688_v46, %v688_v46 }
  0xc8   : > { %v726_v49 = vunpack.c.l.b16 %v710_v47  ;;  %v5344_v47 = vld [vmem:[#allocation5 + $0x20] sm:$0xff]  }
  0xc9   : > { %7831 = vst [vmem:[#allocation16_spill] sm:$0xff] %v5344_v47  ;;  %v7599_v59 = vunpack.c.l.bf16 %v5344_v47  ;;  %v7598_v60 = vunpack.c.h.bf16 %v5344_v47 }
  0xca   : > { %v5262_v53 = vpack.c.b16 %v726_v49, %v725_v48  ;;  %v5346_v48 = vld [vmem:[#allocation5 + $0x60] sm:$0xff]  }
  0xcb   : > { %7832 = vst [vmem:[#allocation17_spill] sm:$0xff] %v5346_v48  ;;  %v7597_v61 = vunpack.c.l.bf16 %v5346_v48 }
  0xcc   : > { %909 = vmatmul.bf16.vlgmr.msra.gmra.mxu1 %v5262_v53  ;;  %938 = vmatmul.bf16.vlgmr.msra.gmra.mxu2 %v5262_v53  ;;  %v5271_v62 = vunpack.c.l.bf16 %v5262_v53  ;;  %v5275_v0 = vunpack.c.h.bf16 %v5262_v53 }
  0xcd   : > { %967 = vmatmul.bf16.vlgmr.msra.gmra.mxu3 %v5262_v53  ;;  %996 = vmatmul.bf16.vlgmr.msrb.gmra.mxu0 %v5262_v53  ;;  %v691_v57 = vpop.f32.mrf.mxu0 }
  0xce   : > { %v711_v1 = vpack.c.bf16 %v691_v57, %v691_v57  ;;  %v5281_v8 = vmul.f32 %v7576_v63, %v5271_v62  ;;  %v5286_v14 = vmul.f32 %v7575_v5, %v5275_v0  ;;  %v5358_v57 = vld [vmem:[#allocation5 + $0x78] sm:$0xff]  }
  0xcf   : > { %7837 = vst [vmem:[#allocation22_spill] sm:$0xff] %v5358_v57  ;;  %v7582_v19 = vunpack.c.l.bf16 %v5358_v57  ;;  %v7584_v20 = vunpack.c.h.bf16 %v5358_v57 }
  0xd0   : > { %v727_v9 = vunpack.c.l.b16 %v711_v1 }
  0xd5   : > { %v694_v6 = vpop.f32.mrf.mxu0 }
  0xd6   : > { %v712_v7 = vpack.c.bf16 %v694_v6, %v694_v6  ;;  %v7593_v6 = vunpack.c.l.bf16 %v5348_v50 }
  0xd8   : > { %v728_v10 = vunpack.c.l.b16 %v712_v7  ;;  %v7590_v7 = vunpack.c.h.bf16 %v5348_v50 }
  0xda   : > { %v5288_v15 = vpack.c.b16 %v728_v10, %v727_v9  ;;  %v7583_v9 = vunpack.c.l.bf16 %v5352_v54  ;;  %v5370_v10 = vld [vmem:[#allocation5 + $0x70] sm:$0xff]  }
  0xdb   : > { %7840 = vst [vmem:[#allocation25_spill] sm:$0xff] %v5370_v10 }
  0xdc   : > { %914 = vmatmul.bf16.gmra.mxu1 %v5288_v15  ;;  %943 = vmatmul.bf16.gmra.mxu2 %v5288_v15  ;;  %v5300_v26 = vunpack.c.l.bf16 %v5288_v15  ;;  %v5303_v27 = vunpack.c.h.bf16 %v5288_v15 }
  0xdd   : > { %972 = vmatmul.bf16.gmra.mxu3 %v5288_v15  ;;  %1001 = vmatmul.bf16.gmra.mxu0 %v5288_v15  ;;  %v697_v17 = vpop.f32.mrf.mxu0 }
  0xde   : > { %v713_v28 = vpack.c.bf16 %v697_v17, %v697_v17  ;;  %v5309_v34 = vmul.f32 %v7578_v25, %v5300_v26  ;;  %v5314_v35 = vmul.f32 %v7577_v29, %v5303_v27 }
  0xe0   : > { %v729_v32 = vunpack.c.l.b16 %v713_v28  ;;  %v7586_v28 = vunpack.c.h.bf16 %v5363_v3 }
  0xe5   : > { %v700_v30 = vpop.f32.mrf.mxu0 }
  0xe6   : > { %v714_v31 = vpack.c.bf16 %v700_v30, %v700_v30  ;;  %v7587_v30 = vunpack.c.l.bf16 %v5365_v4 }
  0xe8   : > { %v730_v33 = vunpack.c.l.b16 %v714_v31  ;;  %v7601_v31 = vunpack.c.h.bf16 %v5356_v56  ;;  %v5790_v56 = vld [vmem:[%s5733_s0 + $0x20] sm:$0xff] }
  0xe9   : > { %7897 = vst [vmem:[#allocation71_spill] sm:$0xff] %v5790_v56 }
  0xea   : > { %v5316_v36 = vpack.c.b16 %v730_v33, %v729_v32 }
  0xec   : > { %919 = vmatmul.bf16.gmra.mxu1 %v5316_v36  ;;  %948 = vmatmul.bf16.gmra.mxu2 %v5316_v36  ;;  %v5327_v40 = vunpack.c.l.bf16 %v5316_v36  ;;  %v5330_v41 = vunpack.c.h.bf16 %v5316_v36 }
  0xed   : > { %977 = vmatmul.bf16.gmra.mxu3 %v5316_v36  ;;  %1006 = vmatmul.bf16.gmra.mxu0 %v5316_v36  ;;  %v703_v39 = vpop.f32.mrf.mxu0 }
  0xee   : > { %v5337_v44 = vmul.f32 %v7580_v42, %v5327_v40  ;;  %v5342_v45 = vmul.f32 %v7579_v43, %v5330_v41  ;;  %v715_v46 = vpack.c.bf16 %v703_v39, %v703_v39  ;;  %v7606_v39 = vunpack.c.h.bf16 %v5365_v4 }
  0xef   : > { %v1871_v42 = vmul.f32 %v7587_v30, %v5327_v40 }
  0xf0   : > { %v731_v1 = vunpack.c.l.b16 %v715_v46  ;;  %v7589_v46 = vunpack.c.l.bf16 %v5370_v10 }
  0xf5   : > { %v706_v49 = vpop.f32.mrf.mxu0 }
  0xf6   : > { %v716_v52 = vpack.c.bf16 %v706_v49, %v706_v49  ;;  %v7588_v49 = vunpack.c.h.bf16 %v5370_v10 }
  0xf8   : > { %v732_v2 = vunpack.c.l.b16 %v716_v52  ;;  %v7605_v52 = vunpack.c.l.bf16 %v5378_v21 }
  0xfa   : > { %v736_v17 = vpack.c.b16 %v732_v2, %v731_v1  ;;  %v7595_v1 = vunpack.c.h.bf16 %v5378_v21  ;;  %v7592_v2 = vunpack.c.l.bf16 %v5380_v22  ;;  %v1919_v30 = vmul.f32 %v7605_v52, %v5327_v40 }
  0xfc   : > { %v5386_v32 = vunpack.c.l.bf16 %v736_v17  ;;  %v5388_v33 = vunpack.c.h.bf16 %v736_v17  ;;  %924 = vmatmul.bf16.gmra.mxu1 %v736_v17  ;;  %953 = vmatmul.bf16.gmra.mxu2 %v736_v17 }
  0xfd   : > { %982 = vmatmul.bf16.gmra.mxu3 %v736_v17  ;;  %1011 = vmatmul.bf16.gmra.mxu0 %v736_v17 }
  0xfe   : > { %1021 = vmatpush.bf16.xpose.msrb.mxu1 %v736_v17  ;;  %v1873_v5 = vmul.f32 %v7583_v9, %v5386_v32  ;;  %v1874_v63 = vmul.f32 %v7581_v18, %v5388_v33  ;;  %v1889_v29 = vmul.f32 %v7582_v19, %v5386_v32  ;;  %v1890_v25 = vmul.f32 %v7584_v20, %v5388_v33  ;;  %v5417_v18 = vld [vmem:[#allocation5 + $0xe0] sm:$0xff]  }
  0xff   : > { %v1921_v17 = vmul.f32 %v7585_v23, %v5386_v32  ;;  %v1922_v43 = vmul.f32 %v7586_v28, %v5388_v33  ;;  %7843 = vst [vmem:[#allocation28_spill] sm:$0xff] %v5417_v18  ;;  %v7594_v19 = vunpack.c.h.bf16 %v5380_v22  ;;  %v1872_v20 = vmul.f32 %v7606_v39, %v5330_v41  ;;  %v5766_v22 = vld [vmem:[%s5733_s0] sm:$0xff] }
 0x100   : > { %v1930_v9 = vpack.c.bf16 %v1874_v63, %v1873_v5  ;;  %v1938_v16 = vpack.c.bf16 %v1890_v25, %v1889_v29  ;;  %v1887_v23 = vmul.f32 %v7589_v46, %v5327_v40  ;;  %v1888_v28 = vmul.f32 %v7588_v49, %v5330_v41  ;;  %7893 = vst [vmem:[#allocation67_spill] sm:$0xff] %v5766_v22 }
 0x101   : > { %v1954_v37 = vpack.c.bf16 %v1922_v43, %v1921_v17  ;;  %v1920_v63 = vmul.f32 %v7595_v1, %v5330_v41  ;;  %v1869_v5 = vmul.f32 %v7593_v6, %v5300_v26  ;;  %v7600_v25 = vunpack.c.h.bf16 %v5346_v48  ;;  %v5469_v1 = vld [vmem:[#allocation5 + $0x18] sm:$0xff]  }
 0x102   : > { %1955 = vmatpush.bf16.msra.mxu2 %v1930_v9  ;;  %1984 = vmatpush.bf16.msra.mxu3 %v1938_v16  ;;  %v7604_v29 = vunpack.c.l.bf16 %v5417_v18  ;;  %v7603_v43 = vunpack.c.h.bf16 %v5417_v18  ;;  %v1870_v17 = vmul.f32 %v7590_v7, %v5303_v27  ;;  %v1885_v9 = vmul.f32 %v7591_v11, %v5300_v26  ;;  %7844 = vst [vmem:[#allocation29_spill] sm:$0xff] %v5469_v1 }
 0x103   : > { %2042 = vmatpush.bf16.msrb.mxu0 %v1954_v37  ;;  %v5450_v16 = vmul.f32 %v7592_v2, %v5386_v32  ;;  %v5455_v49 = vmul.f32 %v7594_v19, %v5388_v33  ;;  %v1929_v46 = vpack.c.bf16 %v1872_v20, %v1871_v42  ;;  %v1886_v37 = vmul.f32 %v7596_v12, %v5303_v27 }
 0x104   : > { %v1917_v7 = vmul.f32 %v7602_v13, %v5300_v26  ;;  %v1918_v11 = vmul.f32 %v7601_v31, %v5303_v27  ;;  %v1937_v2 = vpack.c.bf16 %v1888_v28, %v1887_v23  ;;  %v1953_v6 = vpack.c.bf16 %v1920_v63, %v1919_v30  ;;  %v5483_v30 = vld [vmem:[#allocation5 + $0x58] sm:$0xff]   ;;  %v5497_v13 = vld [vmem:[#allocation5 + $0x50] sm:$0xff]  }
 0x105   : > { %v1867_v19 = vmul.f32 %v7599_v59, %v5271_v62  ;;  %v1868_v20 = vmul.f32 %v7598_v60, %v5275_v0  ;;  %v1883_v23 = vmul.f32 %v7597_v61, %v5271_v62  ;;  %v1884_v28 = vmul.f32 %v7600_v25, %v5275_v0  ;;  %7845 = vst [vmem:[#allocation30_spill] sm:$0xff] %v5483_v30  ;;  %v5485_v63 = vld [vmem:[#allocation5 + $0xd8] sm:$0xff]   ;;  %v5493_v61 = vld [vmem:[#allocation5 + $0x10] sm:$0xff]  }
 0x106   : > { %1022 = vmatpush.bf16.xpose.msrb.mxu1 %v5316_v36  ;;  %1956 = vmatpush.bf16.msra.mxu2 %v1929_v46  ;;  %7846 = vst [vmem:[#allocation31_spill] sm:$0xff] %v5485_v63  ;;  %v1928_v36 = vpack.c.bf16 %v1870_v17, %v1869_v5  ;;  %v1915_v46 = vmul.f32 %v7604_v29, %v5271_v62  ;;  %v7610_v25 = vunpack.c.l.bf16 %v5469_v1  ;;  %v7607_v31 = vunpack.c.h.bf16 %v5469_v1  ;;  %v5506_v29 = vld [vmem:[#allocation5 + $0xd0] sm:$0xff]  }
 0x107   : > { %1985 = vmatpush.bf16.msra.mxu3 %v1937_v2  ;;  %2043 = vmatpush.bf16.msrb.mxu0 %v1953_v6  ;;  %v1916_v12 = vmul.f32 %v7603_v43, %v5275_v0  ;;  %7847 = vst [vmem:[#allocation32_spill] sm:$0xff] %v5493_v61  ;;  %v1936_v60 = vpack.c.bf16 %v1886_v37, %v1885_v9  ;;  %v7608_v6 = vunpack.c.l.bf16 %v5483_v30  ;;  %v7609_v2 = vunpack.c.h.bf16 %v5483_v30  ;;  %v5752_v30 = vld [vmem:[%s5733_s0 + $0x8] sm:$0xff] }
 0x108   : > { %v1952_v59 = vpack.c.bf16 %v1918_v11, %v1917_v7  ;;  %7848 = vst [vmem:[#allocation33_spill] sm:$0xff] %v5497_v13  ;;  %v7611_v5 = vunpack.c.l.bf16 %v5485_v63  ;;  %v7612_v17 = vunpack.c.h.bf16 %v5485_v63  ;;  %v7614_v43 = vunpack.c.l.bf16 %v5493_v61 }
 0x109   : > { %v1927_v7 = vpack.c.bf16 %v1868_v20, %v1867_v19  ;;  %v1935_v11 = vpack.c.bf16 %v1884_v28, %v1883_v23  ;;  %v7613_v9 = vunpack.c.h.bf16 %v5493_v61  ;;  %v7616_v37 = vunpack.c.l.bf16 %v5497_v13  ;;  %7849 = vst [vmem:[#allocation34_spill] sm:$0xff] %v5506_v29  ;;  %v5517_v19 = vld [vmem:[#allocation5 + $0x48] sm:$0xff]   ;;  %v5763_v61 = vld [vmem:[%s5733_s0 + $0x38] sm:$0xff] }
 0x10a   : > { %1957 = vmatpush.bf16.msra.mxu2 %v1928_v36  ;;  %v1951_v52 = vpack.c.bf16 %v1916_v12, %v1915_v46  ;;  %v1865_v39 = vmul.f32 %v7610_v25, %v5386_v32  ;;  %v1866_v36 = vmul.f32 %v7607_v31, %v5388_v33  ;;  %7851 = vst [vmem:[#allocation36_spill] sm:$0xff] %v5517_v19  ;;  %v7617_v46 = vunpack.c.l.bf16 %v5506_v29 }
 0x10b   : > { %1986 = vmatpush.bf16.msra.mxu3 %v1936_v60  ;;  %2044 = vmatpush.bf16.msrb.mxu0 %v1952_v59  ;;  %v7615_v60 = vunpack.c.h.bf16 %v5497_v13  ;;  %v5515_v59 = vld [vmem:[#allocation5 + $0x8] sm:$0xff]   ;;  %v1881_v20 = vmul.f32 %v7608_v6, %v5386_v32  ;;  %v1882_v12 = vmul.f32 %v7609_v2, %v5388_v33  ;;  %v1913_v23 = vmul.f32 %v7611_v5, %v5386_v32 }
 0x10c   : > { %7850 = vst [vmem:[#allocation35_spill] sm:$0xff] %v5515_v59  ;;  %v1914_v28 = vmul.f32 %v7612_v17, %v5388_v33  ;;  %v7618_v31 = vunpack.c.h.bf16 %v5506_v29  ;;  %v7619_v6 = vunpack.c.l.bf16 %v5515_v59  ;;  %v7620_v25 = vunpack.c.l.bf16 %v5517_v19  ;;  %v5537_v5 = vld [vmem:[#allocation5 + $0xc8] sm:$0xff]   ;;  %v5548_v17 = vld [vmem:[#allocation5 + $0x40] sm:$0xff]  }
 0x10d   : > { %7852 = vst [vmem:[#allocation37_spill] sm:$0xff] %v5537_v5  ;;  %v1926_v51 = vpack.c.bf16 %v1866_v36, %v1865_v39  ;;  %v1934_v42 = vpack.c.bf16 %v1882_v12, %v1881_v20  ;;  %v1879_v39 = vmul.f32 %v7616_v37, %v5327_v40  ;;  %v1880_v36 = vmul.f32 %v7615_v60, %v5330_v41 }
 0x10e   : > { %1023 = vmatpush.bf16.xpose.msrb.mxu1 %v5288_v15  ;;  %1958 = vmatpush.bf16.msra.mxu2 %v1927_v7  ;;  %v1863_v15 = vmul.f32 %v7614_v43, %v5327_v40  ;;  %v1864_v7 = vmul.f32 %v7613_v9, %v5330_v41  ;;  %7854 = vst [vmem:[#allocation39_spill] sm:$0xff] %v5548_v17  ;;  %v7856_v20 = vunpack.c.h.bf16 %v5515_v59  ;;  %v7907_v4 = vunpack.c.h.bf16 %v5766_v22 }
 0x10f   : > { %1987 = vmatpush.bf16.msra.mxu3 %v1935_v11  ;;  %2045 = vmatpush.bf16.msrb.mxu0 %v1951_v52  ;;  %v5546_v52 = vld [vmem:[#allocation5] sm:$0xff]   ;;  %v1950_v2 = vpack.c.bf16 %v1914_v28, %v1913_v23  ;;  %v1911_v9 = vmul.f32 %v7617_v46, %v5327_v40  ;;  %v1912_v43 = vmul.f32 %v7618_v31, %v5330_v41  ;;  %v4542_v28 = vld [vmem:[#allocation5 + $0xb8] sm:$0xff]  ;;  %v4541_v11 = vld [vmem:[#allocation5 + $0xb0] sm:$0xff] }
 0x110   : > { %7853 = vst [vmem:[#allocation38_spill] sm:$0xff] %v5546_v52  ;;  %v5564_v23 = vld [vmem:[#allocation5 + $0xc0] sm:$0xff]   ;;  %v7623_v60 = vunpack.c.l.bf16 %v5546_v52  ;;  %v1925_v46 = vpack.c.bf16 %v1864_v7, %v1863_v15  ;;  %v1861_v31 = vmul.f32 %v7619_v6, %v5300_v26  ;;  %v1862_v12 = vmul.f32 %v7856_v20, %v5303_v27 }
 0x111   : > { %7855 = vst [vmem:[#allocation40_spill] sm:$0xff] %v5564_v23  ;;  %v7621_v15 = vunpack.c.l.bf16 %v5564_v23  ;;  %v1949_v7 = vpack.c.bf16 %v1912_v43, %v1911_v9  ;;  %v7858_v20 = vunpack.c.l.bf16 %v5537_v5  ;;  %v7860_v43 = vunpack.c.h.bf16 %v5546_v52  ;;  %v5755_v52 = vld [vmem:[%s5733_s0 + $0x18] sm:$0xff] }
 0x112   : > { %1959 = vmatpush.bf16.msra.mxu2 %v1926_v51  ;;  %v7857_v51 = vunpack.c.h.bf16 %v5517_v19  ;;  %7889 = vst [vmem:[#allocation63_spill] sm:$0xff] %v5752_v30  ;;  %v5760_v19 = vld [vmem:[%s5733_s0 + $0x28] sm:$0xff] }
 0x113   : > { %1988 = vmatpush.bf16.msra.mxu3 %v1934_v42  ;;  %2046 = vmatpush.bf16.msrb.mxu0 %v1950_v2  ;;  %v1933_v42 = vpack.c.bf16 %v1880_v36, %v1879_v39  ;;  %v1877_v2 = vmul.f32 %v7620_v25, %v5300_v26  ;;  %v1909_v6 = vmul.f32 %v7858_v20, %v5300_v26  ;;  %v7859_v39 = vunpack.c.h.bf16 %v5537_v5 }
 0x114   : > { %v1878_v37 = vmul.f32 %v7857_v51, %v5303_v27  ;;  %v7622_v25 = vunpack.c.h.bf16 %v5564_v23  ;;  %v1924_v51 = vpack.c.bf16 %v1862_v12, %v1861_v31  ;;  %v1860_v9 = vmul.f32 %v7860_v43, %v5275_v0  ;;  %v580_v31 = vld [vmem:[#allocation5 + $0x200] sm:$0xf]  ;;  %7890 = vst [vmem:[#allocation64_spill] sm:$0xff] %v5755_v52 }
 0x115   : > { %v1910_v36 = vmul.f32 %v7859_v39, %v5303_v27  ;;  %v7861_v20 = vunpack.c.l.bf16 %v5548_v17  ;;  %v1907_v12 = vmul.f32 %v7621_v15, %v5271_v62  ;;  %v5609_v15 = vld [vmem:[#allocation5 + $0xb8] sm:$0xff]   ;;  %7891 = vst [vmem:[#allocation65_spill] sm:$0xff] %v5760_v19 }
 0x116   : > { %1024 = vmatpush.bf16.xpose.msrb.mxu1 %v5262_v53  ;;  %1960 = vmatpush.bf16.msra.mxu2 %v1925_v46  ;;  %v1859_v53 = vmul.f32 %v7623_v60, %v5271_v62  ;;  %v1932_v46 = vpack.c.bf16 %v1878_v37, %v1877_v2  ;;  %v1908_v43 = vmul.f32 %v7622_v25, %v5275_v0  ;;  %v4540_v37 = vld [vmem:[#allocation5 + $0xa8] sm:$0xff] }
 0x117   : > { %1989 = vmatpush.bf16.msra.mxu3 %v1933_v42  ;;  %2047 = vmatpush.bf16.msrb.mxu0 %v1949_v7  ;;  %v1875_v39 = vmul.f32 %v7861_v20, %v5271_v62  ;;  %v1948_v7 = vpack.c.bf16 %v1910_v36, %v1909_v6  ;;  %v4539_v6 = vld [vmem:[#allocation5 + $0xa0] sm:$0xff]  ;;  %v4538_v36 = vld [vmem:[#allocation5 + $0x98] sm:$0xff]  ;;  %7863 = vst [vmem:[#allocation41_spill] sm:$0xff] %v5609_v15 }
 0x118   : > { %v1923_v2 = vpack.c.bf16 %v1860_v9, %v1859_v53  ;;  %v4536_v53 = vld [vmem:[#allocation5 + $0x88] sm:$0xff]  ;;  %v5613_v9 = vld [vmem:[#allocation5 + $0xb0] sm:$0xff]   ;;  %7892 = vst [vmem:[#allocation66_spill] sm:$0xff] %v5763_v61 }
 0x119   : > { %7864 = vst [vmem:[#allocation42_spill] sm:$0xff] %v5613_v9 }
 0x11a   : > { %1961 = vmatpush.bf16.msra.mxu2 %v1924_v51  ;;  %v4537_v51 = vld [vmem:[#allocation5 + $0x90] sm:$0xff] }
 0x11b   : > { %1990 = vmatpush.bf16.msra.mxu3 %v1932_v46  ;;  %2048 = vmatpush.bf16.msrb.mxu0 %v1948_v7  ;;  %v7630_v46 = vunpack.c.h.bf16 %v5609_v15  ;;  %v7629_v7 = vunpack.c.l.bf16 %v5613_v9 }
 0x11d   : > { %1025 = vmatmul.bf16.vlgmr.msrb.gmra.mxu1 %v580_v31  ;;  %v7628_v31 = vunpack.c.h.bf16 %v5613_v9 }
 0x11e   : > { %1721 = vmatpush.bf16.msra.mxu1 %v4542_v28  ;;  %v7862_v28 = vunpack.c.h.bf16 %v5548_v17  ;;  %1962 = vmatpush.bf16.msra.mxu2 %v1923_v2 }
 0x120   : > { %v1876_v42 = vmul.f32 %v7862_v28, %v5275_v0  ;;  %v1947_v28 = vpack.c.bf16 %v1908_v43, %v1907_v12  ;;  %v5623_v12 = vld [vmem:[#allocation5 + $0xa8] sm:$0xff]   ;;  %v4535_v43 = vld [vmem:[#allocation5 + $0x80] sm:$0xff] }
 0x121   : > { %7865 = vst [vmem:[#allocation43_spill] sm:$0xff] %v5623_v12 }
 0x122   : > { %1722 = vmatpush.bf16.msra.mxu1 %v4541_v11  ;;  %v1931_v20 = vpack.c.bf16 %v1876_v42, %v1875_v39  ;;  %2049 = vmatpush.bf16.msrb.mxu0 %v1947_v28  ;;  %v7631_v11 = vunpack.c.l.bf16 %v5609_v15  ;;  %v1906_v42 = vmul.f32 %v7630_v46, %v5388_v33  ;;  %v7626_v33 = vunpack.c.h.bf16 %v5623_v12  ;;  %v5633_v28 = vld [vmem:[#allocation5 + $0xa0] sm:$0xff]  }
 0x123   : > { %7866 = vst [vmem:[#allocation44_spill] sm:$0xff] %v5633_v28 }
 0x124   : > { %1991 = vmatpush.bf16.msra.mxu3 %v1931_v20  ;;  %v1905_v39 = vmul.f32 %v7631_v11, %v5386_v32  ;;  %v1903_v20 = vmul.f32 %v7629_v7, %v5327_v40  ;;  %v1904_v32 = vmul.f32 %v7628_v31, %v5330_v41  ;;  %v1902_v40 = vmul.f32 %v7626_v33, %v5303_v27 }
 0x125   : > { %v7868_v27 = vpack.c.bf16 %v5342_v45, %v5337_v44 }
 0x126   : > { %1723 = vmatpush.bf16.msra.mxu1 %v4540_v37  ;;  %v7627_v37 = vunpack.c.l.bf16 %v5623_v12  ;;  %v1946_v2 = vpack.c.bf16 %v1906_v42, %v1905_v39  ;;  %v5793_v12 = vld [vmem:[%s5733_s0 + $0x30] sm:$0xff] }
 0x127   : > { %7898 = vst [vmem:[#allocation72_spill] sm:$0xff] %v5793_v12 }
 0x12a   : > { %1724 = vmatpush.bf16.msra.mxu1 %v4539_v6  ;;  %v7625_v6 = vunpack.c.l.bf16 %v5633_v28 }
 0x12c   : > { %v1899_v39 = vmul.f32 %v7625_v6, %v5271_v62  ;;  %v7870_v62 = vpack.c.bf16 %v5314_v35, %v5309_v34 }
 0x12e   : > { %1725 = vmatpush.bf16.msra.mxu1 %v4538_v36  ;;  %v1945_v36 = vpack.c.bf16 %v1904_v32, %v1903_v20 }
 0x132   : > { %1726 = vmatpush.bf16.msra.mxu1 %v4537_v51  ;;  %v1901_v51 = vmul.f32 %v7627_v37, %v5300_v26  ;;  %v7867_v26 = vpack.c.bf16 %v5455_v49, %v5450_v16 }
 0x134   : > { %v1944_v41 = vpack.c.bf16 %v1902_v40, %v1901_v51 }
 0x136   : > { %1727 = vmatpush.bf16.msra.mxu1 %v4536_v53  ;;  %v7624_v53 = vunpack.c.h.bf16 %v5633_v28 }
 0x138   : > { %v1900_v42 = vmul.f32 %v7624_v53, %v5275_v0  ;;  %v7871_v0 = vpack.c.bf16 %v5286_v14, %v5281_v8 }
 0x13a   : > { %1728 = vmatpush.bf16.msra.mxu1 %v4535_v43  ;;  %v1943_v43 = vpack.c.bf16 %v1900_v42, %v1899_v39 }
 0x13e   : > { %2013 = vmatpush.bf16.msrb.mxu1 %v1946_v2 }
 0x142   : > { %2014 = vmatpush.bf16.msrb.mxu1 %v1945_v36 }
 0x146   : > { %2015 = vmatpush.bf16.msrb.mxu1 %v1944_v41 }
 0x149   : > { %v5655_v2 = vpop.f32.mrf.mxu1 }
 0x14a   : > { %2016 = vmatpush.bf16.msrb.mxu1 %v1943_v43  ;;  %7869 = vst [vmem:[#allocation45_spill] sm:$0xff] %v5655_v2  ;;  %v5689_v39 = vpop.f32.mrf.mxu0 }
 0x14e   : > { %2017 = vmatpush.bf16.msrb.mxu1 %v7867_v26 }
 0x14f   : > { %v5691_v42 = vpop.f32.mrf.mxu2 }
 0x150   : > { %v5693_v43 = vpop.f32.mrf.mxu3 }
 0x151   : > { %v5663_v20 = vpop.f32.mrf.mxu1 }
 0x152   : > { %2018 = vmatpush.bf16.msrb.mxu1 %v7868_v27  ;;  %7872 = vst [vmem:[#allocation46_spill] sm:$0xff] %v5663_v20  ;;  %v5695_v26 = vpop.f32.mrf.mxu0 }
 0x156   : > { %2019 = vmatpush.bf16.msrb.mxu1 %v7870_v62 }
 0x157   : > { %v5697_v27 = vpop.f32.mrf.mxu2 }
 0x158   : > { %v5699_v62 = vpop.f32.mrf.mxu3 }
 0x159   : > { %v5665_v32 = vpop.f32.mrf.mxu1 }
 0x15a   : > { %2020 = vmatpush.bf16.msrb.mxu1 %v7871_v0  ;;  %7873 = vst [vmem:[#allocation47_spill] sm:$0xff] %v5665_v32  ;;  %v5701_v0 = vpop.f32.mrf.mxu0 }
 0x161   : > { %v5667_v49 = vpop.f32.mrf.mxu1 }
 0x162   : > { %7874 = vst [vmem:[#allocation48_spill] sm:$0xff] %v5667_v49 }
 0x169   : > { %v5669_v16 = vpop.f32.mrf.mxu1 }
 0x16a   : > { %7875 = vst [vmem:[#allocation49_spill] sm:$0xff] %v5669_v16 }
 0x171   : > { %v5671_v44 = vpop.f32.mrf.mxu1 }
 0x172   : > { %7876 = vst [vmem:[#allocation50_spill] sm:$0xff] %v5671_v44 }
 0x179   : > { %v5673_v45 = vpop.f32.mrf.mxu1 }
 0x17a   : > { %7877 = vst [vmem:[#allocation51_spill] sm:$0xff] %v5673_v45 }
 0x181   : > { %v5675_v36 = vpop.f32.mrf.mxu1 }
 0x182   : > { %7878 = vst [vmem:[#allocation52_spill] sm:$0xff] %v5675_v36 }
 0x19a   : > { %v5677_v34 = vpop.f32.mrf.mxu1 }
 0x19b   : > { %v1190_v8 = vsel %vm7726_vm1, %v5677_v34, -inf  ;;  %v1049_v14 = vrot.slane %v5677_v34, 7  ;;  %v1037_v35 = vrot.slane %v5677_v34, 3  ;;  %v1043_v40 = vrot.slane %v5677_v34, 5 }
 0x19c   : > { %1191 = vmax.xlane.f32.xlu0 %v1190_v8  ;;  %v1031_v41 = vrot.slane %v5677_v34, 1  ;;  %v5703_v8 = vpop.f32.mrf.mxu2  ;;  %v1047_v25 = vrot.slane %v5677_v34, 6  ;;  %v1035_v31 = vrot.slane %v5677_v34, 2  ;;  %v1041_v5 = vrot.slane %v5677_v34, 4 }
 0x19d   : > { %1050 = vrot.lane.b32.xlu2 %v1049_v14, %s5067_s15  ;;  %1038 = vrot.lane.b32.xlu1 %v1037_v35, %s5067_s15  ;;  %v5705_v14 = vpop.f32.mrf.mxu3  ;;  %v5707_v35 = vpop.f32.mrf.mxu0 }
 0x19e   : > { %7879 = vst [vmem:[#allocation53_spill] sm:$0xff] %v5705_v14 }
 0x1a2   : > { %v1028_v51 = vpop.f32.mrf.mxu1 }
 0x1a4   : > { %v5709_v51 = vpop.f32.mrf.mxu2 }
 0x1a5   : > { %1044 = vrot.lane.b32.xlu1 %v1043_v40, %s5067_s15  ;;  %v5711_v40 = vpop.f32.mrf.mxu3  ;;  %v5714_v60 = vpop.f32.mrf.mxu0 }
 0x1a6   : > { %7880 = vst [vmem:[#allocation54_spill] sm:$0xff] %v5711_v40 }
 0x1a7   : > { %7881 = vst [vmem:[#allocation55_spill] sm:$0xff] %v5714_v60 }
 0x1ac   : > { %v5716_v53 = vpop.f32.mrf.mxu2 }
 0x1ad   : > { %7882 = vst [vmem:[#allocation56_spill] sm:$0xff] %v5716_v53  ;;  %v5718_v6 = vpop.f32.mrf.mxu3 }
 0x1ae   : > { %7883 = vst [vmem:[#allocation57_spill] sm:$0xff] %v5718_v6 }
 0x1b0   : > { %1032 = vrot.lane.b32.xlu0 %v1031_v41, %s5067_s15 }
 0x1f7   : > { %v1051_v41 = vpop.permute.xlu2 %1050 }
 0x1f8   : > { %v1057_v33 = vsel %vm7726_vm1, %v1047_v25, %v1051_v41 }
 0x1f9   : > { %v5721_v37 = vperm.slane %v1057_v33, 0  ;;  %v5735_v33 = vpop.f32.mrf.mxu0 }
 0x1fa   : > { %7886 = vst [vmem:[#allocation60_spill] sm:$0xff] %v5735_v33 }
 0x1fb   : > { %7884 = vst [vmem:[#allocation58_spill] sm:$0xff] %v5721_v37  ;;  %v1065_v10 = vadd.f32 %v5721_v37, %v5689_v39  ;;  %v1069_v41 = vadd.f32 %v5721_v37, %v5695_v26  ;;  %v1077_v13 = vadd.f32 %v5721_v37, %v5707_v35 }
 0x1fd   : > { %v1129_v23 = vmul.f32 0.2, %v1065_v10  ;;  %vm1097_vm2 = vcmp.gt.f32.partialorder %v1065_v10, 0.0  ;;  %vm1101_vm3 = vcmp.gt.f32.partialorder %v1069_v41, 0.0  ;;  %v1133_v59 = vmul.f32 0.2, %v1069_v41 }
 0x1fe   : > { %vm1109_vm5 = vcmp.gt.f32.partialorder %v1077_v13, 0.0  ;;  %v1141_v63 = vmul.f32 0.2, %v1077_v13 }
 0x1ff   : > { %v1161_v28 = vsel %vm1097_vm2, %v1065_v10, %v1129_v23  ;;  %v1165_v17 = vsel %vm1101_vm3, %v1069_v41, %v1133_v59 }
 0x20f   : > { %v1192_v7 = vpop.xlane.xlu0 %1191  ;;  %v1039_v46 = vpop.permute.xlu1 %1038 }
 0x210   : > { %v1193_v11 = vrot.slane %v1192_v7, 4  ;;  %v1055_v48 = vsel %vm7726_vm1, %v1035_v31, %v1039_v46  ;;  %v5741_v46 = vpop.f32.mrf.mxu2  ;;  %v5743_v31 = vpop.f32.mrf.mxu3 }
 0x211   : > { %v5726_v55 = vperm.slane %v1055_v48, 0  ;;  %v1073_v48 = vadd.f32 %v5721_v37, %v5701_v0  ;;  %7887 = vst [vmem:[#allocation61_spill] sm:$0xff] %v5741_v46 }
 0x212   : > { %v1194_v25 = vmax.f32 %v1192_v7, %v1193_v11  ;;  %7888 = vst [vmem:[#allocation62_spill] sm:$0xff] %v5743_v31 }
 0x213   : > { %7885 = vst [vmem:[#allocation59_spill] sm:$0xff] %v5726_v55  ;;  %v1063_v11 = vadd.f32 %v5726_v55, %v5691_v42  ;;  %v1067_v7 = vadd.f32 %v5726_v55, %v5697_v27  ;;  %v1137_v29 = vmul.f32 0.2, %v1073_v48  ;;  %vm1105_vm4 = vcmp.gt.f32.partialorder %v1073_v48, 0.0 }
 0x214   : > { %v1195_v57 = vrot.slane %v1194_v25, 2  ;;  %v5782_v10 = vadd.f32 %v5726_v55, %v5703_v8 }
 0x215   : > { %v1131_v1 = vmul.f32 0.2, %v1067_v7  ;;  %vm1095_vm6 = vcmp.gt.f32.partialorder %v1063_v11, 0.0  ;;  %vm1099_vm7 = vcmp.gt.f32.partialorder %v1067_v7, 0.0  ;;  %v1169_v50 = vsel %vm1105_vm4, %v1073_v48, %v1137_v29 }
 0x216   : > { %v1196_v58 = vmax.f32 %v1194_v25, %v1195_v57  ;;  %v5769_v57 = vld [vmem:[%s5733_s0 + $0x10] sm:$0xff]  ;;  %v1127_v25 = vmul.f32 0.2, %v1063_v11  ;;  %v5797_v29 = vadd.f32 %v5726_v55, %v5709_v51 }
 0x217   : > { %v1045_v24 = vpop.permute.xlu1 %1044  ;;  %7894 = vst [vmem:[#allocation68_spill] sm:$0xff] %v5769_v57  ;;  %v1163_v41 = vsel %vm1099_vm7, %v1067_v7, %v1131_v1 }
 0x218   : > { %v1197_v47 = vrot.slane %v1196_v58, 1  ;;  %v1056_v38 = vsel %vm7726_vm1, %v1041_v5, %v1045_v24  ;;  %v1173_v24 = vsel %vm1109_vm5, %v1077_v13, %v1141_v63  ;;  %v5785_v5 = vpop.f32.mrf.mxu0  ;;  %v1159_v59 = vsel %vm1095_vm6, %v1063_v11, %v1127_v25  ;;  %v5799_v48 = vpop.f32.mrf.mxu2 }
 0x219   : > { %7895 = vst [vmem:[#allocation69_spill] sm:$0xff] %v5785_v5  ;;  %v5787_v23 = vperm.slane %v1056_v38, 0  ;;  %v5801_v18 = vpop.f32.mrf.mxu3  ;;  %v7901_v13 = vunpack.c.h.bf16 %v5752_v30  ;;  %v7902_v38 = vunpack.c.h.bf16 %v5755_v52  ;;  %v7903_v11 = vunpack.c.h.bf16 %v5760_v19 }
 0x21a   : > { %7899 = vst [vmem:[#allocation73_spill] sm:$0xff] %v5799_v48  ;;  %v1198_v21 = vmax.f32 %v1196_v58, %v1197_v47  ;;  %v7905_v25 = vunpack.c.h.bf16 %v5763_v61  ;;  %v5821_v3 = vadd.f32 %v1159_v59, %v7907_v4  ;;  %v7908_v58 = vunpack.c.h.bf16 %v5769_v57 }
 0x21b   : > { %7896 = vst [vmem:[#allocation70_spill] sm:$0xff] %v5787_v23  ;;  %v5805_v63 = vadd.f32 %v1161_v28, %v7901_v13  ;;  %v5809_v1 = vadd.f32 %v1165_v17, %v7902_v38  ;;  %v5813_v7 = vadd.f32 %v1169_v50, %v7903_v11  ;;  %v5831_v50 = vadd.f32 %v5787_v23, %v5693_v43 }
 0x21c   : > { %7900 = vst [vmem:[#allocation74_spill] sm:$0xff] %v5801_v18  ;;  %v5817_v9 = vadd.f32 %v1173_v24, %v7905_v25  ;;  %v5825_v47 = vadd.f32 %v1163_v41, %v7908_v58  ;;  %v5835_v24 = vadd.f32 %v5787_v23, %v5699_v62  ;;  %v5838_v13 = vmul.f32 0.2, %v5782_v10 }
 0x21d   : > { %7904 = vst [vmem:[#allocation75_spill] sm:$0xff] %v5813_v7  ;;  %v5841_v4 = vmul.f32 0.2, %v5797_v29  ;;  %v5844_v59 = vadd.f32 %v1198_v21, %v5655_v2  ;;  %v5847_v41 = vadd.f32 %v1198_v21, %v5691_v42  ;;  %v5850_v38 = vadd.f32 %v1198_v21, %v5693_v43 }
 0x21e   : > { %7906 = vst [vmem:[#allocation76_spill] sm:$0xff] %v5817_v9  ;;  %v5853_v11 = vadd.f32 %v1198_v21, %v5689_v39  ;;  %v5856_v25 = vadd.f32 %v1198_v21, %v5663_v20  ;;  %v5859_v58 = vadd.f32 %v1198_v21, %v5697_v27  ;;  %v5862_v17 = vadd.f32 %v1198_v21, %v5699_v62 }
 0x21f   : > { %7909 = vst [vmem:[#allocation77_spill] sm:$0xff] %v5831_v50  ;;  %v5865_v28 = vadd.f32 %v1198_v21, %v5695_v26  ;;  %v5868_v42 = vadd.f32 %v1198_v21, %v5665_v32  ;;  %v5871_v43 = vadd.f32 %v1198_v21, %v5703_v8  ;;  %v5874_v39 = vadd.f32 %v1198_v21, %v5705_v14 }
 0x220   : > { %7910 = vst [vmem:[#allocation78_spill] sm:$0xff] %v5835_v24  ;;  %v5877_v15 = vadd.f32 %v1198_v21, %v5701_v0  ;;  %v5880_v27 = vadd.f32 %v1198_v21, %v5667_v49  ;;  %v5883_v62 = vadd.f32 %v1198_v21, %v5709_v51  ;;  %v5886_v26 = vadd.f32 %v1198_v21, %v5711_v40  ;;  %v5903_v51 = vpop.f32.mrf.mxu0  ;;  %v5917_v32 = vpop.f32.mrf.mxu2 }
 0x221   : > { %7911 = vst [vmem:[#allocation79_spill] sm:$0xff] %v5838_v13  ;;  %v5889_v54 = vadd.f32 %v1198_v21, %v5707_v35  ;;  %v5892_v8 = vadd.f32 %v1198_v21, %v5669_v16  ;;  %v5895_v37 = vadd.f32 %v1198_v21, %v5716_v53  ;;  %v5898_v0 = vadd.f32 %v1198_v21, %v5718_v6  ;;  %v5919_v6 = vpop.f32.mrf.mxu3 }
 0x222   : > { %7912 = vst [vmem:[#allocation80_spill] sm:$0xff] %v5841_v4  ;;  %v5901_v55 = vadd.f32 %v1198_v21, %v5714_v60  ;;  %v5906_v49 = vadd.f32 %v1198_v21, %v5671_v44  ;;  %v5909_v35 = vadd.f32 %v1198_v21, %v5741_v46  ;;  %v5912_v16 = vadd.f32 %v1198_v21, %v5743_v31 }
 0x223   : > { %7913 = vst [vmem:[#allocation81_spill] sm:$0xff] %v5903_v51  ;;  %v5915_v53 = vadd.f32 %v1198_v21, %v5735_v33  ;;  %v5922_v60 = vadd.f32 %v1198_v21, %v5673_v45  ;;  %v5925_v40 = vadd.f32 %v1198_v21, %v5799_v48  ;;  %v5928_v44 = vadd.f32 %v1198_v21, %v5801_v18  ;;  %v1033_v18 = vpop.permute.xlu0 %1032 }
 0x224   : > { %7914 = vst [vmem:[#allocation82_spill] sm:$0xff] %v5917_v32  ;;  %v5931_v46 = vadd.f32 %v1198_v21, %v5785_v5  ;;  %v5934_v31 = vadd.f32 %v1198_v21, %v5675_v36  ;;  %v5937_v33 = vadd.f32 %v1198_v21, %v5917_v32  ;;  %v5940_v23 = vadd.f32 %v1198_v21, %v5919_v6 }
 0x225   : > { %7915 = vst [vmem:[#allocation83_spill] sm:$0xff] %v5919_v6  ;;  %v5943_v45 = vadd.f32 %v1198_v21, %v5903_v51  ;;  %vm1231_vm8 = vcmp.gt.f32.partialorder %v5844_v59, 0.0  ;;  %vm1232_vm9 = vcmp.gt.f32.partialorder %v5847_v41, 0.0  ;;  %vm1233_vm10 = vcmp.gt.f32.partialorder %v5850_v38, 0.0 }
 0x226   : > { %7916 = vst [vmem:[#allocation84_spill] sm:$0xff] %v5922_v60  ;;  %vm1234_vm11 = vcmp.gt.f32.partialorder %v5853_v11, 0.0  ;;  %vm1235_vm12 = vcmp.gt.f32.partialorder %v5856_v25, 0.0  ;;  %vm1236_vm13 = vcmp.gt.f32.partialorder %v5859_v58, 0.0  ;;  %vm1237_vm14 = vcmp.gt.f32.partialorder %v5862_v17, 0.0 }
 0x227   : > { %vm1239_vm0 = vcmp.gt.f32.partialorder %v5868_v42, 0.0  ;;  %vm1240_vm2 = vcmp.gt.f32.partialorder %v5871_v43, 0.0  ;;  %vm1241_vm3 = vcmp.gt.f32.partialorder %v5874_v39, 0.0  ;;  %v1263_v21 = vmul.f32 0.2, %v5844_v59 }
 0x228   : > { %v1264_v36 = vmul.f32 0.2, %v5847_v41  ;;  %v1265_v6 = vmul.f32 0.2, %v5850_v38  ;;  %v1266_v51 = vmul.f32 0.2, %v5853_v11  ;;  %v5968_v32 = vsel %vm7726_vm1, %v5677_v34, %v1033_v18 }
 0x229   : > { %v1267_v5 = vmul.f32 0.2, %v5856_v25  ;;  %vm1249_vm6 = vcmp.gt.f32.partialorder %v5898_v0, 0.0  ;;  %v1268_v48 = vmul.f32 0.2, %v5859_v58  ;;  %vm1254_vm5 = vcmp.gt.f32.partialorder %v5915_v53, 0.0 }
 0x22a   : > { %v1269_v14 = vmul.f32 0.2, %v5862_v17  ;;  %v1270_v61 = vmul.f32 0.2, %v5865_v28  ;;  %v1271_v18 = vmul.f32 0.2, %v5868_v42  ;;  %v5988_v7 = vsel %vm1231_vm8, %v5844_v59, %v1263_v21 }
 0x22b   : > { %v1272_v34 = vmul.f32 0.2, %v5871_v43  ;;  %v1273_v9 = vmul.f32 0.2, %v5874_v39  ;;  %7917 = vst [vmem:[#allocation85_spill] sm:$0xff] %v5988_v7  ;;  %vm1257_vm15 = vcmp.gt.f32.partialorder %v5928_v44, 0.0  ;;  %v1296_v4 = vsel %vm1232_vm9, %v5847_v41, %v1264_v36 }
 0x22c   : > { %vm1258_vm1 = vcmp.gt.f32.partialorder %v5931_v46, 0.0  ;;  %vm1260_vm4 = vcmp.gt.f32.partialorder %v5937_v33, 0.0  ;;  %v1274_v19 = vmul.f32 0.2, %v5877_v15  ;;  %v1275_v12 = vmul.f32 0.2, %v5880_v27 }
 0x22d   : > { %v1276_v56 = vmul.f32 0.2, %v5883_v62  ;;  %vm1261_vm8 = vcmp.gt.f32.partialorder %v5940_v23, 0.0  ;;  %vm1262_vm7 = vcmp.gt.f32.partialorder %v5943_v45, 0.0  ;;  %v1277_v59 = vmul.f32 0.2, %v5886_v26 }
 0x22e   : > { %v1278_v21 = vmul.f32 0.2, %v5889_v54  ;;  %v1279_v7 = vmul.f32 0.2, %v5892_v8  ;;  %v6008_v13 = vsel %vm1233_vm10, %v5850_v38, %v1265_v6  ;;  %v1280_v20 = vmul.f32 0.2, %v5895_v37 }
 0x22f   : > { %7918 = vst [vmem:[#allocation86_spill] sm:$0xff] %v6008_v13  ;;  %v1281_v2 = vmul.f32 0.2, %v5898_v0  ;;  %v1282_v36 = vmul.f32 0.2, %v5901_v55  ;;  %v1298_v41 = vsel %vm1234_vm11, %v5853_v11, %v1266_v51  ;;  %v6022_v6 = vsel %vm1235_vm12, %v5856_v25, %v1267_v5 }
 0x230   : > { %v1283_v30 = vmul.f32 0.2, %v5906_v49  ;;  %v1284_v57 = vmul.f32 0.2, %v5909_v35  ;;  %v1285_v22 = vmul.f32 0.2, %v5912_v16  ;;  %v1300_v11 = vsel %vm1236_vm13, %v5859_v58, %v1268_v48 }
 0x231   : > { %v1286_v38 = vmul.f32 0.2, %v5915_v53  ;;  %v6026_v13 = vmul.f32 0.2, %v5922_v60  ;;  %v1288_v24 = vmul.f32 0.2, %v5925_v40  ;;  %v6040_v5 = vsel %vm1237_vm14, %v5862_v17, %v1269_v14 }
 0x232   : > { %v1289_v51 = vmul.f32 0.2, %v5928_v44  ;;  %v1290_v50 = vmul.f32 0.2, %v5931_v46  ;;  %v6035_v52 = vmul.f32 0.2, %v5934_v31  ;;  %v6051_v58 = vsel %vm1239_vm0, %v5868_v42, %v1271_v18 }
 0x233   : > { %7919 = vst [vmem:[#allocation87_spill] sm:$0xff] %v6026_v13  ;;  %v1292_v25 = vmul.f32 0.2, %v5937_v33  ;;  %v1293_v13 = vmul.f32 0.2, %v5940_v23  ;;  %vm7921_vm9 = vcmp.gt.f32.partialorder %v5865_v28, 0.0  ;;  %v6056_v14 = vsel %vm1240_vm2, %v5871_v43, %v1272_v34 }
 0x234   : > { %7920 = vst [vmem:[#allocation88_spill] sm:$0xff] %v6035_v52  ;;  %v1294_v60 = vmul.f32 0.2, %v5943_v45  ;;  %v1302_v48 = vsel %vm7921_vm9, %v5865_v28, %v1270_v61  ;;  %v6061_v17 = vsel %vm1241_vm3, %v5874_v39, %v1273_v9  ;;  %vm7922_vm10 = vcmp.gt.f32.partialorder %v5877_v15, 0.0  ;;  %v7936_v42 = vld [vmem:[#allocation78_spill] sm:$0xff]  ;;  %v7937_v39 = vld [vmem:[#allocation67_spill] sm:$0xff] }
 0x235   : > { %v6066_v52 = vsel %vm7922_vm10, %v5877_v15, %v1274_v19  ;;  %vm1103_vm11 = vcmp.gt.f32.partialorder %v5782_v10, 0.0  ;;  %vm1107_vm12 = vcmp.gt.f32.partialorder %v5797_v29, 0.0  ;;  %vm7923_vm13 = vcmp.gt.f32.partialorder %v5880_v27, 0.0 }
 0x236   : > { %v6073_v61 = vsel %vm7923_vm13, %v5880_v27, %v1275_v12  ;;  %vm7924_vm14 = vcmp.gt.f32.partialorder %v5883_v62, 0.0  ;;  %vm7925_vm0 = vcmp.gt.f32.partialorder %v5886_v26, 0.0  ;;  %vm7926_vm2 = vcmp.gt.f32.partialorder %v5889_v54, 0.0  ;;  %v7939_v27 = vld [vmem:[#allocation63_spill] sm:$0xff] }
 0x237   : > { %v6078_v28 = vsel %vm7924_vm14, %v5883_v62, %v1276_v56  ;;  %v6083_v9 = vsel %vm7925_vm0, %v5886_v26, %v1277_v59  ;;  %v6088_v19 = vsel %vm7926_vm2, %v5889_v54, %v1278_v21  ;;  %vm7927_vm3 = vcmp.gt.f32.partialorder %v5892_v8, 0.0  ;;  %v7943_v59 = vld [vmem:[#allocation79_spill] sm:$0xff] }
 0x238   : > { %v6093_v15 = vsel %vm7927_vm3, %v5892_v8, %v1279_v7  ;;  %vm7928_vm9 = vcmp.gt.f32.partialorder %v5895_v37, 0.0  ;;  %v6103_v12 = vsel %vm1249_vm6, %v5898_v0, %v1281_v2  ;;  %vm7929_vm10 = vcmp.gt.f32.partialorder %v5901_v55, 0.0  ;;  %v7941_v8 = vld [vmem:[#allocation45_spill] sm:$0xff] }
 0x239   : > { %v6098_v56 = vsel %vm7928_vm9, %v5895_v37, %v1280_v20  ;;  %v6108_v54 = vsel %vm7929_vm10, %v5901_v55, %v1282_v36  ;;  %vm7930_vm13 = vcmp.gt.f32.partialorder %v5906_v49, 0.0  ;;  %vm7931_vm14 = vcmp.gt.f32.partialorder %v5909_v35, 0.0  ;;  %v7944_v36 = vld [vmem:[#allocation80_spill] sm:$0xff] }
 0x23a   : > { %v6113_v7 = vsel %vm7930_vm13, %v5906_v49, %v1283_v30  ;;  %v6118_v37 = vsel %vm7931_vm14, %v5909_v35, %v1284_v57  ;;  %vm7932_vm0 = vcmp.gt.f32.partialorder %v5912_v16, 0.0  ;;  %v6128_v55 = vsel %vm1254_vm5, %v5915_v53, %v1286_v38  ;;  %v7942_v35 = vld [vmem:[#allocation46_spill] sm:$0xff] }
 0x23b   : > { %v6123_v2 = vsel %vm7932_vm0, %v5912_v16, %v1285_v22  ;;  %vm7933_vm6 = vcmp.gt.f32.partialorder %v5925_v40, 0.0  ;;  %v6138_v20 = vsel %vm1257_vm15, %v5928_v44, %v1289_v51  ;;  %v6143_v22 = vsel %vm1258_vm1, %v5931_v46, %v1290_v50  ;;  %v7934_v50 = vld [vmem:[#allocation64_spill] sm:$0xff] }
 0x23c   : > { %v6133_v30 = vsel %vm7933_vm6, %v5925_v40, %v1288_v24  ;;  %v6148_v53 = vsel %vm1260_vm4, %v5937_v33, %v1292_v25  ;;  %v6153_v49 = vsel %vm1261_vm8, %v5940_v23, %v1293_v13  ;;  %v6158_v16 = vsel %vm1262_vm7, %v5943_v45, %v1294_v60  ;;  %v7935_v13 = vld [vmem:[#allocation77_spill] sm:$0xff] }
 0x23d   : > { %v6161_v44 = vperm.slane %v5968_v32, 0  ;;  %v1360_v40 = vsub.f32 %v5821_v3, %v1296_v4  ;;  %v1364_v46 = vsub.f32 %v5825_v47, %v1300_v11  ;;  %v1362_v33 = vsub.f32 %v5805_v63, %v1298_v41  ;;  %v7945_v11 = vld [vmem:[#allocation86_spill] sm:$0xff] }
 0x23e   : > { %v1366_v57 = vsub.f32 %v5809_v1, %v1302_v48  ;;  %v7765_v24 = vunpack.c.l.bf16 %v7934_v50  ;;  %vm1096_vm1 = vcmp.gt.f32.partialorder %v7935_v13, 0.0  ;;  %vm1100_vm15 = vcmp.gt.f32.partialorder %v7936_v42, 0.0  ;;  %v7938_v1 = vld [vmem:[#allocation68_spill] sm:$0xff] }
 0x23f   : > { %v1393_v23 = vmul.f32 1.442695, %v1360_v40  ;;  %v1128_v60 = vmul.f32 0.2, %v7935_v13  ;;  %v1401_v45 = vmul.f32 1.442695, %v1364_v46  ;;  %v7767_v3 = vunpack.c.l.bf16 %v7937_v39 }
 0x240   : > { %v1397_v32 = vmul.f32 1.442695, %v1362_v33  ;;  %v1405_v43 = vmul.f32 1.442695, %v1366_v57  ;;  %v1132_v47 = vmul.f32 0.2, %v7936_v42  ;;  %v7766_v4 = vunpack.c.l.bf16 %v7938_v1 }
 0x241   : > { %4667 = vpow2.f32 %v1393_v23  ;;  %v1160_v63 = vsel %vm1096_vm1, %v7935_v13, %v1128_v60  ;;  %v7940_v62 = vunpack.c.l.bf16 %v7939_v27  ;;  %v1062_v0 = vadd.f32 %v6161_v44, %v7941_v8  ;;  %v7946_v40 = vld [vmem:[#allocation71_spill] sm:$0xff]  ;;  %v7948_v23 = vld [vmem:[#allocation72_spill] sm:$0xff] }
 0x242   : > { %4669 = vpow2.f32 %v1401_v45  ;;  %v1066_v18 = vadd.f32 %v6161_v44, %v7942_v35  ;;  %v1164_v34 = vsel %vm1100_vm15, %v7936_v42, %v1132_v47  ;;  %v1167_v21 = vsel %vm1103_vm11, %v5782_v10, %v7943_v59 }
 0x243   : > { %v1329_v26 = vadd.f32 %v1160_v63, %v7940_v62  ;;  %4671 = vpow2.f32 %v1397_v32  ;;  %v1171_v41 = vsel %vm1107_vm12, %v5797_v29, %v7944_v36  ;;  %v1333_v38 = vadd.f32 %v1164_v34, %v7765_v24  ;;  %v7950_v29 = vld [vmem:[#allocation75_spill] sm:$0xff]  ;;  %v7951_v63 = vld [vmem:[#allocation76_spill] sm:$0xff] }
 0x244   : > { %4673 = vpow2.f32 %v1405_v43  ;;  %vm1094_vm4 = vcmp.gt.f32.partialorder %v1062_v0, 0.0  ;;  %vm1098_vm5 = vcmp.gt.f32.partialorder %v1066_v18, 0.0  ;;  %v1126_v25 = vmul.f32 0.2, %v1062_v0 }
 0x245   : > { %v1361_v51 = vsub.f32 %v1329_v26, %v7945_v11  ;;  %v1130_v48 = vmul.f32 0.2, %v1066_v18  ;;  %v7947_v46 = vunpack.c.h.bf16 %v7946_v40  ;;  %v1365_v10 = vsub.f32 %v1333_v38, %v6040_v5 }
 0x246   : > { %v7949_v13 = vunpack.c.h.bf16 %v7948_v23  ;;  %v1370_v60 = vsub.f32 %v7950_v29, %v6066_v52  ;;  %v1158_v32 = vsel %vm1094_vm4, %v1062_v0, %v1126_v25  ;;  %v1374_v62 = vsub.f32 %v7951_v63, %v6088_v19 }
 0x247   : > { %v1336_v33 = vadd.f32 %v1167_v21, %v7947_v46  ;;  %v1395_v57 = vmul.f32 1.442695, %v1361_v51  ;;  %v4668_v45 = vpop.eup %4667  ;;  %v1162_v43 = vsel %vm1098_vm5, %v1066_v18, %v1130_v48  ;;  %v1403_v8 = vmul.f32 1.442695, %v1365_v10  ;;  %v7952_v21 = vld [vmem:[#allocation85_spill] sm:$0xff]  ;;  %v7956_v10 = vld [vmem:[#allocation70_spill] sm:$0xff] }
 0x248   : > { %v1340_v42 = vadd.f32 %v1171_v41, %v7949_v13  ;;  %v4670_v26 = vpop.eup %4669  ;;  %v1327_v5 = vadd.f32 %v1158_v32, %v7767_v3  ;;  %v1331_v35 = vadd.f32 %v1162_v43, %v7766_v4  ;;  %v1413_v18 = vmul.f32 1.442695, %v1370_v60  ;;  %v7953_v51 = vld [vmem:[#allocation65_spill] sm:$0xff]  ;;  %v7957_v13 = vld [vmem:[#allocation54_spill] sm:$0xff]  ;;  %v7958_v32 = vld [vmem:[#allocation47_spill] sm:$0xff] }
 0x249   : > { %v1368_v47 = vsub.f32 %v1336_v33, %v6056_v14  ;;  %4675 = vpow2.f32 %v1395_v57  ;;  %v4672_v34 = vpop.eup %4671  ;;  %v6207_v59 = vpack.c.bf16 %v4670_v26, %v4668_v45  ;;  %v1421_v41 = vmul.f32 1.442695, %v1374_v62  ;;  %v6229_v26 = vld [vmem:[%s5733_s0 + $0x40] sm:$0xff] }
 0x24a   : > { %v1372_v52 = vsub.f32 %v1340_v42, %v6078_v28  ;;  %v4674_v14 = vpop.eup %4673  ;;  %4677 = vpow2.f32 %v1403_v8  ;;  %v1359_v19 = vsub.f32 %v1327_v5, %v7952_v21  ;;  %v1363_v36 = vsub.f32 %v1331_v35, %v6022_v6  ;;  %v7954_v28 = vld [vmem:[#allocation66_spill] sm:$0xff]  ;;  %v7955_v6 = vld [vmem:[#allocation53_spill] sm:$0xff]  ;;  %7960 = vst [vmem:[#allocation77_spill] sm:$0xff] %v6229_v26  ;;  %v6232_v8 = vld [vmem:[%s5733_s0 + $0x50] sm:$0xff] }
 0x24b   : > { %v1409_v0 = vmul.f32 1.442695, %v1368_v47  ;;  %1700 = vmatmul.bf16.vlgmr.msrb.gmra.mxu3 %v6207_v59  ;;  %v6213_v38 = vpack.c.bf16 %v4674_v14, %v4672_v34  ;;  %v7752_v25 = vunpack.c.l.bf16 %v7953_v51  ;;  %v7747_v33 = vunpack.c.l.bf16 %v7954_v28  ;;  %v7959_v47 = vld [vmem:[#allocation48_spill] sm:$0xff]  ;;  %7961 = vst [vmem:[#allocation78_spill] sm:$0xff] %v6232_v8 }
 0x24c   : > { %v1417_v11 = vmul.f32 1.442695, %v1372_v52  ;;  %v1391_v48 = vmul.f32 1.442695, %v1359_v19  ;;  %v1399_v46 = vmul.f32 1.442695, %v1363_v36  ;;  %v1072_v57 = vadd.f32 %v7956_v10, %v7955_v6 }
 0x24d   : > { %4679 = vpow2.f32 %v1409_v0  ;;  %1758 = vmatmul.bf16.vlgmr.msra.gmra.mxu0 %v6213_v38  ;;  %v1076_v42 = vadd.f32 %v7956_v10, %v7957_v13  ;;  %v7764_v29 = vunpack.c.l.bf16 %v7946_v40  ;;  %v7753_v45 = vunpack.c.l.bf16 %v7948_v23 }
 0x24e   : > { %4681 = vpow2.f32 %v1413_v18  ;;  %v1070_v43 = vadd.f32 %v6161_v44, %v7958_v32  ;;  %v1074_v63 = vadd.f32 %v6161_v44, %v7959_v47  ;;  %vm1104_vm7 = vcmp.gt.f32.partialorder %v1072_v57, 0.0 }
 0x24f   : > { %4683 = vpow2.f32 %v1417_v11  ;;  %v4676_v60 = vpop.eup %4675  ;;  %vm1108_vm8 = vcmp.gt.f32.partialorder %v1076_v42, 0.0  ;;  %v1136_v62 = vmul.f32 0.2, %v1072_v57  ;;  %v1140_v35 = vmul.f32 0.2, %v1076_v42 }
 0x250   : > { %4685 = vpow2.f32 %v1391_v48  ;;  %v4678_v5 = vpop.eup %4677  ;;  %vm1102_vm11 = vcmp.gt.f32.partialorder %v1070_v43, 0.0  ;;  %vm1106_vm12 = vcmp.gt.f32.partialorder %v1074_v63, 0.0  ;;  %v1134_v18 = vmul.f32 0.2, %v1070_v43 }
 0x251   : > { %4687 = vpow2.f32 %v1399_v46  ;;  %v6234_v52 = vpack.c.bf16 %v4678_v5, %v4676_v60  ;;  %v1168_v0 = vsel %vm1104_vm7, %v1072_v57, %v1136_v62  ;;  %v1138_v14 = vmul.f32 0.2, %v1074_v63  ;;  %v7962_v57 = vld [vmem:[#allocation56_spill] sm:$0xff]  ;;  %v7963_v60 = vld [vmem:[#allocation59_spill] sm:$0xff] }
 0x252   : > { %4689 = vpow2.f32 %v1421_v41  ;;  %v1172_v19 = vsel %vm1108_vm8, %v1076_v42, %v1140_v35  ;;  %v1337_v36 = vadd.f32 %v1168_v0, %v7752_v25  ;;  %v7746_v11 = vunpack.c.h.bf16 %v6229_v26  ;;  %v6329_v25 = vld [vmem:[%s5733_s0 + $0x78] sm:$0xff] }
 0x253   : > { %v4680_v34 = vpop.eup %4679  ;;  %v7745_v48 = vunpack.c.h.bf16 %v6232_v8  ;;  %1729 = vmatmul.bf16.vlgmr.msra.gmra.mxu1 %v6234_v52  ;;  %v1341_v41 = vadd.f32 %v1172_v19, %v7747_v33  ;;  %v1166_v6 = vsel %vm1102_vm11, %v1070_v43, %v1134_v18  ;;  %v1170_v13 = vsel %vm1106_vm12, %v1074_v63, %v1138_v14  ;;  %v7964_v63 = vld [vmem:[#allocation61_spill] sm:$0xff]  ;;  %7978 = vst [vmem:[#allocation75_spill] sm:$0xff] %v6329_v25 }
 0x254   : > { %v4682_v21 = vpop.eup %4681  ;;  %v1079_v32 = vadd.f32 %v7963_v60, %v7962_v57  ;;  %v1369_v62 = vsub.f32 %v1337_v36, %v6061_v17  ;;  %v1335_v5 = vadd.f32 %v1166_v6, %v7764_v29  ;;  %v1339_v35 = vadd.f32 %v1170_v13, %v7753_v45  ;;  %v6260_v6 = vld [vmem:[%s5733_s0 + $0x48] sm:$0xff] }
 0x255   : > { %v4684_v46 = vpop.eup %4683  ;;  %v1373_v43 = vsub.f32 %v1341_v41, %v6083_v9  ;;  %v1083_v18 = vadd.f32 %v7963_v60, %v7964_v63  ;;  %7965 = vst [vmem:[#allocation45_spill] sm:$0xff] %v6260_v6  ;;  %v6265_v41 = vld [vmem:[%s5733_s0 + $0x58] sm:$0xff] }
 0x256   : > { %v4686_v42 = vpop.eup %4685  ;;  %v6245_v47 = vpack.c.bf16 %v4684_v46, %v4680_v34  ;;  %vm1111_vm2 = vcmp.gt.f32.partialorder %v1079_v32, 0.0  ;;  %v1143_v14 = vmul.f32 0.2, %v1079_v32  ;;  %v1411_v46 = vmul.f32 1.442695, %v1369_v62  ;;  %7966 = vst [vmem:[#allocation46_spill] sm:$0xff] %v6265_v41 }
 0x257   : > { %v4688_v0 = vpop.eup %4687  ;;  %v1367_v17 = vsub.f32 %v1335_v5, %v6051_v58  ;;  %v1371_v36 = vsub.f32 %v1339_v35, %v6073_v61  ;;  %v1419_v57 = vmul.f32 1.442695, %v1373_v43  ;;  %vm1115_vm3 = vcmp.gt.f32.partialorder %v1083_v18, 0.0  ;;  %v7968_v43 = vld [vmem:[#allocation58_spill] sm:$0xff] }
 0x258   : > { %v4690_v19 = vpop.eup %4689  ;;  %v6255_v34 = vpack.c.bf16 %v4688_v0, %v4686_v42  ;;  %v1147_v9 = vmul.f32 0.2, %v1083_v18  ;;  %4691 = vpow2.f32 %v1411_v46  ;;  %v1175_v62 = vsel %vm1111_vm2, %v1079_v32, %v1143_v14  ;;  %v7967_v0 = vld [vmem:[#allocation55_spill] sm:$0xff] }
 0x259   : > { %v6262_v13 = vpack.c.bf16 %v4690_v19, %v4682_v21  ;;  %v1407_v63 = vmul.f32 1.442695, %v1367_v17  ;;  %v1415_v42 = vmul.f32 1.442695, %v1371_v36  ;;  %4693 = vpow2.f32 %v1419_v57 }
 0x25a   : > { %1671 = vmatmul.bf16.vlgmr.msrb.gmra.mxu2 %v6255_v34  ;;  %v1179_v58 = vsel %vm1115_vm3, %v1083_v18, %v1147_v9  ;;  %v1344_v61 = vadd.f32 %v1175_v62, %v7746_v11  ;;  %v7749_v21 = vunpack.c.h.bf16 %v6260_v6  ;;  %v7748_v35 = vunpack.c.h.bf16 %v6265_v41  ;;  %v7969_v18 = vld [vmem:[#allocation60_spill] sm:$0xff]  ;;  %v7970_v62 = vld [vmem:[#allocation57_spill] sm:$0xff] }
 0x25b   : > { %4695 = vpow2.f32 %v1407_v63  ;;  %v1348_v5 = vadd.f32 %v1179_v58, %v7745_v48  ;;  %v1081_v19 = vadd.f32 %v7968_v43, %v7967_v0  ;;  %1705 = vmatmul.bf16.gmra.mxu3 %v6245_v47  ;;  %v1085_v14 = vadd.f32 %v7968_v43, %v7969_v18  ;;  %v7971_v0 = vld [vmem:[#allocation62_spill] sm:$0xff] }
 0x25c   : > { %4697 = vpow2.f32 %v1415_v42  ;;  %v1376_v32 = vsub.f32 %v1344_v61, %v6098_v56  ;;  %v7751_v46 = vunpack.c.l.bf16 %v6260_v6  ;;  %v7750_v57 = vunpack.c.l.bf16 %v6265_v41 }
 0x25d   : > { %v1380_v17 = vsub.f32 %v1348_v5, %v6118_v37  ;;  %vm1113_vm9 = vcmp.gt.f32.partialorder %v1081_v19, 0.0  ;;  %v1145_v36 = vmul.f32 0.2, %v1081_v19  ;;  %1763 = vmatmul.bf16.gmra.mxu0 %v6262_v13  ;;  %vm1117_vm10 = vcmp.gt.f32.partialorder %v1085_v14, 0.0 }
 0x25e   : > { %v1425_v9 = vmul.f32 1.442695, %v1376_v32  ;;  %v1149_v63 = vmul.f32 0.2, %v1085_v14  ;;  %v1080_v42 = vadd.f32 %v7956_v10, %v7970_v62  ;;  %v4692_v56 = vpop.eup %4691  ;;  %v1084_v18 = vadd.f32 %v7956_v10, %v7971_v0  ;;  %v7973_v0 = vld [vmem:[#allocation49_spill] sm:$0xff] }
 0x25f   : > { %v1433_v58 = vmul.f32 1.442695, %v1380_v17  ;;  %v1177_v61 = vsel %vm1113_vm9, %v1081_v19, %v1145_v36  ;;  %v7763_v37 = vunpack.c.l.bf16 %v6229_v26  ;;  %v4694_v5 = vpop.eup %4693  ;;  %v6297_v19 = vld [vmem:[%s5733_s0 + $0x60] sm:$0xff]  ;;  %vm1259_vm3 = vcmp.gt.f32.partialorder %v5934_v31, 0.0 }
 0x260   : > { %4699 = vpow2.f32 %v1425_v9  ;;  %v1181_v48 = vsel %vm1117_vm10, %v1085_v14, %v1149_v63  ;;  %v1346_v32 = vadd.f32 %v1177_v61, %v7749_v21  ;;  %vm1112_vm13 = vcmp.gt.f32.partialorder %v1080_v42, 0.0  ;;  %7972 = vst [vmem:[#allocation79_spill] sm:$0xff] %v6297_v19 }
 0x261   : > { %v4696_v11 = vpop.eup %4695  ;;  %v6292_v33 = vpack.c.bf16 %v4694_v5, %v4692_v56  ;;  %4701 = vpow2.f32 %v1433_v58  ;;  %v1350_v17 = vadd.f32 %v1181_v48, %v7748_v35  ;;  %vm1116_vm14 = vcmp.gt.f32.partialorder %v1084_v18, 0.0  ;;  %v7974_v5 = vld [vmem:[#allocation50_spill] sm:$0xff] }
 0x262   : > { %v4698_v36 = vpop.eup %4697  ;;  %v1378_v62 = vsub.f32 %v1346_v32, %v6108_v54  ;;  %v1144_v9 = vmul.f32 0.2, %v1080_v42  ;;  %v1148_v14 = vmul.f32 0.2, %v1084_v18  ;;  %v7762_v63 = vunpack.c.l.bf16 %v6232_v8  ;;  %v6311_v32 = vld [vmem:[%s5733_s0 + $0x70] sm:$0xff] }
 0x263   : > { %v6301_v61 = vpack.c.bf16 %v4698_v36, %v4696_v11  ;;  %v1382_v56 = vsub.f32 %v1350_v17, %v6128_v55  ;;  %v1078_v58 = vadd.f32 %v6161_v44, %v7973_v0  ;;  %v1082_v48 = vadd.f32 %v6161_v44, %v7974_v5  ;;  %1734 = vmatmul.bf16.gmra.mxu1 %v6292_v33  ;;  %v6322_v5 = vld [vmem:[%s5733_s0 + $0x68] sm:$0xff] }
 0x264   : > { %v1429_v35 = vmul.f32 1.442695, %v1378_v62  ;;  %v1176_v21 = vsel %vm1112_vm13, %v1080_v42, %v1144_v9  ;;  %v1180_v54 = vsel %vm1116_vm14, %v1084_v18, %v1148_v14  ;;  %7975 = vst [vmem:[#allocation80_spill] sm:$0xff] %v6311_v32  ;;  %v7759_v11 = vunpack.c.h.bf16 %v6297_v19 }
 0x265   : > { %v1437_v36 = vmul.f32 1.442695, %v1382_v56  ;;  %v1345_v55 = vadd.f32 %v1176_v21, %v7751_v46  ;;  %v1349_v17 = vadd.f32 %v1180_v54, %v7750_v57  ;;  %vm1110_vm0 = vcmp.gt.f32.partialorder %v1078_v58, 0.0  ;;  %7976 = vst [vmem:[#allocation86_spill] sm:$0xff] %v6322_v5  ;;  %v7977_v46 = vld [vmem:[#allocation73_spill] sm:$0xff] }
 0x266   : > { %v4700_v0 = vpop.eup %4699  ;;  %4703 = vpow2.f32 %v1429_v35  ;;  %vm1114_vm6 = vcmp.gt.f32.partialorder %v1082_v48, 0.0  ;;  %v1142_v62 = vmul.f32 0.2, %v1078_v58  ;;  %v1146_v42 = vmul.f32 0.2, %v1082_v48 }
 0x267   : > { %v4702_v18 = vpop.eup %4701  ;;  %4705 = vpow2.f32 %v1437_v36  ;;  %v1377_v9 = vsub.f32 %v1345_v55, %v6103_v12  ;;  %v1381_v14 = vsub.f32 %v1349_v17, %v6123_v2  ;;  %v7754_v56 = vunpack.c.h.bf16 %v6311_v32  ;;  %v7979_v55 = vld [vmem:[#allocation82_spill] sm:$0xff] }
 0x268   : > { %v6324_v21 = vpack.c.bf16 %v4702_v18, %v4700_v0  ;;  %v1174_v54 = vsel %vm1110_vm0, %v1078_v58, %v1142_v62  ;;  %v1178_v57 = vsel %vm1114_vm6, %v1082_v48, %v1146_v42  ;;  %v1087_v35 = vadd.f32 %v7963_v60, %v7977_v46 }
 0x269   : > { %v1427_v36 = vmul.f32 1.442695, %v1377_v9  ;;  %v1435_v45 = vmul.f32 1.442695, %v1381_v14  ;;  %v1343_v12 = vadd.f32 %v1174_v54, %v7763_v37  ;;  %v1347_v2 = vadd.f32 %v1178_v57, %v7762_v63 }
 0x26a   : > { %1676 = vmatmul.bf16.gmra.mxu2 %v6301_v61  ;;  %v1091_v17 = vadd.f32 %v7963_v60, %v7979_v55  ;;  %vm1119_vm1 = vcmp.gt.f32.partialorder %v1087_v35, 0.0  ;;  %v1151_v58 = vmul.f32 0.2, %v1087_v35  ;;  %v7758_v48 = vunpack.c.h.bf16 %v6322_v5 }
 0x26b   : > { %4707 = vpow2.f32 %v1427_v36  ;;  %v1375_v46 = vsub.f32 %v1343_v12, %v6093_v15  ;;  %v1379_v0 = vsub.f32 %v1347_v2, %v6113_v7  ;;  %v7755_v62 = vunpack.c.h.bf16 %v6329_v25  ;;  %1710 = vmatmul.bf16.gmra.mxu3 %v6324_v21  ;;  %v7980_v36 = vld [vmem:[#allocation69_spill] sm:$0xff] }
 0x26c   : > { %v4704_v42 = vpop.eup %4703  ;;  %4709 = vpow2.f32 %v1435_v45  ;;  %vm1123_vm15 = vcmp.gt.f32.partialorder %v1091_v17, 0.0  ;;  %v1155_v57 = vmul.f32 0.2, %v1091_v17  ;;  %v1183_v18 = vsel %vm1119_vm1, %v1087_v35, %v1151_v58  ;;  %v7981_v2 = vld [vmem:[#allocation81_spill] sm:$0xff] }
 0x26d   : > { %v4706_v9 = vpop.eup %4705  ;;  %v1423_v60 = vmul.f32 1.442695, %v1375_v46  ;;  %v1431_v14 = vmul.f32 1.442695, %v1379_v0  ;;  %v1352_v54 = vadd.f32 %v1183_v18, %v7759_v11  ;;  %v1089_v15 = vadd.f32 %v7968_v43, %v7980_v36  ;;  %v7982_v18 = vld [vmem:[#allocation74_spill] sm:$0xff] }
 0x26e   : > { %v6347_v12 = vpack.c.bf16 %v4706_v9, %v4704_v42  ;;  %v1187_v7 = vsel %vm1123_vm15, %v1091_v17, %v1155_v57  ;;  %v1093_v55 = vadd.f32 %v7968_v43, %v7981_v2  ;;  %v7757_v45 = vunpack.c.l.bf16 %v6322_v5 }
 0x26f   : > { %4711 = vpow2.f32 %v1423_v60  ;;  %v1356_v35 = vadd.f32 %v1187_v7, %v7754_v56  ;;  %v1384_v58 = vsub.f32 %v1352_v54, %v6133_v30  ;;  %vm1121_vm4 = vcmp.gt.f32.partialorder %v1089_v15, 0.0  ;;  %v7983_v30 = vld [vmem:[#allocation83_spill] sm:$0xff] }
 0x270   : > { %1768 = vmatmul.bf16.gmra.mxu0 %v6347_v12  ;;  %4713 = vpow2.f32 %v1431_v14  ;;  %vm1125_vm5 = vcmp.gt.f32.partialorder %v1093_v55, 0.0  ;;  %v1153_v46 = vmul.f32 0.2, %v1089_v15  ;;  %v1157_v0 = vmul.f32 0.2, %v1093_v55 }
 0x271   : > { %v4708_v42 = vpop.eup %4707  ;;  %v1388_v17 = vsub.f32 %v1356_v35, %v6148_v53  ;;  %v1441_v57 = vmul.f32 1.442695, %v1384_v58  ;;  %v7756_v43 = vunpack.c.l.bf16 %v6329_v25  ;;  %v1088_v9 = vadd.f32 %v7956_v10, %v7982_v18 }
 0x272   : > { %v4710_v60 = vpop.eup %4709  ;;  %v1185_v36 = vsel %vm1121_vm4, %v1089_v15, %v1153_v46  ;;  %v1189_v7 = vsel %vm1125_vm5, %v1093_v55, %v1157_v0  ;;  %v1092_v54 = vadd.f32 %v7956_v10, %v7983_v30  ;;  %v7761_v14 = vunpack.c.l.bf16 %v6297_v19 }
 0x273   : > { %v6363_v2 = vpack.c.bf16 %v4710_v60, %v4708_v42  ;;  %4715 = vpow2.f32 %v1441_v57  ;;  %v1449_v56 = vmul.f32 1.442695, %v1388_v17  ;;  %v1354_v53 = vadd.f32 %v1185_v36, %v7758_v48  ;;  %v7984_v57 = vld [vmem:[#allocation51_spill] sm:$0xff]  ;;  %v7985_v60 = vld [vmem:[#allocation52_spill] sm:$0xff] }
 0x274   : > { %v1358_v35 = vadd.f32 %v1189_v7, %v7755_v62  ;;  %vm1120_vm7 = vcmp.gt.f32.partialorder %v1088_v9, 0.0  ;;  %vm1124_vm8 = vcmp.gt.f32.partialorder %v1092_v54, 0.0  ;;  %v1152_v58 = vmul.f32 0.2, %v1088_v9 }
 0x275   : > { %v4712_v15 = vpop.eup %4711  ;;  %1739 = vmatmul.bf16.gmra.mxu1 %v6363_v2  ;;  %4717 = vpow2.f32 %v1449_v56  ;;  %v1386_v10 = vsub.f32 %v1354_v53, %v6143_v22  ;;  %v1156_v55 = vmul.f32 0.2, %v1092_v54  ;;  %v7760_v46 = vunpack.c.l.bf16 %v6311_v32 }
 0x276   : > { %v4714_v0 = vpop.eup %4713  ;;  %v1390_v42 = vsub.f32 %v1358_v35, %v6158_v16  ;;  %v1184_v17 = vsel %vm1120_vm7, %v1088_v9, %v1152_v58  ;;  %v1086_v18 = vadd.f32 %v6161_v44, %v7984_v57  ;;  %v1090_v36 = vadd.f32 %v6161_v44, %v7985_v60  ;;  %v7986_v44 = vld [vmem:[#allocation84_spill] sm:$0xff]  ;;  %v7987_v57 = vld [vmem:[#allocation87_spill] sm:$0xff] }
 0x277   : > { %v1463_v7 = vpack.c.bf16 %v4714_v0, %v4712_v15  ;;  %v1445_v30 = vmul.f32 1.442695, %v1386_v10  ;;  %v1188_v62 = vsel %vm1124_vm8, %v1092_v54, %v1156_v55  ;;  %v1353_v56 = vadd.f32 %v1184_v17, %v7757_v45 }
 0x278   : > { %v1453_v22 = vmul.f32 1.442695, %v1390_v42  ;;  %v1357_v53 = vadd.f32 %v1188_v62, %v7756_v43  ;;  %vm1118_vm11 = vcmp.gt.f32.partialorder %v1086_v18, 0.0  ;;  %vm1122_vm12 = vcmp.gt.f32.partialorder %v1090_v36, 0.0 }
 0x279   : > { %v4716_v16 = vpop.eup %4715  ;;  %4719 = vpow2.f32 %v1445_v30  ;;  %v1385_v9 = vsub.f32 %v1353_v56, %v6138_v20  ;;  %v1150_v35 = vmul.f32 0.2, %v1086_v18  ;;  %v1154_v58 = vmul.f32 0.2, %v1090_v36  ;;  %v7988_v30 = vld [vmem:[#allocation88_spill] sm:$0xff] }
 0x27a   : > { %1681 = vmatmul.bf16.gmra.mxu2 %v1463_v7  ;;  %vm1255_vm2 = vcmp.gt.f32.partialorder %v7986_v44, 0.0  ;;  %4721 = vpow2.f32 %v1453_v22  ;;  %v1389_v54 = vsub.f32 %v1357_v53, %v6153_v49  ;;  %v1323_v56 = vsel %vm1259_vm3, %v5934_v31, %v7988_v30 }
 0x27b   : > { %v4718_v15 = vpop.eup %4717  ;;  %v1443_v10 = vmul.f32 1.442695, %v1385_v9  ;;  %v1182_v55 = vsel %vm1118_vm11, %v1086_v18, %v1150_v35  ;;  %v1186_v62 = vsel %vm1122_vm12, %v1090_v36, %v1154_v58  ;;  %v1319_v60 = vsel %vm1255_vm2, %v7986_v44, %v7987_v57 }
 0x27c   : > { %v1468_v0 = vpack.c.bf16 %v4718_v15, %v4716_v16  ;;  %v1451_v42 = vmul.f32 1.442695, %v1389_v54  ;;  %v1351_v17 = vadd.f32 %v1182_v55, %v7761_v14  ;;  %v1355_v20 = vadd.f32 %v1186_v62, %v7760_v46 }
 0x27d   : > { %4723 = vpow2.f32 %v1443_v10  ;;  %vm8091_vm4 = vcmask 523264  }
 0x27e   : > { %1715 = vmatmul.bf16.gmra.mxu3 %v1468_v0  ;;  %4725 = vpow2.f32 %v1451_v42  ;;  %v1383_v49 = vsub.f32 %v1351_v17, %v1319_v60  ;;  %v1387_v18 = vsub.f32 %v1355_v20, %v1323_v56  ;;  %vm8110_vm5 = vmmov %vm8091_vm4 }
 0x27f   : > { %v4720_v36 = vpop.eup %4719  ;;  %vm8111_vm7 = vmmov %vm8091_vm4 }
 0x280   : > { %v4722_v22 = vpop.eup %4721  ;;  %v1439_v53 = vmul.f32 1.442695, %v1383_v49  ;;  %v1447_v16 = vmul.f32 1.442695, %v1387_v18 }
 0x281   : > { %v1470_v9 = vpack.c.bf16 %v4722_v22, %v4720_v36 }
 0x282   : > { %4727 = vpow2.f32 %v1439_v53 }
 0x283   : > { %v4724_v35 = vpop.eup %4723  ;;  %1773 = vmatmul.bf16.gmra.mxu0 %v1470_v9  ;;  %4729 = vpow2.f32 %v1447_v16 }
 0x284   : > { %v4726_v58 = vpop.eup %4725 }
 0x285   : > { %v1469_v54 = vpack.c.bf16 %v4726_v58, %v4724_v35 }
 0x287   : > { %1744 = vmatmul.bf16.gmra.mxu1 %v1469_v54 }
 0x288   : > { %v4728_v44 = vpop.eup %4727 }
 0x289   : > { %v4730_v15 = vpop.eup %4729 }
 0x28a   : > { %v1467_v31 = vpack.c.bf16 %v4730_v15, %v4728_v44 }
 0x28c   : > { %1686 = vmatmul.bf16.gmra.mxu2 %v1467_v31 }
 0x28e   : > { %1992 = vmatmul.bf16.vlgmr.msra.gmra.mxu3 %v6207_v59 }
 0x293   : > { %2050 = vmatmul.bf16.vlgmr.msrb.gmra.mxu0 %v6213_v38 }
 0x297   : > { %2021 = vmatmul.bf16.vlgmr.msrb.gmra.mxu1 %v6234_v52 }
 0x29c   : > { %1963 = vmatmul.bf16.vlgmr.msra.gmra.mxu2 %v6255_v34 }
 0x29e   : > { %1997 = vmatmul.bf16.gmra.mxu3 %v6245_v47 }
 0x2a3   : > { %2055 = vmatmul.bf16.gmra.mxu0 %v6262_v13 }
 0x2a7   : > { %2026 = vmatmul.bf16.gmra.mxu1 %v6292_v33 }
 0x2ac   : > { %1968 = vmatmul.bf16.gmra.mxu2 %v6301_v61 }
 0x2ae   : > { %2002 = vmatmul.bf16.gmra.mxu3 %v6324_v21 }
 0x2b3   : > { %2060 = vmatmul.bf16.gmra.mxu0 %v6347_v12 }
 0x2b7   : > { %2031 = vmatmul.bf16.gmra.mxu1 %v6363_v2 }
 0x2bc   : > { %1973 = vmatmul.bf16.gmra.mxu2 %v1463_v7 }
 0x2be   : > { %2007 = vmatmul.bf16.gmra.mxu3 %v1468_v0 }
 0x2c3   : > { %2065 = vmatmul.bf16.gmra.mxu0 %v1470_v9 }
 0x2c7   : > { %2036 = vmatmul.bf16.gmra.mxu1 %v1469_v54 }
 0x2ca   : > { %v1759_v59 = vpop.f32.mrf.mxu0 }
 0x2cc   : > { %1978 = vmatmul.bf16.gmra.mxu2 %v1467_v31 }
 0x2ce   : > { %v1701_v38 = vpop.f32.mrf.mxu3 }
 0x2d0   : > { %v1730_v52 = vpop.f32.mrf.mxu1 }
 0x2d2   : > { %v1761_v47 = vpop.f32.mrf.mxu0 }
 0x2d6   : > { %v1703_v34 = vpop.f32.mrf.mxu3 }
 0x2d8   : > { %v1732_v13 = vpop.f32.mrf.mxu1 }
 0x2da   : > { %v1764_v33 = vpop.f32.mrf.mxu0 }
 0x2dd   : > { %v1672_v10 = vpop.f32.mrf.mxu2 }
 0x2de   : > { %v1702_v61 = vadd.f32 %v1701_v38, %v1672_v10  ;;  %v1706_v21 = vpop.f32.mrf.mxu3 }
 0x2e0   : > { %v1731_v55 = vadd.f32 %v1730_v52, %v1702_v61  ;;  %v1735_v62 = vpop.f32.mrf.mxu1 }
 0x2e2   : > { %v1760_v12 = vadd.f32 %v1759_v59, %v1731_v55  ;;  %v6404_v42 = vpop.f32.mrf.mxu0 }
 0x2e4   : > { %4731 = vrcp.f32 %v1760_v12 }
 0x2e5   : > { %v1674_v2 = vpop.f32.mrf.mxu2 }
 0x2e6   : > { %v6406_v7 = vpop.f32.mrf.mxu3 }
 0x2e8   : > { %v6408_v0 = vpop.f32.mrf.mxu1 }
 0x2ed   : > { %v1677_v17 = vpop.f32.mrf.mxu2  ;;  %v1769_v20 = vpop.f32.mrf.mxu0 }
 0x2ee   : > { %v1707_v57 = vadd.f32 %v1706_v21, %v1677_v17  ;;  %v1711_v30 = vpop.f32.mrf.mxu3 }
 0x2f0   : > { %v1736_v60 = vadd.f32 %v1735_v62, %v1707_v57 }
 0x2f2   : > { %v6410_v56 = vadd.f32 %v1764_v33, %v1736_v60  ;;  %v1740_v49 = vpop.f32.mrf.mxu1  ;;  %v1704_v60 = vadd.f32 %v1703_v34, %v1674_v2  ;;  %v4732_v34 = vpop.eup %4731 }
 0x2f5   : > { %v1679_v18 = vpop.f32.mrf.mxu2  ;;  %v6412_v36 = vpop.f32.mrf.mxu0 }
 0x2f6   : > { %v6414_v22 = vpop.f32.mrf.mxu3 }
 0x2fa   : > { %v6416_v53 = vpop.f32.mrf.mxu1 }
 0x2fd   : > { %v1682_v16 = vpop.f32.mrf.mxu2 }
 0x2fe   : > { %v1712_v9 = vadd.f32 %v1711_v30, %v1682_v16  ;;  %v4557_v16 = vld [vmem:[#allocation5 + $0x130] sm:$0xff] }
 0x300   : > { %v1741_v35 = vadd.f32 %v1740_v49, %v1712_v9  ;;  %v1774_v58 = vpop.f32.mrf.mxu0  ;;  %v1733_v9 = vadd.f32 %v1732_v13, %v1704_v60  ;;  %v4554_v60 = vld [vmem:[#allocation5 + $0x118] sm:$0xff] }
 0x301   : > { %v1716_v44 = vpop.f32.mrf.mxu3 }
 0x302   : > { %v6418_v54 = vadd.f32 %v1769_v20, %v1741_v35  ;;  %v4558_v20 = vld [vmem:[#allocation5 + $0x138] sm:$0xff] }
 0x303   : > { %2188 = vmatpush.bf16.msrb.mxu2 %v4558_v20  ;;  %v6435_v20 = vld [vmem:[%s7569_s2 + $0x8] ss:$0 sm:$0xff] }
 0x304   : > { %v1745_v15 = vpop.f32.mrf.mxu1 }
 0x305   : > { %v6420_v31 = vpop.f32.mrf.mxu2 }
 0x307   : > { %2189 = vmatpush.bf16.msrb.mxu2 %v4557_v16 }
 0x308   : > { %v6424_v38 = vpop.f32.mrf.mxu0 }
 0x309   : > { %v6422_v59 = vpop.f32.mrf.mxu3 }
 0x30c   : > { %v6426_v52 = vpop.f32.mrf.mxu1 }
 0x30f   : > { %v1687_v33 = vpop.f32.mrf.mxu2 }
 0x310   : > { %v1717_v10 = vadd.f32 %v1716_v44, %v1687_v33  ;;  %v2051_v17 = vpop.f32.mrf.mxu0  ;;  %v4556_v44 = vld [vmem:[#allocation5 + $0x128] sm:$0xff] }
 0x311   : > { %v1993_v61 = vpop.f32.mrf.mxu3  ;;  %2190 = vmatpush.bf16.msrb.mxu2 %v4556_v44 }
 0x312   : > { %v1746_v55 = vadd.f32 %v1745_v15, %v1717_v10  ;;  %v1762_v10 = vadd.f32 %v1761_v47, %v1733_v9  ;;  %v4553_v9 = vld [vmem:[#allocation5 + $0x110] sm:$0xff] }
 0x314   : > { %v2022_v21 = vpop.f32.mrf.mxu1  ;;  %v6428_v62 = vadd.f32 %v1774_v58, %v1746_v55  ;;  %v4555_v58 = vld [vmem:[#allocation5 + $0x120] sm:$0xff]  ;;  %4733 = vrcp.f32 %v1762_v10 }
 0x315   : > { %2191 = vmatpush.bf16.msrb.mxu2 %v4555_v58  ;;  %4735 = vrcp.f32 %v6410_v56 }
 0x317   : > { %v6430_v57 = vpop.f32.mrf.mxu2 }
 0x318   : > { %v2053_v35 = vpop.f32.mrf.mxu0 }
 0x319   : > { %v1995_v30 = vpop.f32.mrf.mxu3  ;;  %2192 = vmatpush.bf16.msrb.mxu2 %v4554_v60  ;;  %v4551_v60 = vld [vmem:[#allocation5 + $0x100] sm:$0xff] }
 0x31c   : > { %v2024_v49 = vpop.f32.mrf.mxu1 }
 0x31d   : > { %2193 = vmatpush.bf16.msrb.mxu2 %v4553_v9 }
 0x31f   : > { %v1964_v43 = vpop.f32.mrf.mxu2 }
 0x320   : > { %v1994_v33 = vadd.f32 %v1993_v61, %v1964_v43  ;;  %v2056_v47 = vpop.f32.mrf.mxu0 }
 0x321   : > { %v1998_v2 = vpop.f32.mrf.mxu3 }
 0x322   : > { %v2023_v15 = vadd.f32 %v2022_v21, %v1994_v33  ;;  %v4734_v33 = vpop.eup %4733 }
 0x324   : > { %v2052_v55 = vadd.f32 %v2051_v17, %v2023_v15  ;;  %v2027_v13 = vpop.f32.mrf.mxu1  ;;  %v1709_v17 = vadd.f32 %v6406_v7, %v1679_v18 }
 0x326   : > { %v2071_v45 = vmul.f32 %v4732_v34, %v2052_v55  ;;  %v1738_v10 = vadd.f32 %v6408_v0, %v1709_v17 }
 0x327   : > { %v1966_v12 = vpop.f32.mrf.mxu2 }
 0x328   : > { %v2080_v43 = vadd.f32 %v6435_v20, %v2071_v45  ;;  %v1996_v61 = vadd.f32 %v1995_v30, %v1966_v12  ;;  %v4552_v45 = vld [vmem:[#allocation5 + $0x108] sm:$0xff]  ;;  %v2058_v12 = vpop.f32.mrf.mxu0 }
 0x329   : > { %v2000_v58 = vpop.f32.mrf.mxu3  ;;  %2194 = vmatpush.bf16.msrb.mxu2 %v4552_v45 }
 0x32a   : > { %v2096_v21 = vmin.f32 %v2080_v43, 0.0  ;;  %v2025_v16 = vadd.f32 %v2024_v49, %v1996_v61  ;;  %vm2088_vm9 = vcmp.gt.f32.partialorder %v2080_v43, 0.0 }
 0x32c   : > { %v2054_v44 = vadd.f32 %v2053_v35, %v2025_v16  ;;  %v2104_v15 = vmul.f32 1.442695, %v2096_v21  ;;  %v2029_v49 = vpop.f32.mrf.mxu1  ;;  %v1767_v35 = vadd.f32 %v6404_v42, %v1738_v10  ;;  %v4736_v21 = vpop.eup %4735  ;;  %v1714_v42 = vadd.f32 %v6414_v22, %v6420_v31 }
 0x32d   : > { %2195 = vmatpush.bf16.msrb.mxu2 %v4551_v60 }
 0x32e   : > { %v2072_v48 = vmul.f32 %v4734_v33, %v2054_v44  ;;  %4737 = vpow2.f32 %v2104_v15 }
 0x32f   : > { %v1969_v55 = vpop.f32.mrf.mxu2 }
 0x330   : > { %v2081_v30 = vadd.f32 %v6435_v20, %v2072_v48  ;;  %v1999_v34 = vadd.f32 %v1998_v2, %v1969_v55 }
 0x331   : > { %v2003_v9 = vpop.f32.mrf.mxu3 }
 0x332   : > { %v2097_v7 = vmin.f32 %v2081_v30, 0.0  ;;  %v2028_v18 = vadd.f32 %v2027_v13, %v1999_v34  ;;  %v2061_v34 = vpop.f32.mrf.mxu0  ;;  %vm2089_vm10 = vcmp.gt.f32.partialorder %v2081_v30, 0.0 }
 0x334   : > { %v2106_v61 = vmul.f32 1.442695, %v2097_v7  ;;  %v2057_v56 = vadd.f32 %v2056_v47, %v2028_v18  ;;  %v4738_v17 = vpop.eup %4737  ;;  %v2032_v15 = vpop.f32.mrf.mxu1 }
 0x335   : > { %v4175_v33 = vadd.f32 -1.0, %v4738_v17 }
 0x336   : > { %4739 = vpow2.f32 %v2106_v61  ;;  %v2073_v0 = vmul.f32 %v4736_v21, %v2057_v56 }
 0x337   : > { %4741 = vrcp.f32 %v1767_v35  ;;  %v1971_v16 = vpop.f32.mrf.mxu2  ;;  %v2128_v35 = vsel %vm2088_vm9, %v2080_v43, %v4175_v33 }
 0x338   : > { %v2082_v48 = vadd.f32 %v6435_v20, %v2073_v0  ;;  %v2001_v2 = vadd.f32 %v2000_v58, %v1971_v16  ;;  %4743 = vrcp.f32 %v6418_v54  ;;  %v1743_v58 = vadd.f32 %v6416_v53, %v1714_v42 }
 0x339   : > { %v2005_v0 = vpop.f32.mrf.mxu3 }
 0x33a   : > { %v2030_v44 = vadd.f32 %v2029_v49, %v2001_v2  ;;  %v2098_v13 = vmin.f32 %v2082_v48, 0.0  ;;  %v1772_v21 = vadd.f32 %v6412_v36, %v1743_v58  ;;  %v2063_v53 = vpop.f32.mrf.mxu0  ;;  %v1719_v36 = vadd.f32 %v6422_v59, %v6430_v57 }
 0x33b   : > { %vm2090_vm13 = vcmp.gt.f32.partialorder %v2082_v48, 0.0 }
 0x33c   : > { %v4740_v10 = vpop.eup %4739  ;;  %v2059_v47 = vadd.f32 %v2058_v12, %v2030_v44  ;;  %v2108_v18 = vmul.f32 1.442695, %v2098_v13  ;;  %v2034_v54 = vpop.f32.mrf.mxu1  ;;  %v1748_v58 = vadd.f32 %v6426_v52, %v1719_v36 }
 0x33d   : > { %v4742_v55 = vpop.eup %4741  ;;  %v4176_v45 = vadd.f32 -1.0, %v4740_v10 }
 0x33e   : > { %v2074_v7 = vmul.f32 %v4742_v55, %v2059_v47  ;;  %4745 = vpow2.f32 %v2108_v18  ;;  %v4744_v2 = vpop.eup %4743 }
 0x33f   : > { %v1974_v49 = vpop.f32.mrf.mxu2  ;;  %v2129_v60 = vsel %vm2089_vm10, %v2081_v30, %v4176_v45 }
 0x340   : > { %v2004_v61 = vadd.f32 %v2003_v9, %v1974_v49  ;;  %v2136_v22 = vpack.c.bf16 %v2129_v60, %v2128_v35  ;;  %v2083_v31 = vadd.f32 %v6435_v20, %v2074_v7 }
 0x341   : > { %v2008_v45 = vpop.f32.mrf.mxu3 }
 0x342   : > { %v2033_v56 = vadd.f32 %v2032_v15, %v2004_v61  ;;  %2196 = vmatmul.bf16.vlgmr.msrb.gmra.mxu2 %v2136_v22  ;;  %v2099_v12 = vmin.f32 %v2083_v31, 0.0  ;;  %vm2091_vm14 = vcmp.gt.f32.partialorder %v2083_v31, 0.0 }
 0x344   : > { %v2062_v16 = vadd.f32 %v2061_v34, %v2033_v56  ;;  %v2110_v17 = vmul.f32 1.442695, %v2099_v12  ;;  %v4746_v30 = vpop.eup %4745  ;;  %v2037_v49 = vpop.f32.mrf.mxu1 }
 0x345   : > { %v4177_v15 = vadd.f32 -1.0, %v4746_v30  ;;  %v2066_v56 = vpop.f32.mrf.mxu0 }
 0x346   : > { %v2075_v44 = vmul.f32 %v4744_v2, %v2062_v16  ;;  %4747 = vpow2.f32 %v2110_v17  ;;  %v4517_v16 = vld [vmem:[#allocation2 + $0x1ec] sm:$0xf0]  ;;  %v4515_v17 = vld [vmem:[#allocation2 + $0x1e4] sm:$0xf]  ;;  %v4331_v2 = vld [vmem:[#allocation2 + $0x1f0] sm:$0xf0] }
 0x347   : > { %4749 = vrcp.f32 %v1772_v21  ;;  %v1976_v43 = vpop.f32.mrf.mxu2  ;;  %v2130_v60 = vsel %vm2090_vm13, %v2082_v48, %v4177_v15  ;;  %v4337_v48 = vld [vmem:[#allocation2 + $0x1e8] sm:$0xf] }
 0x348   : > { %v6451_v9 = vadd.f32 %v6435_v20, %v2075_v44  ;;  %v2006_v13 = vadd.f32 %v2005_v0, %v1976_v43  ;;  %4751 = vrcp.f32 %v6428_v62  ;;  %v4329_v0 = vld [vmem:[#allocation2 + $0x1e0] sm:$0xf]  ;;  %v1777_v62 = vadd.f32 %v6424_v38, %v1748_v58  ;;  %v4516_v43 = vld [vmem:[#allocation2 + $0x1ec] sm:$0xf]  ;;  %v4511_v38 = vld [vmem:[#allocation2 + $0x1c4] sm:$0xf] }
 0x349   : > { %v4330_v52 = vor.u32 %v4517_v16, %v4329_v0  ;;  %v4334_v44 = vor.u32 %v4515_v17, %v4331_v2  ;;  %v4321_v58 = vld [vmem:[#allocation2 + $0x1c8] sm:$0xf] }
 0x34a   : > { %v2035_v42 = vadd.f32 %v2034_v54, %v2006_v13  ;;  %v2100_v33 = vmin.f32 %v6451_v9, 0.0  ;;  %v4305_v17 = vld [vmem:[#allocation2 + $0x1a8] sm:$0xf]  ;;  %vm2092_vm0 = vcmp.gt.f32.partialorder %v6451_v9, 0.0 }
 0x34b   : > { %2409 = vmatpush.bf16.msrb.mxu3 %v4330_v52  ;;  %2438 = vmatpush.bf16.msra.mxu1 %v4334_v44  ;;  %v4299_v52 = vld [vmem:[#allocation2 + $0x1b0] sm:$0xf0]  ;;  %v4510_v44 = vld [vmem:[#allocation2 + $0x1b4] sm:$0xf0] }
 0x34c   : > { %v4748_v10 = vpop.eup %4747  ;;  %v2064_v47 = vadd.f32 %v2063_v53, %v2035_v42  ;;  %v2112_v7 = vmul.f32 1.442695, %v2100_v33  ;;  %v4518_v53 = vld [vmem:[#allocation2 + $0x1f4] sm:$0xf0]  ;;  %v4339_v42 = vld [vmem:[#allocation2 + $0x1f8] sm:$0xf0] }
 0x34d   : > { %v4750_v55 = vpop.eup %4749  ;;  %v4178_v34 = vadd.f32 -1.0, %v4748_v10  ;;  %v4338_v13 = vor.u32 %v4518_v53, %v4337_v48  ;;  %v4313_v33 = vld [vmem:[#allocation2 + $0x1c0] sm:$0xf]  ;;  %v4342_v15 = vor.u32 %v4516_v43, %v4339_v42  ;;  %v4513_v10 = vld [vmem:[#allocation2 + $0x1cc] sm:$0xf0]  ;;  %v2068_v43 = vpop.f32.mrf.mxu0 }
 0x34e   : > { %v2076_v18 = vmul.f32 %v4750_v55, %v2064_v47  ;;  %4753 = vpow2.f32 %v2112_v7  ;;  %v4752_v30 = vpop.eup %4751  ;;  %v4315_v47 = vld [vmem:[#allocation2 + $0x1d0] sm:$0xf0]  ;;  %v4314_v7 = vor.u32 %v4513_v10, %v4313_v33  ;;  %v4508_v53 = vld [vmem:[#allocation2 + $0x1ac] sm:$0xf]  ;;  %v4281_v42 = vld [vmem:[#allocation2 + $0x180] sm:$0xf] }
 0x34f   : > { %v1979_v35 = vpop.f32.mrf.mxu2  ;;  %v2131_v61 = vsel %vm2091_vm14, %v2083_v31, %v4178_v34  ;;  %2467 = vmatpush.bf16.msra.mxu0 %v4338_v13  ;;  %2496 = vmatpush.bf16.msra.mxu2 %v4342_v15  ;;  %v4307_v13 = vld [vmem:[#allocation2 + $0x1b8] sm:$0xf0]  ;;  %v4505_v33 = vld [vmem:[#allocation2 + $0x18c] sm:$0xf0] }
 0x350   : > { %v2009_v22 = vadd.f32 %v2008_v45, %v1979_v35  ;;  %v2137_v59 = vpack.c.bf16 %v2131_v61, %v2130_v60  ;;  %v6459_v57 = vadd.f32 %v6435_v20, %v2076_v18  ;;  %v2010_v45 = vpop.f32.mrf.mxu3  ;;  %v4318_v18 = vor.u32 %v4511_v38, %v4315_v47  ;;  %v4512_v35 = vld [vmem:[#allocation2 + $0x1cc] sm:$0xf]  ;;  %2410 = vmatpush.bf16.msrb.mxu3 %v4314_v7  ;;  %v4503_v38 = vld [vmem:[#allocation2 + $0x184] sm:$0xf]  ;;  %v4283_v47 = vld [vmem:[#allocation2 + $0x190] sm:$0xf0] }
 0x351   : > { %v4310_v10 = vor.u32 %v4508_v53, %v4307_v13  ;;  %v4289_v7 = vld [vmem:[#allocation2 + $0x188] sm:$0xf]  ;;  %v4499_v53 = vld [vmem:[#allocation2 + $0x164] sm:$0xf] }
 0x352   : > { %v2038_v12 = vadd.f32 %v2037_v49, %v2009_v22  ;;  %2201 = vmatmul.bf16.gmra.mxu2 %v2137_v59  ;;  %v2101_v21 = vmin.f32 %v6459_v57, 0.0  ;;  %v4514_v49 = vld [vmem:[#allocation2 + $0x1d4] sm:$0xf0]  ;;  %v4323_v59 = vld [vmem:[#allocation2 + $0x1d8] sm:$0xf0]  ;;  %2439 = vmatpush.bf16.msra.mxu1 %v4318_v18  ;;  %vm2093_vm6 = vcmp.gt.f32.partialorder %v6459_v57, 0.0 }
 0x353   : > { %v4322_v22 = vor.u32 %v4514_v49, %v4321_v58  ;;  %v4326_v0 = vor.u32 %v4512_v35, %v4323_v59  ;;  %v4506_v18 = vld [vmem:[#allocation2 + $0x194] sm:$0xf0]  ;;  %v4286_v35 = vor.u32 %v4503_v38, %v4283_v47  ;;  %v4273_v13 = vld [vmem:[#allocation2 + $0x168] sm:$0xf]  ;;  %v4249_v38 = vld [vmem:[#allocation2 + $0x140] sm:$0xf] }
 0x354   : > { %v2067_v31 = vadd.f32 %v2066_v56, %v2038_v12  ;;  %v2114_v54 = vmul.f32 1.442695, %v2101_v21  ;;  %v4754_v55 = vpop.eup %4753  ;;  %v4297_v56 = vld [vmem:[#allocation2 + $0x1a0] sm:$0xf]  ;;  %v4509_v12 = vld [vmem:[#allocation2 + $0x1ac] sm:$0xf0]  ;;  %v2039_v21 = vpop.f32.mrf.mxu1 }
 0x355   : > { %v4298_v16 = vor.u32 %v4509_v12, %v4297_v56  ;;  %v4179_v48 = vadd.f32 -1.0, %v4754_v55  ;;  %2468 = vmatpush.bf16.msra.mxu0 %v4322_v22  ;;  %2497 = vmatpush.bf16.msra.mxu2 %v4326_v0  ;;  %v4291_v22 = vld [vmem:[#allocation2 + $0x198] sm:$0xf0]  ;;  %v4290_v12 = vor.u32 %v4506_v18, %v4289_v7  ;;  %v4257_v18 = vld [vmem:[#allocation2 + $0x148] sm:$0xf] }
 0x356   : > { %v2077_v36 = vmul.f32 %v4752_v30, %v2067_v31  ;;  %4755 = vpow2.f32 %v2114_v54  ;;  %v4306_v30 = vor.u32 %v4510_v44, %v4305_v17  ;;  %v4501_v44 = vld [vmem:[#allocation2 + $0x16c] sm:$0xf0] }
 0x357   : > { %4757 = vrcp.f32 %v1777_v62  ;;  %v1981_v34 = vpop.f32.mrf.mxu2  ;;  %v4507_v62 = vld [vmem:[#allocation2 + $0x1a4] sm:$0xf]  ;;  %2411 = vmatpush.bf16.msrb.mxu3 %v4298_v16  ;;  %v2132_v59 = vsel %vm2092_vm0, %v6451_v9, %v4179_v48 }
 0x358   : > { %v6464_v60 = vadd.f32 %v6435_v20, %v2077_v36  ;;  %v2011_v61 = vadd.f32 %v2010_v45, %v1981_v34  ;;  %v4302_v54 = vor.u32 %v4507_v62, %v4299_v52  ;;  %v4282_v34 = vor.u32 %v4505_v33, %v4281_v42  ;;  %v4502_v42 = vld [vmem:[#allocation2 + $0x174] sm:$0xf0] }
 0x359   : > { %2469 = vmatpush.bf16.msra.mxu0 %v4306_v30  ;;  %2498 = vmatpush.bf16.msra.mxu2 %v4310_v10  ;;  %v4267_v30 = vld [vmem:[#allocation2 + $0x170] sm:$0xf0]  ;;  %v4275_v10 = vld [vmem:[#allocation2 + $0x178] sm:$0xf0] }
 0x35a   : > { %v2040_v2 = vadd.f32 %v2039_v21, %v2011_v61  ;;  %v2102_v31 = vmin.f32 %v6464_v60, 0.0  ;;  %2440 = vmatpush.bf16.msra.mxu1 %v4302_v54  ;;  %v4504_v61 = vld [vmem:[#allocation2 + $0x18c] sm:$0xf]  ;;  %vm2094_vm1 = vcmp.gt.f32.partialorder %v6464_v60, 0.0  ;;  %v4265_v54 = vld [vmem:[#allocation2 + $0x160] sm:$0xf]  ;;  %v4270_v33 = vor.u32 %v4499_v53, %v4267_v30 }
 0x35b   : > { %v4294_v16 = vor.u32 %v4504_v61, %v4291_v22  ;;  %2412 = vmatpush.bf16.msrb.mxu3 %v4282_v34  ;;  %v4259_v61 = vld [vmem:[#allocation2 + $0x158] sm:$0xf0]  ;;  %v4490_v30 = vld [vmem:[#allocation2 + $0x114] sm:$0xf0] }
 0x35c   : > { %v4756_v36 = vpop.eup %4755  ;;  %v2069_v15 = vadd.f32 %v2068_v43, %v2040_v2  ;;  %v2116_v49 = vmul.f32 1.442695, %v2102_v31  ;;  %v4266_v43 = vor.u32 %v4501_v44, %v4265_v54  ;;  %v4219_v54 = vld [vmem:[#allocation2 + $0x110] sm:$0xf0] }
 0x35d   : > { %v4758_v55 = vpop.eup %4757  ;;  %v4180_v45 = vadd.f32 -1.0, %v4756_v36  ;;  %2470 = vmatpush.bf16.msra.mxu0 %v4290_v12  ;;  %2499 = vmatpush.bf16.msra.mxu2 %v4294_v16  ;;  %v4274_v36 = vor.u32 %v4502_v42, %v4273_v13  ;;  %v4491_v12 = vld [vmem:[#allocation2 + $0x124] sm:$0xf]  ;;  %v4241_v16 = vld [vmem:[#allocation2 + $0x128] sm:$0xf] }
 0x35e   : > { %v2078_v58 = vmul.f32 %v4758_v55, %v2069_v15  ;;  %4759 = vpow2.f32 %v2116_v49  ;;  %2441 = vmatpush.bf16.msra.mxu1 %v4286_v35  ;;  %v4500_v15 = vld [vmem:[#allocation2 + $0x16c] sm:$0xf]  ;;  %v4497_v55 = vld [vmem:[#allocation2 + $0x14c] sm:$0xf0] }
 0x35f   : > { %v2133_v56 = vsel %vm2093_vm6, %v6459_v57, %v4180_v45  ;;  %2413 = vmatpush.bf16.msrb.mxu3 %v4266_v43  ;;  %v4278_v47 = vor.u32 %v4500_v15, %v4275_v10  ;;  %v4495_v45 = vld [vmem:[#allocation2 + $0x144] sm:$0xf]  ;;  %v4250_v34 = vor.u32 %v4497_v55, %v4249_v38  ;;  %v4496_v49 = vld [vmem:[#allocation2 + $0x14c] sm:$0xf]  ;;  %v4225_v43 = vld [vmem:[#allocation2 + $0x108] sm:$0xf] }
 0x360   : > { %v2138_v21 = vpack.c.bf16 %v2133_v56, %v2132_v59  ;;  %v2087_v0 = vadd.f32 %v6435_v20, %v2078_v58  ;;  %v4498_v58 = vld [vmem:[#allocation2 + $0x154] sm:$0xf0]  ;;  %v4262_v22 = vor.u32 %v4496_v49, %v4259_v61  ;;  %v4233_v59 = vld [vmem:[#allocation2 + $0x120] sm:$0xf]  ;;  %v4493_v56 = vld [vmem:[#allocation2 + $0x12c] sm:$0xf0]  ;;  %v4226_v42 = vor.u32 %v4490_v30, %v4225_v43 }
 0x361   : > { %2471 = vmatpush.bf16.msra.mxu0 %v4274_v36  ;;  %2500 = vmatpush.bf16.msra.mxu2 %v4278_v47  ;;  %v4258_v35 = vor.u32 %v4498_v58, %v4257_v18  ;;  %v4488_v13 = vld [vmem:[#allocation2 + $0x10c] sm:$0xf]  ;;  %v4863_v15 = vld [vmem:[#allocation5 + $0x38] sm:$0xff]  ;;  %v4866_v47 = vld [vmem:[#allocation5 + $0x30] sm:$0xff] }
 0x362   : > { %2206 = vmatmul.bf16.gmra.mxu2 %v2138_v21  ;;  %v2103_v62 = vmin.f32 %v2087_v0, 0.0  ;;  %vm2095_vm15 = vcmp.gt.f32.partialorder %v2087_v0, 0.0  ;;  %2442 = vmatpush.bf16.msra.mxu1 %v4270_v33  ;;  %v4234_v21 = vor.u32 %v4493_v56, %v4233_v59  ;;  %v4227_v33 = vld [vmem:[#allocation2 + $0x118] sm:$0xf0]  ;;  %v4867_v55 = vld [vmem:[#allocation5 + $0xb0] sm:$0xff]  ;;  %v4871_v18 = vld [vmem:[#allocation5 + $0xe8] sm:$0xff] }
 0x363   : > { %2414 = vmatpush.bf16.msrb.mxu3 %v4250_v34  ;;  %v4230_v36 = vor.u32 %v4488_v13, %v4227_v33  ;;  %v4864_v10 = vld [vmem:[#allocation5 + $0xb8] sm:$0xff]  ;;  %v4869_v34 = vld [vmem:[#allocation5 + $0x28] sm:$0xff]  ;;  %v4872_v58 = vld [vmem:[#allocation5 + $0x20] sm:$0xff] }
 0x364   : > { %v2118_v52 = vmul.f32 1.442695, %v2103_v62  ;;  %v4760_v17 = vpop.eup %4759  ;;  %v4494_v62 = vld [vmem:[#allocation2 + $0x134] sm:$0xf0]  ;;  %v4873_v49 = vld [vmem:[#allocation5 + $0xa0] sm:$0xff]  ;;  %vm8115_vm6 = vmmov %vm8091_vm4 }
 0x365   : > { %v4181_v9 = vadd.f32 -1.0, %v4760_v17  ;;  %2472 = vmatpush.bf16.msra.mxu0 %v4258_v35  ;;  %2501 = vmatpush.bf16.msra.mxu2 %v4262_v22  ;;  %v4242_v17 = vor.u32 %v4494_v62, %v4241_v16  ;;  %v4865_v38 = vld [vmem:[#allocation5 + $0xf8] sm:$0xff]  ;;  %v4874_v35 = vld [vmem:[#allocation5 + $0xe0] sm:$0xff]  ;;  %v4878_v62 = vld [vmem:[#allocation5 + $0x10] sm:$0xff] }
 0x366   : > { %4761 = vpow2.f32 %v2118_v52  ;;  %v4875_v59 = vld [vmem:[#allocation5 + $0x18] sm:$0xff] }
 0x367   : > { %v2134_v20 = vsel %vm2094_vm1, %v6464_v60, %v4181_v9  ;;  %v4251_v60 = vld [vmem:[#allocation2 + $0x150] sm:$0xf0]  ;;  %v4492_v9 = vld [vmem:[#allocation2 + $0x12c] sm:$0xf]  ;;  %2415 = vmatpush.bf16.msrb.mxu3 %v4234_v21  ;;  %v4877_v21 = vld [vmem:[#allocation5 + $0xd8] sm:$0xff] }
 0x368   : > { %v4254_v7 = vor.u32 %v4495_v45, %v4251_v60  ;;  %v4868_v45 = vld [vmem:[#allocation5 + $0xf0] sm:$0xff] }
 0x369   : > { %2473 = vmatpush.bf16.msra.mxu0 %v4242_v17  ;;  %v4879_v17 = vld [vmem:[#allocation5 + $0x90] sm:$0xff] }
 0x36a   : > { %2443 = vmatpush.bf16.msra.mxu1 %v4254_v7  ;;  %v4870_v7 = vld [vmem:[#allocation5 + $0xa8] sm:$0xff] }
 0x36c   : > { %v4762_v2 = vpop.eup %4761 }
 0x36d   : > { %v4182_v57 = vadd.f32 -1.0, %v4762_v2  ;;  %v4243_v2 = vld [vmem:[#allocation2 + $0x138] sm:$0xf0]  ;;  %2474 = vmatpush.bf16.msra.mxu0 %v4226_v42 }
 0x36f   : > { %v2135_v48 = vsel %vm2095_vm15, %v2087_v0, %v4182_v57  ;;  %v4235_v0 = vld [vmem:[#allocation2 + $0x130] sm:$0xf0]  ;;  %v4217_v57 = vld [vmem:[#allocation2 + $0x100] sm:$0xf] }
 0x370   : > { %v2139_v31 = vpack.c.bf16 %v2135_v48, %v2134_v20  ;;  %v4238_v52 = vor.u32 %v4491_v12, %v4235_v0  ;;  %v4246_v20 = vor.u32 %v4492_v9, %v4243_v2  ;;  %v4489_v48 = vld [vmem:[#allocation2 + $0x10c] sm:$0xf0]  ;;  %v4876_v12 = vld [vmem:[#allocation5 + $0x98] sm:$0xff] }
 0x371   : > { %v4218_v44 = vor.u32 %v4489_v48, %v4217_v57  ;;  %3036 = vmatpush.bf16.msrb.mxu0 %v4864_v10  ;;  %v4880_v9 = vld [vmem:[#allocation5 + $0xd0] sm:$0xff]  ;;  %v4881_v57 = vld [vmem:[#allocation5 + $0x8] sm:$0xff] }
 0x372   : > { %2211 = vmatmul.bf16.gmra.mxu2 %v2139_v31  ;;  %v4487_v31 = vld [vmem:[#allocation2 + $0x104] sm:$0xf]  ;;  %2444 = vmatpush.bf16.msra.mxu1 %v4238_v52  ;;  %v4883_v48 = vld [vmem:[#allocation5 + $0xc8] sm:$0xff] }
 0x373   : > { %v4222_v53 = vor.u32 %v4487_v31, %v4219_v54  ;;  %2502 = vmatpush.bf16.msra.mxu2 %v4246_v20  ;;  %2416 = vmatpush.bf16.msrb.mxu3 %v4218_v44  ;;  %v4882_v20 = vld [vmem:[#allocation5 + $0x88] sm:$0xff]  ;;  %v4884_v31 = vld [vmem:[#allocation5] sm:$0xff] }
 0x374   : > { %v4885_v54 = vld [vmem:[#allocation5 + $0x80] sm:$0xff] }
 0x375   : > { %3037 = vmatpush.bf16.msrb.mxu0 %v4867_v55  ;;  %v4886_v44 = vld [vmem:[#allocation5 + $0xc0] sm:$0xff] }
 0x376   : > { %2445 = vmatpush.bf16.msra.mxu1 %v4222_v53 }
 0x377   : > { %2503 = vmatpush.bf16.msra.mxu2 %v4230_v36 }
 0x379   : > { %3038 = vmatpush.bf16.msrb.mxu0 %v4870_v7 }
 0x37a   : > { %2978 = vmatpush.bf16.msrb.mxu1 %v4863_v15 }
 0x37b   : > { %3065 = vmatpush.bf16.msrb.mxu2 %v4865_v38 }
 0x37d   : > { %3039 = vmatpush.bf16.msrb.mxu0 %v4873_v49 }
 0x37e   : > { %2979 = vmatpush.bf16.msrb.mxu1 %v4866_v47 }
 0x37f   : > { %3066 = vmatpush.bf16.msrb.mxu2 %v4868_v45 }
 0x381   : > { %3040 = vmatpush.bf16.msrb.mxu0 %v4876_v12 }
 0x382   : > { %2980 = vmatpush.bf16.msrb.mxu1 %v4869_v34 }
 0x383   : > { %3067 = vmatpush.bf16.msrb.mxu2 %v4871_v18 }
 0x385   : > { %3041 = vmatpush.bf16.msrb.mxu0 %v4879_v17 }
 0x386   : > { %2981 = vmatpush.bf16.msrb.mxu1 %v4872_v58 }
 0x387   : > { %3068 = vmatpush.bf16.msrb.mxu2 %v4874_v35 }
 0x389   : > { %3042 = vmatpush.bf16.msrb.mxu0 %v4882_v20 }
 0x38a   : > { %2982 = vmatpush.bf16.msrb.mxu1 %v4875_v59 }
 0x38b   : > { %3069 = vmatpush.bf16.msrb.mxu2 %v4877_v21 }
 0x38d   : > { %3043 = vmatpush.bf16.msrb.mxu0 %v4885_v54 }
 0x38e   : > { %2983 = vmatpush.bf16.msrb.mxu1 %v4878_v62 }
 0x38f   : > { %3070 = vmatpush.bf16.msrb.mxu2 %v4880_v9 }
 0x392   : > { %2984 = vmatpush.bf16.msrb.mxu1 %v4881_v57  ;;  %v7992_v57 = vld [vmem:[#allocation41_spill] sm:$0xff] }
 0x393   : > { %3071 = vmatpush.bf16.msrb.mxu2 %v4883_v48  ;;  %v7993_v20 = vunpack.c.l.bf16 %v7992_v57 }
 0x396   : > { %2985 = vmatpush.bf16.msrb.mxu1 %v4884_v31  ;;  %v7994_v31 = vunpack.c.h.bf16 %v7992_v57  ;;  %v8007_v57 = vld [vmem:[#allocation18_spill] sm:$0xff] }
 0x397   : > { %3072 = vmatpush.bf16.msrb.mxu2 %v4886_v44 }
 0x3c5   : > { %v2197_v60 = vpop.f32.mrf.mxu2 }
 0x3c6   : > { %v2217_v61 = vpack.c.bf16 %v2197_v60, %v2197_v60 }
 0x3c8   : > { %v2233_v0 = vunpack.c.l.b16 %v2217_v61 }
 0x3cd   : > { %v2199_v22 = vpop.f32.mrf.mxu2 }
 0x3ce   : > { %v2218_v56 = vpack.c.bf16 %v2199_v22, %v2199_v22 }
 0x3d0   : > { %v2234_v16 = vunpack.c.l.b16 %v2218_v56 }
 0x3d2   : > { %v6476_v52 = vpack.c.b16 %v2234_v16, %v2233_v0  ;;  %v7989_v16 = vld [vmem:[#allocation19_spill] sm:$0xff] }
 0x3d3   : > { %v7990_v62 = vunpack.c.l.bf16 %v7989_v16  ;;  %v7991_v9 = vunpack.c.h.bf16 %v7989_v16  ;;  %v8004_v16 = vld [vmem:[#allocation26_spill] sm:$0xff] }
 0x3d4   : > { %2417 = vmatmul.bf16.vlgmr.msrb.gmra.mxu3 %v6476_v52  ;;  %2446 = vmatmul.bf16.vlgmr.msra.gmra.mxu1 %v6476_v52  ;;  %v6497_v12 = vunpack.c.l.bf16 %v6476_v52  ;;  %v6518_v44 = vunpack.c.h.bf16 %v6476_v52 }
 0x3d5   : > { %2475 = vmatmul.bf16.vlgmr.msra.gmra.mxu0 %v6476_v52  ;;  %2504 = vmatmul.bf16.vlgmr.msra.gmra.mxu2 %v6476_v52  ;;  %v2202_v2 = vpop.f32.mrf.mxu2 }
 0x3d6   : > { %v2219_v53 = vpack.c.bf16 %v2202_v2, %v2202_v2 }
 0x3d8   : > { %v2235_v13 = vunpack.c.l.b16 %v2219_v53  ;;  %v7995_v53 = vld [vmem:[#allocation23_spill] sm:$0xff] }
 0x3dd   : > { %v2204_v43 = vpop.f32.mrf.mxu2 }
 0x3de   : > { %v2220_v30 = vpack.c.bf16 %v2204_v43, %v2204_v43  ;;  %v7996_v43 = vunpack.c.l.bf16 %v7995_v53 }
 0x3e0   : > { %v2236_v42 = vunpack.c.l.b16 %v2220_v30 }
 0x3e2   : > { %v6482_v33 = vpack.c.b16 %v2236_v42, %v2235_v13  ;;  %v7997_v13 = vunpack.c.h.bf16 %v7995_v53  ;;  %v8010_v53 = vld [vmem:[#allocation43_spill] sm:$0xff] }
 0x3e4   : > { %2422 = vmatmul.bf16.gmra.mxu3 %v6482_v33  ;;  %2451 = vmatmul.bf16.gmra.mxu1 %v6482_v33  ;;  %v6500_v21 = vunpack.c.l.bf16 %v6482_v33  ;;  %v6503_v0 = vunpack.c.h.bf16 %v6482_v33 }
 0x3e5   : > { %2480 = vmatmul.bf16.gmra.mxu0 %v6482_v33  ;;  %2509 = vmatmul.bf16.gmra.mxu2 %v6482_v33  ;;  %v2207_v36 = vpop.f32.mrf.mxu2 }
 0x3e6   : > { %v2221_v15 = vpack.c.bf16 %v2207_v36, %v2207_v36  ;;  %v7998_v36 = vld [vmem:[#allocation24_spill] sm:$0xff] }
 0x3e8   : > { %v2237_v47 = vunpack.c.l.b16 %v2221_v15  ;;  %v7999_v15 = vunpack.c.l.bf16 %v7998_v36 }
 0x3ed   : > { %v2209_v10 = vpop.f32.mrf.mxu2 }
 0x3ee   : > { %v2222_v38 = vpack.c.bf16 %v2209_v10, %v2209_v10 }
 0x3f0   : > { %v2238_v55 = vunpack.c.l.b16 %v2222_v38 }
 0x3f2   : > { %v2243_v45 = vpack.c.b16 %v2238_v55, %v2237_v47  ;;  %v8000_v55 = vunpack.c.h.bf16 %v7998_v36 }
 0x3f4   : > { %2427 = vmatmul.bf16.gmra.mxu3 %v2243_v45  ;;  %2456 = vmatmul.bf16.gmra.mxu1 %v2243_v45  ;;  %v6488_v61 = vunpack.c.l.bf16 %v2243_v45  ;;  %v6490_v22 = vunpack.c.h.bf16 %v2243_v45 }
 0x3f5   : > { %2485 = vmatmul.bf16.gmra.mxu0 %v2243_v45  ;;  %2514 = vmatmul.bf16.gmra.mxu2 %v2243_v45  ;;  %v2212_v60 = vpop.f32.mrf.mxu2 }
 0x3f6   : > { %v2223_v34 = vpack.c.bf16 %v2212_v60, %v2212_v60  ;;  %v3122_v10 = vmul.f32 %v6488_v61, %v7999_v15  ;;  %v3123_v60 = vmul.f32 %v6490_v22, %v8000_v55  ;;  %v8013_v15 = vld [vmem:[#allocation21_spill] sm:$0xff] }
 0x3f7   : > { %v8015_v55 = vunpack.c.h.bf16 %v8013_v15 }
 0x3f8   : > { %v2239_v58 = vunpack.c.l.b16 %v2223_v34  ;;  %v8001_v34 = vld [vmem:[#allocation42_spill] sm:$0xff] }
 0x3fd   : > { %v2214_v7 = vpop.f32.mrf.mxu2 }
 0x3fe   : > { %v2224_v18 = vpack.c.bf16 %v2214_v7, %v2214_v7  ;;  %v8002_v7 = vunpack.c.l.bf16 %v8001_v34 }
 0x400   : > { %v2240_v49 = vunpack.c.l.b16 %v2224_v18  ;;  %v3154_v18 = vmul.f32 %v6488_v61, %v8002_v7 }
 0x402   : > { %v2244_v35 = vpack.c.b16 %v2240_v49, %v2239_v58  ;;  %v8003_v49 = vunpack.c.h.bf16 %v8001_v34  ;;  %v3169_v34 = vmul.f32 %v6503_v0, %v8015_v55 }
 0x404   : > { %v6492_v59 = vunpack.c.l.bf16 %v2244_v35  ;;  %v6494_v56 = vunpack.c.h.bf16 %v2244_v35  ;;  %2432 = vmatmul.bf16.gmra.mxu3 %v2244_v35  ;;  %2461 = vmatmul.bf16.gmra.mxu1 %v2244_v35 }
 0x405   : > { %2490 = vmatmul.bf16.gmra.mxu0 %v2244_v35  ;;  %2519 = vmatmul.bf16.gmra.mxu2 %v2244_v35 }
 0x406   : > { %2529 = vmatpush.bf16.xpose.msra.mxu3 %v2244_v35  ;;  %v3124_v17 = vmul.f32 %v6492_v59, %v7990_v62  ;;  %v3125_v2 = vmul.f32 %v6494_v56, %v7991_v9  ;;  %v3156_v48 = vmul.f32 %v6492_v59, %v7993_v20  ;;  %v3157_v54 = vmul.f32 %v6494_v56, %v7994_v31 }
 0x407   : > { %v3172_v30 = vmul.f32 %v6492_v59, %v7996_v43  ;;  %v3173_v42 = vmul.f32 %v6494_v56, %v7997_v13  ;;  %v3155_v35 = vmul.f32 %v6490_v22, %v8003_v49  ;;  %v8005_v62 = vunpack.c.l.bf16 %v8004_v16 }
 0x408   : > { %v3181_v38 = vpack.c.bf16 %v3125_v2, %v3124_v17  ;;  %v3197_v47 = vpack.c.bf16 %v3157_v54, %v3156_v48  ;;  %v8006_v17 = vunpack.c.h.bf16 %v8004_v16  ;;  %v8008_v20 = vunpack.c.l.bf16 %v8007_v57 }
 0x409   : > { %v3205_v58 = vpack.c.bf16 %v3173_v42, %v3172_v30  ;;  %v3170_v9 = vmul.f32 %v6488_v61, %v8005_v62  ;;  %v8009_v31 = vunpack.c.h.bf16 %v8007_v57  ;;  %v8011_v43 = vunpack.c.l.bf16 %v8010_v53  ;;  %v8019_v57 = vld [vmem:[#allocation16_spill] sm:$0xff] }
 0x40a   : > { %v3171_v2 = vmul.f32 %v6490_v22, %v8006_v17  ;;  %3206 = vmatpush.bf16.msra.mxu1 %v3181_v38  ;;  %3264 = vmatpush.bf16.msra.mxu0 %v3197_v47  ;;  %v3120_v48 = vmul.f32 %v6500_v21, %v8008_v20  ;;  %v3180_v13 = vpack.c.bf16 %v3123_v60, %v3122_v10  ;;  %v8012_v42 = vunpack.c.h.bf16 %v8010_v53 }
 0x40b   : > { %v3121_v54 = vmul.f32 %v6503_v0, %v8009_v31  ;;  %3293 = vmatpush.bf16.msra.mxu2 %v3205_v58  ;;  %v3152_v30 = vmul.f32 %v6500_v21, %v8011_v43  ;;  %v8014_v38 = vunpack.c.l.bf16 %v8013_v15  ;;  %v3196_v7 = vpack.c.bf16 %v3155_v35, %v3154_v18  ;;  %v8016_v58 = vld [vmem:[#allocation39_spill] sm:$0xff]  ;;  %v8022_v31 = vld [vmem:[#allocation44_spill] sm:$0xff] }
 0x40c   : > { %v3153_v36 = vmul.f32 %v6503_v0, %v8012_v42  ;;  %v3204_v49 = vpack.c.bf16 %v3171_v2, %v3170_v9  ;;  %v8017_v16 = vunpack.c.l.bf16 %v8016_v58  ;;  %v8018_v10 = vunpack.c.h.bf16 %v8016_v58 }
 0x40d   : > { %v3168_v47 = vmul.f32 %v6500_v21, %v8014_v38  ;;  %v3179_v17 = vpack.c.bf16 %v3121_v54, %v3120_v48  ;;  %v8020_v20 = vunpack.c.l.bf16 %v8019_v57  ;;  %v8021_v35 = vunpack.c.h.bf16 %v8019_v57  ;;  %v8025_v54 = vld [vmem:[#allocation28_spill] sm:$0xff] }
 0x40e   : > { %v6565_v62 = vmul.f32 %v6497_v12, %v8017_v16  ;;  %v6570_v60 = vmul.f32 %v6518_v44, %v8018_v10  ;;  %2530 = vmatpush.bf16.xpose.msra.mxu3 %v2243_v45  ;;  %3207 = vmatpush.bf16.msra.mxu1 %v3180_v13  ;;  %v8023_v53 = vunpack.c.l.bf16 %v8022_v31  ;;  %v8024_v45 = vunpack.c.h.bf16 %v8022_v31  ;;  %v8028_v10 = vld [vmem:[#allocation29_spill] sm:$0xff] }
 0x40f   : > { %3265 = vmatpush.bf16.msra.mxu0 %v3196_v7  ;;  %3294 = vmatpush.bf16.msra.mxu2 %v3204_v49  ;;  %v3118_v18 = vmul.f32 %v6497_v12, %v8020_v20  ;;  %v3119_v9 = vmul.f32 %v6518_v44, %v8021_v35  ;;  %v8026_v13 = vunpack.c.l.bf16 %v8025_v54  ;;  %v8027_v15 = vunpack.c.h.bf16 %v8025_v54 }
 0x410   : > { %v3182_v2 = vpack.c.bf16 %v6570_v60, %v6565_v62  ;;  %v3150_v43 = vmul.f32 %v6497_v12, %v8023_v53  ;;  %v3151_v48 = vmul.f32 %v6518_v44, %v8024_v45  ;;  %v3195_v55 = vpack.c.bf16 %v3153_v36, %v3152_v30  ;;  %v8031_v53 = vld [vmem:[#allocation27_spill] sm:$0xff] }
 0x411   : > { %v3166_v42 = vmul.f32 %v6497_v12, %v8026_v13  ;;  %v3167_v38 = vmul.f32 %v6518_v44, %v8027_v15  ;;  %v3203_v7 = vpack.c.bf16 %v3169_v34, %v3168_v47  ;;  %v3178_v49 = vpack.c.bf16 %v3119_v9, %v3118_v18  ;;  %v8034_v47 = vld [vmem:[#allocation31_spill] sm:$0xff] }
 0x412   : > { %3208 = vmatpush.bf16.msra.mxu1 %v3179_v17  ;;  %v3194_v58 = vpack.c.bf16 %v3151_v48, %v3150_v43  ;;  %v8029_v57 = vunpack.c.l.bf16 %v8028_v10  ;;  %v8030_v35 = vunpack.c.h.bf16 %v8028_v10  ;;  %v8032_v45 = vunpack.c.l.bf16 %v8031_v53  ;;  %v8037_v43 = vld [vmem:[#allocation32_spill] sm:$0xff] }
 0x413   : > { %3266 = vmatpush.bf16.msra.mxu0 %v3195_v55  ;;  %3295 = vmatpush.bf16.msra.mxu2 %v3203_v7  ;;  %v3202_v16 = vpack.c.bf16 %v3167_v38, %v3166_v42  ;;  %v8033_v30 = vunpack.c.h.bf16 %v8031_v53  ;;  %v8035_v34 = vunpack.c.l.bf16 %v8034_v47  ;;  %v8036_v18 = vunpack.c.h.bf16 %v8034_v47  ;;  %v8040_v55 = vld [vmem:[#allocation36_spill] sm:$0xff] }
 0x414   : > { %v3116_v20 = vmul.f32 %v6492_v59, %v8029_v57  ;;  %v3117_v31 = vmul.f32 %v6494_v56, %v8030_v35  ;;  %v3148_v54 = vmul.f32 %v6492_v59, %v8032_v45  ;;  %v8038_v48 = vunpack.c.l.bf16 %v8037_v43  ;;  %v8046_v45 = vld [vmem:[#allocation34_spill] sm:$0xff] }
 0x415   : > { %v3149_v36 = vmul.f32 %v6494_v56, %v8033_v30  ;;  %v3164_v17 = vmul.f32 %v6492_v59, %v8035_v34  ;;  %v3165_v9 = vmul.f32 %v6494_v56, %v8036_v18  ;;  %v8039_v15 = vunpack.c.h.bf16 %v8037_v43 }
 0x416   : > { %2531 = vmatpush.bf16.xpose.msra.mxu3 %v6482_v33  ;;  %3209 = vmatpush.bf16.msra.mxu1 %v3178_v49  ;;  %v3114_v13 = vmul.f32 %v6488_v61, %v8038_v48  ;;  %v3177_v42 = vpack.c.bf16 %v3117_v31, %v3116_v20  ;;  %v8041_v7 = vunpack.c.l.bf16 %v8040_v55  ;;  %v8042_v57 = vunpack.c.h.bf16 %v8040_v55  ;;  %v8052_v55 = vld [vmem:[#allocation14_spill] sm:$0xff] }
 0x417   : > { %3267 = vmatpush.bf16.msra.mxu0 %v3194_v58  ;;  %3296 = vmatpush.bf16.msra.mxu2 %v3202_v16  ;;  %v3115_v38 = vmul.f32 %v6490_v22, %v8039_v15  ;;  %v3193_v49 = vpack.c.bf16 %v3149_v36, %v3148_v54  ;;  %v3201_v58 = vpack.c.bf16 %v3165_v9, %v3164_v17  ;;  %v8043_v16 = vld [vmem:[#allocation15_spill] sm:$0xff]  ;;  %v8047_v30 = vunpack.c.l.bf16 %v8046_v45 }
 0x418   : > { %v6620_v10 = vmul.f32 %v6500_v21, %v8041_v7  ;;  %v6625_v33 = vmul.f32 %v6503_v0, %v8042_v57  ;;  %v8044_v35 = vunpack.c.l.bf16 %v8043_v16  ;;  %v8045_v31 = vunpack.c.h.bf16 %v8043_v16  ;;  %v8049_v17 = vld [vmem:[#allocation35_spill] sm:$0xff] }
 0x419   : > { %v3162_v47 = vmul.f32 %v6488_v61, %v8047_v30  ;;  %v8048_v34 = vunpack.c.h.bf16 %v8046_v45  ;;  %v3176_v36 = vpack.c.bf16 %v3115_v38, %v3114_v13  ;;  %v8050_v9 = vunpack.c.l.bf16 %v8049_v17  ;;  %v8055_v38 = vld [vmem:[#allocation37_spill] sm:$0xff]  ;;  %v8058_v30 = vld [vmem:[#allocation38_spill] sm:$0xff] }
 0x41a   : > { %v3146_v20 = vmul.f32 %v6488_v61, %v8044_v35  ;;  %v3147_v53 = vmul.f32 %v6490_v22, %v8045_v31  ;;  %3210 = vmatpush.bf16.msra.mxu1 %v3177_v42  ;;  %v3183_v54 = vpack.c.bf16 %v6625_v33, %v6620_v10  ;;  %v8051_v48 = vunpack.c.h.bf16 %v8049_v17 }
 0x41b   : > { %v3163_v18 = vmul.f32 %v6490_v22, %v8048_v34  ;;  %3268 = vmatpush.bf16.msra.mxu0 %v3193_v49  ;;  %3297 = vmatpush.bf16.msra.mxu2 %v3201_v58  ;;  %v3112_v43 = vmul.f32 %v6500_v21, %v8050_v9  ;;  %v8053_v7 = vunpack.c.l.bf16 %v8052_v55  ;;  %v8054_v16 = vunpack.c.h.bf16 %v8052_v55 }
 0x41c   : > { %v3113_v42 = vmul.f32 %v6503_v0, %v8051_v48  ;;  %v3192_v15 = vpack.c.bf16 %v3147_v53, %v3146_v20  ;;  %v8056_v49 = vunpack.c.l.bf16 %v8055_v38  ;;  %v8057_v31 = vunpack.c.h.bf16 %v8055_v38  ;;  %v4887_v53 = vld [vmem:[#allocation5 + $0x78] sm:$0xff] }
 0x41d   : > { %v3144_v57 = vmul.f32 %v6500_v21, %v8053_v7  ;;  %v3145_v35 = vmul.f32 %v6503_v0, %v8054_v16  ;;  %v3200_v13 = vpack.c.bf16 %v3163_v18, %v3162_v47  ;;  %v8059_v34 = vunpack.c.l.bf16 %v8058_v30 }
 0x41e   : > { %2532 = vmatpush.bf16.xpose.msra.mxu3 %v6476_v52  ;;  %3211 = vmatpush.bf16.msra.mxu1 %v3176_v36  ;;  %v3160_v58 = vmul.f32 %v6500_v21, %v8056_v49  ;;  %v3161_v20 = vmul.f32 %v6503_v0, %v8057_v31  ;;  %v3175_v45 = vpack.c.bf16 %v3113_v42, %v3112_v43  ;;  %v8060_v52 = vunpack.c.h.bf16 %v8058_v30  ;;  %v8061_v36 = vld [vmem:[#allocation13_spill] sm:$0xff]  ;;  %v581_v43 = vld [vmem:[#allocation5 + $0x208] sm:$0xf]  ;;  %v8064_v42 = vld [vmem:[#allocation40_spill] sm:$0xff] }
 0x41f   : > { %3269 = vmatpush.bf16.msra.mxu0 %v3192_v15  ;;  %3298 = vmatpush.bf16.msra.mxu2 %v3200_v13  ;;  %v3110_v17 = vmul.f32 %v6497_v12, %v8059_v34  ;;  %v3191_v18 = vpack.c.bf16 %v3145_v35, %v3144_v57  ;;  %v8062_v9 = vunpack.c.l.bf16 %v8061_v36  ;;  %v8063_v55 = vunpack.c.h.bf16 %v8061_v36  ;;  %v4888_v57 = vld [vmem:[#allocation5 + $0x70] sm:$0xff]  ;;  %v8070_v36 = vld [vmem:[#allocation33_spill] sm:$0xff] }
 0x420   : > { %v3111_v47 = vmul.f32 %v6518_v44, %v8060_v52  ;;  %v3199_v15 = vpack.c.bf16 %v3161_v20, %v3160_v58  ;;  %v8065_v16 = vunpack.c.l.bf16 %v8064_v42  ;;  %v8066_v38 = vunpack.c.h.bf16 %v8064_v42  ;;  %v8067_v58 = vld [vmem:[#allocation30_spill] sm:$0xff] }
 0x421   : > { %v3142_v48 = vmul.f32 %v6497_v12, %v8062_v9  ;;  %v3143_v7 = vmul.f32 %v6518_v44, %v8063_v55  ;;  %v8068_v20 = vunpack.c.l.bf16 %v8067_v58  ;;  %v8069_v34 = vunpack.c.h.bf16 %v8067_v58  ;;  %v8073_v42 = vld [vmem:[#allocation22_spill] sm:$0xff] }
 0x422   : > { %3212 = vmatpush.bf16.msra.mxu1 %v3175_v45  ;;  %v3158_v13 = vmul.f32 %v6497_v12, %v8065_v16  ;;  %v3159_v49 = vmul.f32 %v6518_v44, %v8066_v38  ;;  %v3174_v35 = vpack.c.bf16 %v3111_v47, %v3110_v17  ;;  %v4889_v45 = vld [vmem:[#allocation5 + $0x68] sm:$0xff]  ;;  %v8072_v47 = vunpack.c.h.bf16 %v8070_v36 }
 0x423   : > { %3270 = vmatpush.bf16.msra.mxu0 %v3191_v18  ;;  %3299 = vmatpush.bf16.msra.mxu2 %v3199_v15  ;;  %v3190_v31 = vpack.c.bf16 %v3143_v7, %v3142_v48  ;;  %v3132_v30 = vmul.f32 %v6492_v59, %v8068_v20  ;;  %v3133_v52 = vmul.f32 %v6494_v56, %v8069_v34  ;;  %v8071_v18 = vunpack.c.l.bf16 %v8070_v36  ;;  %v4890_v7 = vld [vmem:[#allocation5 + $0x60] sm:$0xff]  ;;  %v4891_v15 = vld [vmem:[#allocation5 + $0x58] sm:$0xff] }
 0x424   : > { %v3131_v9 = vmul.f32 %v6490_v22, %v8072_v47  ;;  %v8074_v16 = vunpack.c.l.bf16 %v8073_v42  ;;  %v8075_v38 = vunpack.c.h.bf16 %v8073_v42  ;;  %v8082_v47 = vld [vmem:[#allocation17_spill] sm:$0xff] }
 0x425   : > { %2533 = vmatmul.bf16.vlgmr.msra.gmra.mxu3 %v581_v43  ;;  %v3130_v17 = vmul.f32 %v6488_v61, %v8071_v18  ;;  %v3185_v48 = vpack.c.bf16 %v3133_v52, %v3132_v30  ;;  %v4892_v43 = vld [vmem:[#allocation5 + $0x50] sm:$0xff]  ;;  %v4894_v30 = vld [vmem:[#allocation5 + $0x40] sm:$0xff] }
 0x426   : > { %3007 = vmatpush.bf16.msrb.mxu3 %v4887_v53  ;;  %3213 = vmatpush.bf16.msra.mxu1 %v3174_v35  ;;  %v3198_v53 = vpack.c.bf16 %v3159_v49, %v3158_v13  ;;  %v3140_v13 = vmul.f32 %v6492_v59, %v8074_v16  ;;  %v3141_v49 = vmul.f32 %v6494_v56, %v8075_v38  ;;  %v8079_v59 = vld [vmem:[#allocation20_spill] sm:$0xff] }
 0x427   : > { %3271 = vmatpush.bf16.msra.mxu0 %v3190_v31  ;;  %v3184_v55 = vpack.c.bf16 %v3131_v9, %v3130_v17  ;;  %v8076_v31 = vld [vmem:[#allocation25_spill] sm:$0xff]  ;;  %v8080_v52 = vunpack.c.l.bf16 %v8079_v59  ;;  %v8081_v56 = vunpack.c.h.bf16 %v8079_v59 }
 0x428   : > { %3300 = vmatpush.bf16.msra.mxu2 %v3198_v53  ;;  %v3189_v35 = vpack.c.bf16 %v3141_v49, %v3140_v13  ;;  %v8077_v53 = vunpack.c.l.bf16 %v8076_v31  ;;  %v8078_v58 = vunpack.c.h.bf16 %v8076_v31 }
 0x429   : > { %v3136_v36 = vmul.f32 %v6500_v21, %v8080_v52  ;;  %v3137_v18 = vmul.f32 %v6503_v0, %v8081_v56 }
 0x42a   : > { %3008 = vmatpush.bf16.msrb.mxu3 %v4888_v57  ;;  %v4893_v57 = vld [vmem:[#allocation5 + $0x48] sm:$0xff]  ;;  %v3139_v20 = vmul.f32 %v6490_v22, %v8078_v58  ;;  %v8084_v22 = vunpack.c.h.bf16 %v8082_v47 }
 0x42b   : > { %v3187_v17 = vpack.c.bf16 %v3137_v18, %v3136_v36 }
 0x42e   : > { %3009 = vmatpush.bf16.msrb.mxu3 %v4889_v45  ;;  %v3138_v45 = vmul.f32 %v6488_v61, %v8077_v53  ;;  %v8083_v61 = vunpack.c.l.bf16 %v8082_v47 }
 0x430   : > { %v3188_v34 = vpack.c.bf16 %v3139_v20, %v3138_v45  ;;  %v3134_v9 = vmul.f32 %v6497_v12, %v8083_v61 }
 0x432   : > { %3010 = vmatpush.bf16.msrb.mxu3 %v4890_v7  ;;  %v3135_v7 = vmul.f32 %v6518_v44, %v8084_v22 }
 0x436   : > { %3011 = vmatpush.bf16.msrb.mxu3 %v4891_v15  ;;  %v3186_v15 = vpack.c.bf16 %v3135_v7, %v3134_v9 }
 0x43a   : > { %3012 = vmatpush.bf16.msrb.mxu3 %v4892_v43 }
 0x43e   : > { %3013 = vmatpush.bf16.msrb.mxu3 %v4893_v57 }
 0x442   : > { %3014 = vmatpush.bf16.msrb.mxu3 %v4894_v30 }
 0x446   : > { %3235 = vmatpush.bf16.msra.mxu3 %v3189_v35 }
 0x44a   : > { %3236 = vmatpush.bf16.msra.mxu3 %v3188_v34 }
 0x44e   : > { %3237 = vmatpush.bf16.msra.mxu3 %v3187_v17 }
 0x451   : > { %v6748_v13 = vpop.f32.mrf.mxu1 }
 0x452   : > { %3238 = vmatpush.bf16.msra.mxu3 %v3186_v15  ;;  %v6750_v38 = vpop.f32.mrf.mxu0 }
 0x453   : > { %8092 = vst [vmem:[#allocation48_spill] sm:$0xff] %v6750_v38 }
 0x456   : > { %3239 = vmatpush.bf16.msra.mxu3 %v3185_v48 }
 0x457   : > { %v6720_v21 = vpop.f32.mrf.mxu3 }
 0x458   : > { %v6752_v49 = vpop.f32.mrf.mxu2 }
 0x459   : > { %v6754_v57 = vpop.f32.mrf.mxu1 }
 0x45a   : > { %3240 = vmatpush.bf16.msra.mxu3 %v3184_v55  ;;  %v6756_v35 = vpop.f32.mrf.mxu0 }
 0x45b   : > { %8093 = vst [vmem:[#allocation56_spill] sm:$0xff] %v6756_v35 }
 0x45e   : > { %3241 = vmatpush.bf16.msra.mxu3 %v3183_v54 }
 0x45f   : > { %v6722_v12 = vpop.f32.mrf.mxu3 }
 0x460   : > { %v6758_v31 = vpop.f32.mrf.mxu2 }
 0x461   : > { %8094 = vst [vmem:[#allocation59_spill] sm:$0xff] %v6758_v31  ;;  %v6760_v53 = vpop.f32.mrf.mxu1 }
 0x462   : > { %3242 = vmatpush.bf16.msra.mxu3 %v3182_v2  ;;  %8095 = vst [vmem:[#allocation61_spill] sm:$0xff] %v6760_v53  ;;  %v6762_v45 = vpop.f32.mrf.mxu0 }
 0x463   : > { %8096 = vst [vmem:[#allocation55_spill] sm:$0xff] %v6762_v45 }
 0x467   : > { %v6724_v0 = vpop.f32.mrf.mxu3 }
 0x468   : > { %8085 = vst [vmem:[#allocation76_spill] sm:$0xff] %v6724_v0  ;;  %v6764_v58 = vpop.f32.mrf.mxu2 }
 0x469   : > { %8097 = vst [vmem:[#allocation58_spill] sm:$0xff] %v6764_v58  ;;  %v6766_v20 = vpop.f32.mrf.mxu1 }
 0x46a   : > { %8098 = vst [vmem:[#allocation60_spill] sm:$0xff] %v6766_v20  ;;  %v6768_v30 = vpop.f32.mrf.mxu0 }
 0x46b   : > { %8099 = vst [vmem:[#allocation57_spill] sm:$0xff] %v6768_v30 }
 0x46f   : > { %v6726_v44 = vpop.f32.mrf.mxu3 }
 0x470   : > { %8086 = vst [vmem:[#allocation85_spill] sm:$0xff] %v6726_v44  ;;  %v6770_v34 = vpop.f32.mrf.mxu2 }
 0x471   : > { %8100 = vst [vmem:[#allocation62_spill] sm:$0xff] %v6770_v34  ;;  %v6772_v59 = vpop.f32.mrf.mxu1 }
 0x472   : > { %8101 = vst [vmem:[#allocation49_spill] sm:$0xff] %v6772_v59  ;;  %v6774_v52 = vpop.f32.mrf.mxu0 }
 0x473   : > { %8102 = vst [vmem:[#allocation50_spill] sm:$0xff] %v6774_v52 }
 0x477   : > { %v6728_v43 = vpop.f32.mrf.mxu3 }
 0x478   : > { %8087 = vst [vmem:[#allocation53_spill] sm:$0xff] %v6728_v43  ;;  %v6776_v36 = vpop.f32.mrf.mxu2 }
 0x479   : > { %8103 = vst [vmem:[#allocation73_spill] sm:$0xff] %v6776_v36  ;;  %v6778_v47 = vpop.f32.mrf.mxu1 }
 0x47a   : > { %8104 = vst [vmem:[#allocation82_spill] sm:$0xff] %v6778_v47  ;;  %v6780_v61 = vpop.f32.mrf.mxu0 }
 0x47b   : > { %8105 = vst [vmem:[#allocation69_spill] sm:$0xff] %v6780_v61 }
 0x47f   : > { %v6730_v48 = vpop.f32.mrf.mxu3 }
 0x480   : > { %8088 = vst [vmem:[#allocation70_spill] sm:$0xff] %v6730_v48  ;;  %v6782_v9 = vpop.f32.mrf.mxu2 }
 0x481   : > { %8106 = vst [vmem:[#allocation81_spill] sm:$0xff] %v6782_v9 }
 0x487   : > { %v6732_v55 = vpop.f32.mrf.mxu3 }
 0x488   : > { %8089 = vst [vmem:[#allocation54_spill] sm:$0xff] %v6732_v55 }
 0x48f   : > { %v6734_v10 = vpop.f32.mrf.mxu3 }
 0x490   : > { %8090 = vst [vmem:[#allocation47_spill] sm:$0xff] %v6734_v10 }
 0x4a8   : > { %v6736_v33 = vpop.f32.mrf.mxu3 }
 0x4a9   : > { %v2697_v62 = vsel %vm8091_vm4, %v6736_v33, -inf  ;;  %v2545_v60 = vrot.slane %v6736_v33, 3  ;;  %v2539_v2 = vrot.slane %v6736_v33, 1  ;;  %v2557_v42 = vrot.slane %v6736_v33, 7 }
 0x4aa   : > { %2698 = vmax.xlane.f32.xlu2 %v2697_v62  ;;  %v2551_v16 = vrot.slane %v6736_v33, 5  ;;  %v8116_v40 = vrot.slane %v6736_v33, 4 }
 0x4ab   : > { %2546 = vrot.lane.b32.xlu1 %v2545_v60, %s5067_s15  ;;  %2540 = vrot.lane.b32.xlu0 %v2539_v2, %s5067_s15  ;;  %v2543_v2 = vrot.slane %v6736_v33, 2 }
 0x4b0   : > { %v2536_v54 = vpop.f32.mrf.mxu3 }
 0x4b1   : > { %v6785_v54 = vpop.f32.mrf.mxu1 }
 0x4b2   : > { %8107 = vst [vmem:[#allocation74_spill] sm:$0xff] %v6785_v54 }
 0x4b3   : > { %2558 = vrot.lane.b32.xlu1 %v2557_v42, %s5067_s15  ;;  %v6787_v42 = vpop.f32.mrf.mxu0 }
 0x4b4   : > { %8108 = vst [vmem:[#allocation83_spill] sm:$0xff] %v6787_v42 }
 0x4b9   : > { %v6860_v26 = vpop.f32.mrf.mxu1 }
 0x4ba   : > { %8112 = vst [vmem:[#allocation52_spill] sm:$0xff] %v6860_v26 }
 0x4bb   : > { %2552 = vrot.lane.b32.xlu1 %v2551_v16, %s5067_s15  ;;  %v6789_v16 = vpop.f32.mrf.mxu2  ;;  %v6874_v51 = vpop.f32.mrf.mxu0 }
 0x4bc   : > { %8109 = vst [vmem:[#allocation51_spill] sm:$0xff] %v6789_v16 }
 0x4bd   : > { %8113 = vst [vmem:[#allocation84_spill] sm:$0xff] %v6874_v51 }
 0x51d   : > { %v2699_v56 = vpop.xlane.xlu2 %2698  ;;  %v2547_v15 = vpop.permute.xlu1 %2546 }
 0x51e   : > { %v2700_v18 = vrot.slane %v2699_v56, 4  ;;  %v2541_v60 = vpop.permute.xlu0 %2540 }
 0x51f   : > { %v2561_v11 = vsel %vm8111_vm7, %v6736_v33, %v2541_v60  ;;  %vm8117_vm7 = vmmov %vm8115_vm6 }
 0x520   : > { %v2701_v17 = vmax.f32 %v2699_v56, %v2700_v18  ;;  %v2562_v18 = vsel %vm8110_vm5, %v2543_v2, %v2547_v15 }
 0x521   : > { %v6794_v46 = vperm.slane %v2562_v18, 0 }
 0x522   : > { %v2702_v22 = vrot.slane %v2701_v17, 2 }
 0x524   : > { %v2703_v7 = vmax.f32 %v2701_v17, %v2702_v22  ;;  %v6796_v17 = vperm.slane %v2561_v11, 0  ;;  %v2555_v22 = vrot.slane %v6736_v33, 6 }
 0x525   : > { %v2559_v14 = vpop.permute.xlu1 %2558 }
 0x526   : > { %v2704_v62 = vrot.slane %v2703_v7, 1 }
 0x528   : > { %v2705_v56 = vmax.f32 %v2703_v7, %v2704_v62 }
 0x52a   : > { %v6801_v37 = vadd.f32 %v2705_v56, %v6720_v21  ;;  %v6804_v29 = vadd.f32 %v2705_v56, %v6748_v13  ;;  %v6807_v7 = vadd.f32 %v2705_v56, %v6750_v38  ;;  %v6810_v15 = vadd.f32 %v2705_v56, %v6752_v49 }
 0x52b   : > { %v6813_v11 = vadd.f32 %v2705_v56, %v6722_v12  ;;  %v6816_v62 = vadd.f32 %v2705_v56, %v6754_v57  ;;  %v6819_v60 = vadd.f32 %v2705_v56, %v6756_v35  ;;  %v6822_v2 = vadd.f32 %v2705_v56, %v6758_v31 }
 0x52c   : > { %v6825_v18 = vadd.f32 %v2705_v56, %v6724_v0  ;;  %v6828_v24 = vadd.f32 %v2705_v56, %v6760_v53  ;;  %v6831_v4 = vadd.f32 %v2705_v56, %v6762_v45  ;;  %v6834_v3 = vadd.f32 %v2705_v56, %v6764_v58 }
 0x52d   : > { %v6837_v63 = vadd.f32 %v2705_v56, %v6726_v44  ;;  %v6840_v25 = vadd.f32 %v2705_v56, %v6766_v20  ;;  %v6843_v5 = vadd.f32 %v2705_v56, %v6768_v30  ;;  %v6846_v32 = vadd.f32 %v2705_v56, %v6770_v34 }
 0x52e   : > { %v6849_v19 = vadd.f32 %v2705_v56, %v6728_v43  ;;  %v6852_v41 = vadd.f32 %v2705_v56, %v6772_v59  ;;  %v6855_v6 = vadd.f32 %v2705_v56, %v6774_v52  ;;  %v6858_v8 = vadd.f32 %v2705_v56, %v6776_v36  ;;  %v6876_v52 = vpop.f32.mrf.mxu2 }
 0x52f   : > { %v6863_v28 = vadd.f32 %v2705_v56, %v6730_v48  ;;  %v6866_v30 = vadd.f32 %v2705_v56, %v6778_v47  ;;  %v6869_v43 = vadd.f32 %v2705_v56, %v6780_v61  ;;  %v6872_v59 = vadd.f32 %v2705_v56, %v6782_v9  ;;  %8114 = vst [vmem:[#allocation87_spill] sm:$0xff] %v6876_v52 }
 0x530   : > { %v6879_v36 = vadd.f32 %v2705_v56, %v6732_v55  ;;  %v6882_v45 = vadd.f32 %v2705_v56, %v6785_v54  ;;  %v6885_v48 = vadd.f32 %v2705_v56, %v6787_v42  ;;  %v6888_v47 = vadd.f32 %v2705_v56, %v6789_v16 }
 0x531   : > { %v6891_v61 = vadd.f32 %v2705_v56, %v6734_v10  ;;  %v6894_v9 = vadd.f32 %v2705_v56, %v6860_v26  ;;  %v6897_v34 = vadd.f32 %v2705_v56, %v6874_v51  ;;  %v6900_v55 = vadd.f32 %v2705_v56, %v6876_v52  ;;  %v2553_v51 = vpop.permute.xlu1 %2552 }
 0x532   : > { %vm2738_vm8 = vcmp.gt.f32.partialorder %v6801_v37, 0.0  ;;  %vm2739_vm11 = vcmp.gt.f32.partialorder %v6804_v29, 0.0  ;;  %vm2740_vm12 = vcmp.gt.f32.partialorder %v6807_v7, 0.0  ;;  %vm2741_vm2 = vcmp.gt.f32.partialorder %v6810_v15, 0.0 }
 0x533   : > { %vm2742_vm3 = vcmp.gt.f32.partialorder %v6813_v11, 0.0  ;;  %vm2743_vm9 = vcmp.gt.f32.partialorder %v6816_v62, 0.0  ;;  %vm2744_vm10 = vcmp.gt.f32.partialorder %v6819_v60, 0.0  ;;  %vm2745_vm13 = vcmp.gt.f32.partialorder %v6822_v2, 0.0 }
 0x534   : > { %vm2746_vm14 = vcmp.gt.f32.partialorder %v6825_v18, 0.0  ;;  %v2770_v56 = vmul.f32 0.2, %v6801_v37  ;;  %v2771_v42 = vmul.f32 0.2, %v6804_v29  ;;  %vm2752_vm5 = vcmp.gt.f32.partialorder %v6843_v5, 0.0 }
 0x535   : > { %v2772_v52 = vmul.f32 0.2, %v6807_v7  ;;  %v2773_v16 = vmul.f32 0.2, %v6810_v15  ;;  %v2774_v26 = vmul.f32 0.2, %v6813_v11  ;;  %v6924_v54 = vsel %vm8115_vm6, %v2555_v22, %v2559_v14 }
 0x536   : > { %vm2757_vm4 = vcmp.gt.f32.partialorder %v6858_v8, 0.0  ;;  %v2775_v10 = vmul.f32 0.2, %v6816_v62  ;;  %v2776_v58 = vmul.f32 0.2, %v6819_v60  ;;  %v6936_v20 = vsel %vm8117_vm7, %v8116_v40, %v2553_v51 }
 0x537   : > { %v2777_v23 = vmul.f32 0.2, %v6822_v2  ;;  %vm2761_vm15 = vcmp.gt.f32.partialorder %v6872_v59, 0.0  ;;  %v2778_v14 = vmul.f32 0.2, %v6825_v18  ;;  %v6948_v33 = vsel %vm2738_vm8, %v6801_v37, %v2770_v56 }
 0x538   : > { %v2779_v22 = vmul.f32 0.2, %v6828_v24  ;;  %v2780_v53 = vmul.f32 0.2, %v6831_v4  ;;  %8118 = vst [vmem:[#allocation88_spill] sm:$0xff] %v6948_v33  ;;  %vm2763_vm6 = vcmp.gt.f32.partialorder %v6882_v45, 0.0  ;;  %v6960_v0 = vsel %vm2739_vm11, %v6804_v29, %v2771_v42 }
 0x539   : > { %vm2765_vm1 = vcmp.gt.f32.partialorder %v6888_v47, 0.0  ;;  %vm2766_vm0 = vcmp.gt.f32.partialorder %v6891_v61, 0.0  ;;  %v2781_v40 = vmul.f32 0.2, %v6834_v3  ;;  %v2782_v51 = vmul.f32 0.2, %v6837_v63 }
 0x53a   : > { %v2783_v44 = vmul.f32 0.2, %v6840_v25  ;;  %8119 = vst [vmem:[#allocation19_spill] sm:$0xff] %v6960_v0  ;;  %vm2767_vm8 = vcmp.gt.f32.partialorder %v6894_v9, 0.0  ;;  %vm2769_vm7 = vcmp.gt.f32.partialorder %v6900_v55, 0.0  ;;  %v6970_v27 = vsel %vm2740_vm12, %v6807_v7, %v2772_v52 }
 0x53b   : > { %v2784_v37 = vmul.f32 0.2, %v6843_v5  ;;  %v2785_v56 = vmul.f32 0.2, %v6846_v32  ;;  %v2786_v50 = vmul.f32 0.2, %v6849_v19  ;;  %v6978_v0 = vsel %vm2741_vm2, %v6810_v15, %v2773_v16 }
 0x53c   : > { %8120 = vst [vmem:[#allocation41_spill] sm:$0xff] %v6970_v27  ;;  %v2787_v33 = vmul.f32 0.2, %v6852_v41  ;;  %v2788_v29 = vmul.f32 0.2, %v6855_v6  ;;  %v6986_v52 = vsel %vm2742_vm3, %v6813_v11, %v2774_v26  ;;  %v6994_v16 = vsel %vm2743_vm9, %v6816_v62, %v2775_v10 }
 0x53d   : > { %v2789_v42 = vmul.f32 0.2, %v6858_v8  ;;  %8121 = vst [vmem:[#allocation23_spill] sm:$0xff] %v6978_v0  ;;  %v2790_v1 = vmul.f32 0.2, %v6863_v28  ;;  %v7004_v26 = vsel %vm2744_vm10, %v6819_v60, %v2776_v58  ;;  %v7014_v62 = vsel %vm2745_vm13, %v6822_v2, %v2777_v23 }
 0x53e   : > { %v2791_v39 = vmul.f32 0.2, %v6866_v30  ;;  %v2792_v35 = vmul.f32 0.2, %v6869_v43  ;;  %8122 = vst [vmem:[#allocation24_spill] sm:$0xff] %v6986_v52  ;;  %vm8124_vm11 = vcmp.gt.f32.partialorder %v6828_v24, 0.0 }
 0x53f   : > { %v2793_v7 = vmul.f32 0.2, %v6872_v59  ;;  %v2794_v27 = vmul.f32 0.2, %v6879_v36  ;;  %v2795_v38 = vmul.f32 0.2, %v6882_v45  ;;  %v7024_v58 = vsel %vm8124_vm11, %v6828_v24, %v2779_v22 }
 0x540   : > { %v6997_v15 = vmul.f32 0.2, %v6885_v48  ;;  %v2797_v0 = vmul.f32 0.2, %v6888_v47  ;;  %v2798_v31 = vmul.f32 0.2, %v6891_v61 }
 0x541   : > { %v2799_v11 = vmul.f32 0.2, %v6894_v9  ;;  %v7008_v52 = vmul.f32 0.2, %v6897_v34  ;;  %v2801_v10 = vmul.f32 0.2, %v6900_v55 }
 0x542   : > { %8123 = vst [vmem:[#allocation42_spill] sm:$0xff] %v6997_v15  ;;  %v7019_v15 = vsel %vm2746_vm14, %v6825_v18, %v2778_v14  ;;  %vm8125_vm12 = vcmp.gt.f32.partialorder %v6831_v4, 0.0  ;;  %vm8126_vm2 = vcmp.gt.f32.partialorder %v6834_v3, 0.0  ;;  %vm8127_vm3 = vcmp.gt.f32.partialorder %v6837_v63, 0.0  ;;  %v8142_v14 = vld [vmem:[#allocation68_spill] sm:$0xff] }
 0x543   : > { %v7029_v60 = vsel %vm8125_vm12, %v6831_v4, %v2780_v53  ;;  %v7034_v23 = vsel %vm8126_vm2, %v6834_v3, %v2781_v40  ;;  %v7039_v2 = vsel %vm8127_vm3, %v6837_v63, %v2782_v51  ;;  %vm8128_vm9 = vcmp.gt.f32.partialorder %v6840_v25, 0.0 }
 0x544   : > { %v7044_v24 = vsel %vm8128_vm9, %v6840_v25, %v2783_v44  ;;  %v7049_v4 = vsel %vm2752_vm5, %v6843_v5, %v2784_v37  ;;  %vm8129_vm10 = vcmp.gt.f32.partialorder %v6846_v32, 0.0  ;;  %vm8130_vm13 = vcmp.gt.f32.partialorder %v6849_v19, 0.0 }
 0x545   : > { %v7054_v3 = vsel %vm8129_vm10, %v6846_v32, %v2785_v56  ;;  %v7059_v63 = vsel %vm8130_vm13, %v6849_v19, %v2786_v50  ;;  %vm8131_vm14 = vcmp.gt.f32.partialorder %v6852_v41, 0.0  ;;  %vm8132_vm11 = vcmp.gt.f32.partialorder %v6855_v6, 0.0 }
 0x546   : > { %v7064_v25 = vsel %vm8131_vm14, %v6852_v41, %v2787_v33  ;;  %v7069_v5 = vsel %vm8132_vm11, %v6855_v6, %v2788_v29  ;;  %v7074_v32 = vsel %vm2757_vm4, %v6858_v8, %v2789_v42  ;;  %vm8133_vm5 = vcmp.gt.f32.partialorder %v6863_v28, 0.0 }
 0x547   : > { %v7079_v50 = vsel %vm8133_vm5, %v6863_v28, %v2790_v1  ;;  %vm8134_vm12 = vcmp.gt.f32.partialorder %v6866_v30, 0.0  ;;  %vm8135_vm2 = vcmp.gt.f32.partialorder %v6869_v43, 0.0  ;;  %v7094_v8 = vsel %vm2761_vm15, %v6872_v59, %v2793_v7 }
 0x548   : > { %v7084_v41 = vsel %vm8134_vm12, %v6866_v30, %v2791_v39  ;;  %v7089_v6 = vsel %vm8135_vm2, %v6869_v43, %v2792_v35  ;;  %vm8136_vm4 = vcmp.gt.f32.partialorder %v6879_v36, 0.0  ;;  %v7104_v39 = vsel %vm2763_vm6, %v6882_v45, %v2795_v38  ;;  %v8137_v45 = vld [vmem:[#allocation59_spill] sm:$0xff] }
 0x549   : > { %v7099_v1 = vsel %vm8136_vm4, %v6879_v36, %v2794_v27  ;;  %v7109_v28 = vsel %vm2765_vm1, %v6888_v47, %v2797_v0  ;;  %v7114_v19 = vsel %vm2766_vm0, %v6891_v61, %v2798_v31  ;;  %v7119_v27 = vsel %vm2767_vm8, %v6894_v9, %v2799_v11  ;;  %v8139_v36 = vld [vmem:[#allocation56_spill] sm:$0xff] }
 0x54a   : > { %v7124_v44 = vsel %vm2769_vm7, %v6900_v55, %v2801_v10  ;;  %v7127_v43 = vperm.slane %v6924_v54, 0  ;;  %v7130_v0 = vperm.slane %v6936_v20, 0  ;;  %v2569_v38 = vadd.f32 %v6796_v17, %v6720_v21  ;;  %v8138_v20 = vld [vmem:[#allocation48_spill] sm:$0xff] }
 0x54b   : > { %v2573_v35 = vadd.f32 %v6796_v17, %v6722_v12  ;;  %v2570_v31 = vadd.f32 %v6794_v46, %v6748_v13  ;;  %v2574_v53 = vadd.f32 %v6794_v46, %v6754_v57  ;;  %v8143_v22 = vunpack.c.l.bf16 %v8142_v14  ;;  %v8146_v10 = vld [vmem:[#allocation88_spill] sm:$0xff] }
 0x54c   : > { %v2572_v55 = vadd.f32 %v7127_v43, %v6752_v49  ;;  %v2576_v30 = vadd.f32 %v7127_v43, %v8137_v45  ;;  %v2571_v59 = vadd.f32 %v7130_v0, %v8138_v20  ;;  %v2575_v21 = vadd.f32 %v7130_v0, %v8139_v36  ;;  %v8140_v49 = vld [vmem:[#allocation67_spill] sm:$0xff] }
 0x54d   : > { %vm2601_vm0 = vcmp.gt.f32.partialorder %v2569_v38, 0.0  ;;  %vm2605_vm1 = vcmp.gt.f32.partialorder %v2573_v35, 0.0  ;;  %v2633_v12 = vmul.f32 0.2, %v2569_v38  ;;  %v2637_v47 = vmul.f32 0.2, %v2573_v35 }
 0x54e   : > { %vm2602_vm15 = vcmp.gt.f32.partialorder %v2570_v31, 0.0  ;;  %vm2606_vm6 = vcmp.gt.f32.partialorder %v2574_v53, 0.0  ;;  %v2634_v13 = vmul.f32 0.2, %v2570_v31  ;;  %v2638_v57 = vmul.f32 0.2, %v2574_v53 }
 0x54f   : > { %v2665_v61 = vsel %vm2601_vm0, %v2569_v38, %v2633_v12  ;;  %v2669_v9 = vsel %vm2605_vm1, %v2573_v35, %v2637_v47  ;;  %vm2604_vm7 = vcmp.gt.f32.partialorder %v2572_v55, 0.0  ;;  %vm2608_vm8 = vcmp.gt.f32.partialorder %v2576_v30, 0.0  ;;  %v8147_v35 = vld [vmem:[#allocation24_spill] sm:$0xff]  ;;  %v8148_v20 = vld [vmem:[#allocation19_spill] sm:$0xff] }
 0x550   : > { %v8141_v54 = vunpack.c.l.bf16 %v8140_v49  ;;  %v2838_v33 = vadd.f32 %v2669_v9, %v8143_v22  ;;  %v2666_v40 = vsel %vm2602_vm15, %v2570_v31, %v2634_v13  ;;  %v2670_v51 = vsel %vm2606_vm6, %v2574_v53, %v2638_v57  ;;  %v8149_v57 = vld [vmem:[#allocation63_spill] sm:$0xff] }
 0x551   : > { %v8144_v37 = vunpack.c.h.bf16 %v8140_v49  ;;  %v8145_v29 = vunpack.c.h.bf16 %v8142_v14  ;;  %v2636_v7 = vmul.f32 0.2, %v2572_v55  ;;  %v2640_v11 = vmul.f32 0.2, %v2576_v30  ;;  %v8151_v49 = vld [vmem:[#allocation64_spill] sm:$0xff] }
 0x552   : > { %v2834_v18 = vadd.f32 %v2665_v61, %v8141_v54  ;;  %v2870_v45 = vsub.f32 %v2838_v33, %v8147_v35  ;;  %vm2603_vm3 = vcmp.gt.f32.partialorder %v2571_v59, 0.0  ;;  %vm2607_vm9 = vcmp.gt.f32.partialorder %v2575_v21, 0.0 }
 0x553   : > { %v2835_v56 = vadd.f32 %v2666_v40, %v8144_v37  ;;  %v2839_v42 = vadd.f32 %v2670_v51, %v8145_v29  ;;  %v2668_v31 = vsel %vm2604_vm7, %v2572_v55, %v2636_v7  ;;  %v2672_v53 = vsel %vm2608_vm8, %v2576_v30, %v2640_v11  ;;  %v8153_v40 = vld [vmem:[#allocation76_spill] sm:$0xff]  ;;  %v8155_v29 = vld [vmem:[#allocation85_spill] sm:$0xff] }
 0x554   : > { %v2866_v38 = vsub.f32 %v2834_v18, %v8146_v10  ;;  %v2906_v13 = vmul.f32 1.442695, %v2870_v45  ;;  %v8150_v61 = vunpack.c.h.bf16 %v8149_v57  ;;  %v8152_v54 = vunpack.c.h.bf16 %v8151_v49 }
 0x555   : > { %v2867_v36 = vsub.f32 %v2835_v56, %v8148_v20  ;;  %v2871_v12 = vsub.f32 %v2839_v42, %v6994_v16  ;;  %v2635_v33 = vmul.f32 0.2, %v2571_v59  ;;  %v2577_v51 = vadd.f32 %v6796_v17, %v8153_v40  ;;  %v8154_v16 = vld [vmem:[#allocation23_spill] sm:$0xff] }
 0x556   : > { %v2898_v47 = vmul.f32 1.442695, %v2866_v38  ;;  %v2837_v9 = vadd.f32 %v2668_v31, %v8150_v61  ;;  %v2841_v18 = vadd.f32 %v2672_v53, %v8152_v54  ;;  %v2639_v30 = vmul.f32 0.2, %v2575_v21  ;;  %v8159_v31 = vld [vmem:[#allocation41_spill] sm:$0xff] }
 0x557   : > { %v2900_v14 = vmul.f32 1.442695, %v2867_v36  ;;  %v2908_v22 = vmul.f32 1.442695, %v2871_v12  ;;  %v2667_v56 = vsel %vm2603_vm3, %v2571_v59, %v2635_v33  ;;  %v2581_v42 = vadd.f32 %v6796_v17, %v8155_v29  ;;  %v8158_v36 = vld [vmem:[#allocation61_spill] sm:$0xff] }
 0x558   : > { %4763 = vpow2.f32 %v2898_v47  ;;  %v2869_v37 = vsub.f32 %v2837_v9, %v8154_v16  ;;  %v2873_v55 = vsub.f32 %v2841_v18, %v7014_v62  ;;  %vm2609_vm10 = vcmp.gt.f32.partialorder %v2577_v51, 0.0  ;;  %v8163_v16 = vld [vmem:[#allocation72_spill] sm:$0xff] }
 0x559   : > { %4765 = vpow2.f32 %v2906_v13  ;;  %v2671_v10 = vsel %vm2607_vm9, %v2575_v21, %v2639_v30  ;;  %v8156_v38 = vunpack.c.l.bf16 %v8149_v57  ;;  %v8157_v45 = vunpack.c.l.bf16 %v8151_v49  ;;  %v8160_v21 = vld [vmem:[#allocation60_spill] sm:$0xff] }
 0x55a   : > { %4767 = vpow2.f32 %v2900_v14  ;;  %v2904_v7 = vmul.f32 1.442695, %v2869_v37  ;;  %v2912_v11 = vmul.f32 1.442695, %v2873_v55  ;;  %vm2613_vm13 = vcmp.gt.f32.partialorder %v2581_v42, 0.0 }
 0x55b   : > { %4769 = vpow2.f32 %v2908_v22  ;;  %v2836_v35 = vadd.f32 %v2667_v56, %v8156_v38  ;;  %v2840_v62 = vadd.f32 %v2671_v10, %v8157_v45  ;;  %v2641_v20 = vmul.f32 0.2, %v2577_v51  ;;  %v8161_v22 = vld [vmem:[#allocation71_spill] sm:$0xff] }
 0x55c   : > { %4771 = vpow2.f32 %v2904_v7  ;;  %v2645_v59 = vmul.f32 0.2, %v2581_v42  ;;  %v2578_v12 = vadd.f32 %v6794_v46, %v8158_v36  ;;  %v2582_v13 = vadd.f32 %v6794_v46, %v8160_v21 }
 0x55d   : > { %4773 = vpow2.f32 %v2912_v11  ;;  %v2868_v53 = vsub.f32 %v2836_v35, %v8159_v31  ;;  %v2872_v47 = vsub.f32 %v2840_v62, %v7004_v26  ;;  %v2673_v61 = vsel %vm2609_vm10, %v2577_v51, %v2641_v20  ;;  %v8166_v62 = vld [vmem:[#allocation58_spill] sm:$0xff] }
 0x55e   : > { %v4764_v57 = vpop.eup %4763  ;;  %v2677_v9 = vsel %vm2613_vm13, %v2581_v42, %v2645_v59  ;;  %vm2610_vm14 = vcmp.gt.f32.partialorder %v2578_v12, 0.0  ;;  %v2642_v49 = vmul.f32 0.2, %v2578_v12  ;;  %v8162_v33 = vunpack.c.l.bf16 %v8161_v22 }
 0x55f   : > { %v4766_v54 = vpop.eup %4765  ;;  %v2902_v18 = vmul.f32 1.442695, %v2868_v53  ;;  %v2910_v14 = vmul.f32 1.442695, %v2872_v47  ;;  %v8164_v37 = vunpack.c.l.bf16 %v8163_v16  ;;  %vm2614_vm11 = vcmp.gt.f32.partialorder %v2582_v13, 0.0  ;;  %v8168_v47 = vld [vmem:[#allocation62_spill] sm:$0xff] }
 0x560   : > { %v2842_v40 = vadd.f32 %v2673_v61, %v8162_v33  ;;  %v4768_v30 = vpop.eup %4767  ;;  %v7189_v26 = vpack.c.bf16 %v4766_v54, %v4764_v57  ;;  %v2646_v56 = vmul.f32 0.2, %v2582_v13  ;;  %v2674_v29 = vsel %vm2610_vm14, %v2578_v12, %v2642_v49 }
 0x561   : > { %v2846_v55 = vadd.f32 %v2677_v9, %v8164_v37  ;;  %v4770_v7 = vpop.eup %4769  ;;  %4775 = vpow2.f32 %v2902_v18  ;;  %v8165_v11 = vunpack.c.h.bf16 %v8161_v22  ;;  %v2580_v20 = vadd.f32 %v7127_v43, %v8166_v62  ;;  %v8169_v9 = vld [vmem:[#allocation55_spill] sm:$0xff]  ;;  %v8170_v22 = vld [vmem:[#allocation65_spill] sm:$0xff]  ;;  %v8176_v62 = vld [vmem:[#allocation70_spill] sm:$0xff] }
 0x562   : > { %v2874_v51 = vsub.f32 %v2842_v40, %v7019_v15  ;;  %v4772_v38 = vpop.eup %4771  ;;  %2986 = vmatmul.bf16.vlgmr.msrb.gmra.mxu1 %v7189_v26  ;;  %v7196_v35 = vpack.c.bf16 %v4770_v7, %v4768_v30  ;;  %4777 = vpow2.f32 %v2910_v14  ;;  %v2678_v45 = vsel %vm2614_vm11, %v2582_v13, %v2646_v56  ;;  %v8173_v56 = vld [vmem:[#allocation53_spill] sm:$0xff] }
 0x563   : > { %v2878_v42 = vsub.f32 %v2846_v55, %v7039_v2  ;;  %v2843_v10 = vadd.f32 %v2674_v29, %v8165_v11  ;;  %v4774_v59 = vpop.eup %4773  ;;  %v8167_v15 = vunpack.c.h.bf16 %v8163_v16  ;;  %v2584_v21 = vadd.f32 %v7127_v43, %v8168_v47  ;;  %v8172_v16 = vld [vmem:[#allocation57_spill] sm:$0xff] }
 0x564   : > { %v2914_v36 = vmul.f32 1.442695, %v2874_v51  ;;  %3015 = vmatmul.bf16.vlgmr.msrb.gmra.mxu3 %v7196_v35  ;;  %v7204_v53 = vpack.c.bf16 %v4774_v59, %v4772_v38  ;;  %vm2612_vm5 = vcmp.gt.f32.partialorder %v2580_v20, 0.0  ;;  %v2644_v13 = vmul.f32 0.2, %v2580_v20  ;;  %v8174_v51 = vld [vmem:[#allocation66_spill] sm:$0xff] }
 0x565   : > { %v2922_v12 = vmul.f32 1.442695, %v2878_v42  ;;  %v2847_v31 = vadd.f32 %v2678_v45, %v8167_v15  ;;  %v2875_v2 = vsub.f32 %v2843_v10, %v7024_v58  ;;  %v2579_v49 = vadd.f32 %v7130_v0, %v8169_v9 }
 0x566   : > { %4779 = vpow2.f32 %v2914_v36  ;;  %3073 = vmatmul.bf16.vlgmr.msrb.gmra.mxu2 %v7204_v53  ;;  %vm2616_vm12 = vcmp.gt.f32.partialorder %v2584_v21, 0.0  ;;  %v2648_v58 = vmul.f32 0.2, %v2584_v21  ;;  %v2676_v54 = vsel %vm2612_vm5, %v2580_v20, %v2644_v13 }
 0x567   : > { %v2879_v57 = vsub.f32 %v2847_v31, %v7044_v24  ;;  %v2916_v61 = vmul.f32 1.442695, %v2875_v2  ;;  %4781 = vpow2.f32 %v2922_v12  ;;  %v4776_v18 = vpop.eup %4775  ;;  %v8171_v33 = vunpack.c.h.bf16 %v8170_v22 }
 0x568   : > { %v2583_v37 = vadd.f32 %v7130_v0, %v8172_v16  ;;  %v4778_v24 = vpop.eup %4777  ;;  %v2680_v55 = vsel %vm2616_vm12, %v2584_v21, %v2648_v58  ;;  %vm2611_vm2 = vcmp.gt.f32.partialorder %v2579_v49, 0.0  ;;  %v2643_v30 = vmul.f32 0.2, %v2579_v49 }
 0x569   : > { %4783 = vpow2.f32 %v2916_v61  ;;  %v2924_v14 = vmul.f32 1.442695, %v2879_v57  ;;  %v2845_v40 = vadd.f32 %v2676_v54, %v8171_v33  ;;  %v2585_v29 = vadd.f32 %v6796_v17, %v8173_v56 }
 0x56a   : > { %v7218_v7 = vpack.c.bf16 %v4778_v24, %v4776_v18  ;;  %v8175_v42 = vunpack.c.h.bf16 %v8174_v51  ;;  %vm2615_vm4 = vcmp.gt.f32.partialorder %v2583_v37, 0.0  ;;  %v2647_v38 = vmul.f32 0.2, %v2583_v37  ;;  %v8179_v18 = vld [vmem:[#allocation49_spill] sm:$0xff]  ;;  %v8182_v24 = vld [vmem:[#allocation78_spill] sm:$0xff] }
 0x56b   : > { %4785 = vpow2.f32 %v2924_v14  ;;  %v2877_v10 = vsub.f32 %v2845_v40, %v7034_v23  ;;  %v2675_v45 = vsel %vm2611_vm2, %v2579_v49, %v2643_v30  ;;  %v2589_v20 = vadd.f32 %v6796_v17, %v8176_v62  ;;  %v8180_v40 = vld [vmem:[#allocation77_spill] sm:$0xff] }
 0x56c   : > { %v2849_v11 = vadd.f32 %v2680_v55, %v8175_v42  ;;  %v4780_v59 = vpop.eup %4779  ;;  %3044 = vmatmul.bf16.vlgmr.msrb.gmra.mxu0 %v7218_v7  ;;  %v8177_v15 = vunpack.c.l.bf16 %v8170_v22  ;;  %vm2617_vm0 = vcmp.gt.f32.partialorder %v2585_v29, 0.0  ;;  %v2679_v47 = vsel %vm2615_vm4, %v2583_v37, %v2647_v38  ;;  %v8184_v42 = vld [vmem:[#allocation82_spill] sm:$0xff] }
 0x56d   : > { %v2920_v12 = vmul.f32 1.442695, %v2877_v10  ;;  %v4782_v2 = vpop.eup %4781  ;;  %vm2621_vm1 = vcmp.gt.f32.partialorder %v2589_v20, 0.0  ;;  %v2649_v23 = vmul.f32 0.2, %v2585_v29  ;;  %v8178_v9 = vunpack.c.l.bf16 %v8174_v51 }
 0x56e   : > { %v2881_v36 = vsub.f32 %v2849_v11, %v7054_v3  ;;  %v2844_v31 = vadd.f32 %v2675_v45, %v8177_v15  ;;  %v2653_v21 = vmul.f32 0.2, %v2589_v20  ;;  %v7229_v57 = vpack.c.bf16 %v4782_v2, %v4780_v59  ;;  %v8185_v45 = vld [vmem:[#allocation73_spill] sm:$0xff] }
 0x56f   : > { %v4784_v13 = vpop.eup %4783  ;;  %4787 = vpow2.f32 %v2920_v12  ;;  %v2848_v49 = vadd.f32 %v2679_v47, %v8178_v9  ;;  %v2681_v58 = vsel %vm2617_vm0, %v2585_v29, %v2649_v23  ;;  %v2586_v14 = vadd.f32 %v6794_v46, %v8179_v18 }
 0x570   : > { %v2928_v61 = vmul.f32 1.442695, %v2881_v36  ;;  %v2876_v3 = vsub.f32 %v2844_v31, %v7029_v60  ;;  %v2685_v54 = vsel %vm2621_vm1, %v2589_v20, %v2653_v21  ;;  %v8181_v16 = vunpack.c.l.bf16 %v8180_v40  ;;  %v8187_v31 = vld [vmem:[#allocation81_spill] sm:$0xff] }
 0x571   : > { %v4786_v22 = vpop.eup %4785  ;;  %v2880_v33 = vsub.f32 %v2848_v49, %v7049_v4  ;;  %v8183_v55 = vunpack.c.l.bf16 %v8182_v24  ;;  %v2590_v60 = vadd.f32 %v6794_v46, %v8184_v42  ;;  %vm2618_vm15 = vcmp.gt.f32.partialorder %v2586_v14, 0.0 }
 0x572   : > { %4789 = vpow2.f32 %v2928_v61  ;;  %v2850_v37 = vadd.f32 %v2681_v58, %v8181_v16  ;;  %v7241_v56 = vpack.c.bf16 %v4786_v22, %v4784_v13  ;;  %v2918_v51 = vmul.f32 1.442695, %v2876_v3  ;;  %2991 = vmatmul.bf16.gmra.mxu1 %v7229_v57  ;;  %v8189_v61 = vld [vmem:[#allocation50_spill] sm:$0xff]  ;;  %v8191_v16 = vld [vmem:[#allocation45_spill] sm:$0xff] }
 0x573   : > { %v2854_v30 = vadd.f32 %v2685_v54, %v8183_v55  ;;  %v2926_v29 = vmul.f32 1.442695, %v2880_v33  ;;  %v2650_v38 = vmul.f32 0.2, %v2586_v14  ;;  %vm2622_vm6 = vcmp.gt.f32.partialorder %v2590_v60, 0.0 }
 0x574   : > { %v2882_v11 = vsub.f32 %v2850_v37, %v7059_v63  ;;  %4791 = vpow2.f32 %v2918_v51  ;;  %v2654_v4 = vmul.f32 0.2, %v2590_v60  ;;  %v2588_v62 = vadd.f32 %v7127_v43, %v8185_v45  ;;  %3020 = vmatmul.bf16.gmra.mxu3 %v7241_v56 }
 0x575   : > { %v2886_v10 = vsub.f32 %v2854_v30, %v7079_v50  ;;  %v4788_v20 = vpop.eup %4787  ;;  %4793 = vpow2.f32 %v2926_v29  ;;  %v2682_v12 = vsel %vm2618_vm15, %v2586_v14, %v2650_v38  ;;  %v8186_v63 = vunpack.c.h.bf16 %v8180_v40  ;;  %v8190_v14 = vld [vmem:[#allocation69_spill] sm:$0xff] }
 0x576   : > { %v2930_v59 = vmul.f32 1.442695, %v2882_v11  ;;  %v2686_v15 = vsel %vm2622_vm6, %v2590_v60, %v2654_v4  ;;  %v2592_v2 = vadd.f32 %v7127_v43, %v8187_v31  ;;  %vm2620_vm7 = vcmp.gt.f32.partialorder %v2588_v62, 0.0  ;;  %v8193_v60 = vld [vmem:[#allocation46_spill] sm:$0xff] }
 0x577   : > { %v2938_v36 = vmul.f32 1.442695, %v2886_v10  ;;  %v2851_v50 = vadd.f32 %v2682_v12, %v8186_v63  ;;  %v8188_v23 = vunpack.c.h.bf16 %v8182_v24  ;;  %v2652_v13 = vmul.f32 0.2, %v2588_v62 }
 0x578   : > { %v4790_v47 = vpop.eup %4789  ;;  %4795 = vpow2.f32 %v2930_v59  ;;  %v2587_v9 = vadd.f32 %v7130_v0, %v8189_v61  ;;  %vm2624_vm8 = vcmp.gt.f32.partialorder %v2592_v2, 0.0  ;;  %v2656_v54 = vmul.f32 0.2, %v2592_v2 }
 0x579   : > { %v2855_v21 = vadd.f32 %v2686_v15, %v8188_v23  ;;  %v7259_v49 = vpack.c.bf16 %v4790_v47, %v4788_v20  ;;  %4797 = vpow2.f32 %v2938_v36  ;;  %v2883_v3 = vsub.f32 %v2851_v50, %v7064_v25 }
 0x57a   : > { %v2684_v18 = vsel %vm2620_vm7, %v2588_v62, %v2652_v13  ;;  %v2591_v22 = vadd.f32 %v7130_v0, %v8190_v14  ;;  %v4792_v33 = vpop.eup %4791  ;;  %v8192_v37 = vunpack.c.h.bf16 %v8191_v16  ;;  %vm2619_vm3 = vcmp.gt.f32.partialorder %v2587_v9, 0.0  ;;  %v8195_v62 = vld [vmem:[#allocation54_spill] sm:$0xff] }
 0x57b   : > { %v2887_v58 = vsub.f32 %v2855_v21, %v7084_v41  ;;  %3078 = vmatmul.bf16.gmra.mxu2 %v7259_v49  ;;  %v2932_v40 = vmul.f32 1.442695, %v2883_v3  ;;  %v2651_v55 = vmul.f32 0.2, %v2587_v9  ;;  %v4794_v30 = vpop.eup %4793  ;;  %v2688_v25 = vsel %vm2624_vm8, %v2592_v2, %v2656_v54  ;;  %v8198_v2 = vld [vmem:[#allocation47_spill] sm:$0xff]  ;;  %v8199_v3 = vld [vmem:[#allocation74_spill] sm:$0xff] }
 0x57c   : > { %v2853_v24 = vadd.f32 %v2684_v18, %v8192_v37  ;;  %vm2623_vm9 = vcmp.gt.f32.partialorder %v2591_v22, 0.0  ;;  %v2655_v42 = vmul.f32 0.2, %v2591_v22  ;;  %v7268_v41 = vpack.c.bf16 %v4794_v30, %v4792_v33 }
 0x57d   : > { %v2940_v51 = vmul.f32 1.442695, %v2887_v58  ;;  %4799 = vpow2.f32 %v2932_v40  ;;  %v8194_v29 = vunpack.c.h.bf16 %v8193_v60  ;;  %v2683_v4 = vsel %vm2619_vm3, %v2587_v9, %v2651_v55  ;;  %v8203_v55 = vld [vmem:[#allocation80_spill] sm:$0xff] }
 0x57e   : > { %v2885_v10 = vsub.f32 %v2853_v24, %v7074_v32  ;;  %v4796_v38 = vpop.eup %4795  ;;  %v2687_v45 = vsel %vm2623_vm9, %v2591_v22, %v2655_v42  ;;  %v2593_v20 = vadd.f32 %v6796_v17, %v8195_v62  ;;  %3049 = vmatmul.bf16.gmra.mxu0 %v7268_v41  ;;  %v8196_v15 = vunpack.c.l.bf16 %v8191_v16  ;;  %v8200_v22 = vld [vmem:[#allocation79_spill] sm:$0xff] }
 0x57f   : > { %v2857_v11 = vadd.f32 %v2688_v25, %v8194_v29  ;;  %4801 = vpow2.f32 %v2940_v51  ;;  %v4798_v59 = vpop.eup %4797  ;;  %v8197_v50 = vunpack.c.l.bf16 %v8193_v60  ;;  %v2597_v47 = vadd.f32 %v6796_v17, %v8198_v2 }
 0x580   : > { %v2936_v12 = vmul.f32 1.442695, %v2885_v10  ;;  %v2852_v63 = vadd.f32 %v2683_v4, %v8196_v15  ;;  %v7281_v32 = vpack.c.bf16 %v4798_v59, %v4796_v38  ;;  %vm2625_vm10 = vcmp.gt.f32.partialorder %v2593_v20, 0.0  ;;  %v8206_v4 = vld [vmem:[#allocation51_spill] sm:$0xff] }
 0x581   : > { %v2889_v36 = vsub.f32 %v2857_v11, %v7094_v8  ;;  %v2856_v31 = vadd.f32 %v2687_v45, %v8197_v50  ;;  %v2657_v23 = vmul.f32 0.2, %v2593_v20  ;;  %vm2629_vm13 = vcmp.gt.f32.partialorder %v2597_v47, 0.0  ;;  %v8208_v59 = vld [vmem:[#allocation83_spill] sm:$0xff] }
 0x582   : > { %4803 = vpow2.f32 %v2936_v12  ;;  %v2884_v13 = vsub.f32 %v2852_v63, %v7069_v5  ;;  %v2661_v61 = vmul.f32 0.2, %v2597_v47  ;;  %v2594_v58 = vadd.f32 %v6794_v46, %v8199_v3  ;;  %v8202_v5 = vld [vmem:[#allocation52_spill] sm:$0xff]  ;;  %2996 = vmatmul.bf16.gmra.mxu1 %v7281_v32 }
 0x583   : > { %v2944_v21 = vmul.f32 1.442695, %v2889_v36  ;;  %v2888_v8 = vsub.f32 %v2856_v31, %v7089_v6  ;;  %v2689_v9 = vsel %vm2625_vm10, %v2593_v20, %v2657_v23  ;;  %v4800_v54 = vpop.eup %4799  ;;  %v8201_v17 = vunpack.c.l.bf16 %v8200_v22  ;;  %v8207_v20 = vld [vmem:[#allocation87_spill] sm:$0xff]  ;;  %v8209_v12 = vld [vmem:[#allocation84_spill] sm:$0xff] }
 0x584   : > { %v2934_v18 = vmul.f32 1.442695, %v2884_v13  ;;  %vm2764_vm14 = vcmp.gt.f32.partialorder %v6885_v48, 0.0  ;;  %v2693_v16 = vsel %vm2629_vm13, %v2597_v47, %v2661_v61  ;;  %v2598_v6 = vadd.f32 %v6794_v46, %v8202_v5  ;;  %v8215_v5 = vld [vmem:[#allocation42_spill] sm:$0xff] }
 0x585   : > { %4805 = vpow2.f32 %v2944_v21  ;;  %v2942_v14 = vmul.f32 1.442695, %v2888_v8  ;;  %v2858_v33 = vadd.f32 %v2689_v9, %v8201_v17  ;;  %v4802_v40 = vpop.eup %4801  ;;  %vm2626_vm11 = vcmp.gt.f32.partialorder %v2594_v58, 0.0 }
 0x586   : > { %v2658_v37 = vmul.f32 0.2, %v2594_v58  ;;  %v7295_v24 = vpack.c.bf16 %v4802_v40, %v4800_v54  ;;  %4807 = vpow2.f32 %v2934_v18  ;;  %v8204_v30 = vunpack.c.l.bf16 %v8203_v55 }
 0x587   : > { %v2890_v25 = vsub.f32 %v2858_v33, %v7099_v1  ;;  %4809 = vpow2.f32 %v2942_v14  ;;  %vm2630_vm5 = vcmp.gt.f32.partialorder %v2598_v6, 0.0  ;;  %v2662_v42 = vmul.f32 0.2, %v2598_v6  ;;  %v8213_v14 = vld [vmem:[#allocation75_spill] sm:$0xff] }
 0x588   : > { %v2862_v51 = vadd.f32 %v2693_v16, %v8204_v30  ;;  %v2690_v60 = vsel %vm2626_vm11, %v2594_v58, %v2658_v37  ;;  %v4804_v29 = vpop.eup %4803  ;;  %3025 = vmatmul.bf16.gmra.mxu3 %v7295_v24  ;;  %v8205_v10 = vunpack.c.h.bf16 %v8200_v22  ;;  %v2596_v45 = vadd.f32 %v7127_v43, %v8206_v4 }
 0x589   : > { %v2946_v11 = vmul.f32 1.442695, %v2890_v25  ;;  %v2694_v62 = vsel %vm2630_vm5, %v2598_v6, %v2662_v42  ;;  %v2600_v1 = vadd.f32 %v7127_v43, %v8207_v20  ;;  %v2595_v36 = vadd.f32 %v7130_v0, %v8208_v59  ;;  %v3389_v42 = vld [vmem:[%s7327_s10 + $0x8] sm:$0xff] }
 0x58a   : > { %v2894_v46 = vsub.f32 %v2862_v51, %v7114_v19  ;;  %v2859_v38 = vadd.f32 %v2690_v60, %v8205_v10  ;;  %v2599_v15 = vadd.f32 %v7130_v0, %v8209_v12  ;;  %v8210_v50 = vunpack.c.h.bf16 %v8203_v55 }
 0x58b   : > { %v4806_v63 = vpop.eup %4805  ;;  %4811 = vpow2.f32 %v2946_v11  ;;  %vm2628_vm12 = vcmp.gt.f32.partialorder %v2596_v45, 0.0  ;;  %vm2632_vm2 = vcmp.gt.f32.partialorder %v2600_v1, 0.0  ;;  %v2660_v23 = vmul.f32 0.2, %v2596_v45 }
 0x58c   : > { %v2954_v19 = vmul.f32 1.442695, %v2894_v46  ;;  %v2863_v31 = vadd.f32 %v2694_v62, %v8210_v50  ;;  %v2891_v2 = vsub.f32 %v2859_v38, %v7104_v39  ;;  %v7315_v47 = vpack.c.bf16 %v4806_v63, %v4804_v29  ;;  %v4808_v43 = vpop.eup %4807 }
 0x58d   : > { %v2664_v0 = vmul.f32 0.2, %v2600_v1  ;;  %v4810_v8 = vpop.eup %4809  ;;  %v2692_v61 = vsel %vm2628_vm12, %v2596_v45, %v2660_v23  ;;  %vm2627_vm4 = vcmp.gt.f32.partialorder %v2595_v36, 0.0  ;;  %vm2631_vm0 = vcmp.gt.f32.partialorder %v2599_v15, 0.0  ;;  %v3392_v23 = vld [vmem:[%s7327_s10 + $0x20] sm:$0xff] }
 0x58e   : > { %4813 = vpow2.f32 %v2954_v19  ;;  %v2895_v21 = vsub.f32 %v2863_v31, %v7119_v27  ;;  %v2948_v13 = vmul.f32 1.442695, %v2891_v2  ;;  %3083 = vmatmul.bf16.gmra.mxu2 %v7315_v47  ;;  %v2659_v9 = vmul.f32 0.2, %v2595_v36  ;;  %v8211_v27 = vld [vmem:[#allocation86_spill] sm:$0xff]  ;;  %v3390_v2 = vld [vmem:[%s7327_s10 + $0x10] sm:$0xff] }
 0x58f   : > { %v7319_v39 = vpack.c.bf16 %v4810_v8, %v4808_v43  ;;  %v2696_v58 = vsel %vm2632_vm2, %v2600_v1, %v2664_v0  ;;  %v8212_v54 = vunpack.c.h.bf16 %v8211_v27  ;;  %v8214_v22 = vunpack.c.h.bf16 %v8213_v14  ;;  %v3394_v8 = vld [vmem:[%s7327_s10 + $0x30] sm:$0xff] }
 0x590   : > { %4815 = vpow2.f32 %v2948_v13  ;;  %v2956_v3 = vmul.f32 1.442695, %v2895_v21  ;;  %v2663_v33 = vmul.f32 0.2, %v2599_v15  ;;  %v2691_v40 = vsel %vm2627_vm4, %v2595_v36, %v2659_v9  ;;  %v3393_v13 = vld [vmem:[%s7327_s10 + $0x28] sm:$0xff]  ;;  %v3395_v9 = vld [vmem:[%s7327_s10 + $0x38] sm:$0xff] }
 0x591   : > { %v2861_v18 = vadd.f32 %v2692_v61, %v8212_v54  ;;  %v2865_v17 = vadd.f32 %v2696_v58, %v8214_v22  ;;  %v4812_v16 = vpop.eup %4811  ;;  %vm2768_vm1 = vcmp.gt.f32.partialorder %v6897_v34, 0.0  ;;  %v2828_v6 = vsel %vm2764_vm14, %v6885_v48, %v8215_v5  ;;  %3054 = vmatmul.bf16.gmra.mxu0 %v7319_v39 }
 0x592   : > { %4817 = vpow2.f32 %v2956_v3  ;;  %v8216_v37 = vunpack.c.l.bf16 %v8211_v27  ;;  %v2695_v25 = vsel %vm2631_vm0, %v2599_v15, %v2663_v33  ;;  %v8217_v29 = vunpack.c.l.bf16 %v8213_v14 }
 0x593   : > { %v2893_v30 = vsub.f32 %v2861_v18, %v7109_v28  ;;  %v2897_v51 = vsub.f32 %v2865_v17, %v7124_v44  ;;  %v5068_v10 = vmov 0   ;;  %vm3420_vm15 = vcmp.gt.f32.partialorder %v3389_v42, 0.0 }
 0x594   : > { %v2860_v55 = vadd.f32 %v2691_v40, %v8216_v37  ;;  %v4814_v60 = vpop.eup %4813  ;;  %v2864_v46 = vadd.f32 %v2695_v25, %v8217_v29  ;;  %4658 = vset.pattern.permute.xlu1 %v5068_v10  ;;  %4657 = vset.pattern.permute.xlu0 %v5068_v10  ;;  %v2832_v48 = vsel %vm2768_vm1, %v6897_v34, %v7008_v52  ;;  %v3428_v38 = vsel %vm3420_vm15, 1, %v5068_v10  ;;  %v3388_v52 = vld [vmem:[%s7327_s10] sm:$0xff] }
 0x595   : > { %v2952_v28 = vmul.f32 1.442695, %v2893_v30  ;;  %v2960_v44 = vmul.f32 1.442695, %v2897_v51  ;;  %4659 = vset.pattern.permute.xlu2 %v5068_v10  ;;  %v7355_v45 = vpack.c.bf16 %v4814_v60, %v4812_v16  ;;  %3439 = vperm.xlu1 %4658, %v3428_v38   ;;  %vm3419_vm6 = vcmp.gt.f32.partialorder %v3388_v52, 0.0 }
 0x596   : > { %v2892_v11 = vsub.f32 %v2860_v55, %v2828_v6  ;;  %v4816_v4 = vpop.eup %4815  ;;  %v2896_v62 = vsub.f32 %v2864_v46, %v2832_v48  ;;  %v3427_v12 = vsel %vm3419_vm6, 1, %v5068_v10  ;;  %vm3421_vm7 = vcmp.gt.f32.partialorder %v3390_v2, 0.0 }
 0x597   : > { %4819 = vpow2.f32 %v2952_v28  ;;  %3001 = vmatmul.bf16.gmra.mxu1 %v7355_v45  ;;  %3436 = vperm.xlu0 %4657, %v3427_v12   ;;  %vm3423_vm8 = vcmp.gt.f32.partialorder %v3392_v23, 0.0  ;;  %v3429_v43 = vsel %vm3421_vm7, 1, %v5068_v10  ;;  %vm3424_vm3 = vcmp.gt.f32.partialorder %v3393_v13, 0.0 }
 0x598   : > { %v2950_v20 = vmul.f32 1.442695, %v2892_v11  ;;  %v4818_v1 = vpop.eup %4817  ;;  %4821 = vpow2.f32 %v2960_v44  ;;  %v2958_v59 = vmul.f32 1.442695, %v2896_v62  ;;  %v3431_v21 = vsel %vm3423_vm8, 1, %v5068_v10 }
 0x599   : > { %v7358_v34 = vpack.c.bf16 %v4818_v1, %v4816_v4  ;;  %v3432_v0 = vsel %vm3424_vm3, 1, %v5068_v10  ;;  %vm3425_vm9 = vcmp.gt.f32.partialorder %v3394_v8, 0.0  ;;  %vm3426_vm10 = vcmp.gt.f32.partialorder %v3395_v9, 0.0 }
 0x59a   : > { %4823 = vpow2.f32 %v2950_v20  ;;  %v3433_v61 = vsel %vm3425_vm9, 1, %v5068_v10  ;;  %v3434_v3 = vsel %vm3426_vm10, 1, %v5068_v10 }
 0x59b   : > { %4825 = vpow2.f32 %v2958_v59  ;;  %3030 = vmatmul.bf16.gmra.mxu3 %v7358_v34 }
 0x59d   : > { %v4820_v36 = vpop.eup %4819  ;;  %3442 = vperm.xlu1 %4658, %v3429_v43  }
 0x59e   : > { %v4822_v15 = vpop.eup %4821 }
 0x59f   : > { %v2977_v19 = vpack.c.bf16 %v4822_v15, %v4820_v36  ;;  %3448 = vperm.xlu0 %4657, %v3431_v21  }
 0x5a0   : > { %v4824_v63 = vpop.eup %4823 }
 0x5a1   : > { %v4826_v50 = vpop.eup %4825  ;;  %3088 = vmatmul.bf16.gmra.mxu2 %v2977_v19 }
 0x5a2   : > { %v2976_v31 = vpack.c.bf16 %v4826_v50, %v4824_v63 }
 0x5a4   : > { %3059 = vmatmul.bf16.gmra.mxu0 %v2976_v31 }
 0x5a5   : > { %3451 = vperm.xlu1 %4658, %v3432_v0  }
 0x5a7   : > { %3214 = vmatmul.bf16.vlgmr.msra.gmra.mxu1 %v7189_v26  ;;  %3454 = vperm.xlu0 %4657, %v3433_v61   ;;  %v5069_v26 = vmov 1  }
 0x5ab   : > { %3243 = vmatmul.bf16.vlgmr.msra.gmra.mxu3 %v7196_v35  ;;  %v3391_v35 = vld [vmem:[%s7327_s10 + $0x18] sm:$0xff]  ;;  %s3753_s10 = scalar_lea.sflag [#allocation4], %s323_s1 }
 0x5ac   : > { %vm3422_vm13 = vcmp.gt.f32.partialorder %v3391_v35, 0.0 }
 0x5ad   : > { %3457 = vperm.xlu1 %4658, %v3434_v3  }
 0x5af   : > { %4660 = vset.pattern.permute.xlu0 %v5069_v26 }
 0x5b0   : > { %3491 = vperm.xlu0 %4660, %v3427_v12  }
 0x5b1   : > { %3301 = vmatmul.bf16.vlgmr.msra.gmra.mxu2 %v7204_v53  ;;  %v3430_v53 = vsel %vm3422_vm13, 1, %v5068_v10 }
 0x5b2   : > { %3445 = vperm.xlu2 %4659, %v3430_v53  }
 0x5b4   : > { %3272 = vmatmul.bf16.vlgmr.msra.gmra.mxu0 %v7218_v7 }
 0x5b5   : > { %4661 = vset.pattern.permute.xlu1 %v5069_v26 }
 0x5b6   : > { %3494 = vperm.xlu1 %4661, %v3428_v38  }
 0x5b7   : > { %3219 = vmatmul.bf16.gmra.mxu1 %v7229_v57 }
 0x5b8   : > { %3506 = vperm.xlu0 %4660, %v3432_v0  }
 0x5ba   : > { %4662 = vset.pattern.permute.xlu2 %v5069_v26 }
 0x5bb   : > { %3248 = vmatmul.bf16.gmra.mxu3 %v7241_v56  ;;  %3497 = vperm.xlu2 %4662, %v3429_v43  }
 0x5be   : > { %3500 = vperm.xlu1 %4661, %v3430_v53  }
 0x5c1   : > { %3306 = vmatmul.bf16.gmra.mxu2 %v7259_v49 }
 0x5c3   : > { %3503 = vperm.xlu2 %4662, %v3431_v21  }
 0x5c4   : > { %3277 = vmatmul.bf16.gmra.mxu0 %v7268_v41 }
 0x5c6   : > { %3509 = vperm.xlu1 %4661, %v3433_v61  }
 0x5c7   : > { %3224 = vmatmul.bf16.gmra.mxu1 %v7281_v32 }
 0x5cb   : > { %3253 = vmatmul.bf16.gmra.mxu3 %v7295_v24  ;;  %3512 = vperm.xlu2 %4662, %v3434_v3  }
 0x5d1   : > { %3311 = vmatmul.bf16.gmra.mxu2 %v7315_v47 }
 0x5d4   : > { %3282 = vmatmul.bf16.gmra.mxu0 %v7319_v39 }
 0x5d7   : > { %3229 = vmatmul.bf16.gmra.mxu1 %v7355_v45 }
 0x5db   : > { %3258 = vmatmul.bf16.gmra.mxu3 %v7358_v34 }
 0x5df   : > { %v2987_v7 = vpop.f32.mrf.mxu1 }
 0x5e1   : > { %3316 = vmatmul.bf16.gmra.mxu2 %v2977_v19 }
 0x5e4   : > { %3287 = vmatmul.bf16.gmra.mxu0 %v2976_v31 }
 0x5e7   : > { %v3016_v57 = vpop.f32.mrf.mxu3  ;;  %v2989_v56 = vpop.f32.mrf.mxu1 }
 0x5e8   : > { %v3017_v49 = vadd.f32 %v3016_v57, %v2987_v7 }
 0x5e9   : > { %v3045_v41 = vpop.f32.mrf.mxu0  ;;  %v3074_v32 = vpop.f32.mrf.mxu2 }
 0x5ea   : > { %v3046_v24 = vadd.f32 %v3045_v41, %v3017_v49 }
 0x5ec   : > { %v3075_v47 = vadd.f32 %v3074_v32, %v3046_v24 }
 0x5ee   : > { %4827 = vrcp.f32 %v3075_v47 }
 0x5ef   : > { %v3018_v58 = vpop.f32.mrf.mxu3  ;;  %v2992_v27 = vpop.f32.mrf.mxu1 }
 0x5f0   : > { %v3019_v54 = vadd.f32 %v3018_v58, %v2989_v56 }
 0x5f1   : > { %v3047_v39 = vpop.f32.mrf.mxu0  ;;  %v3076_v18 = vpop.f32.mrf.mxu2 }
 0x5f2   : > { %v3048_v14 = vadd.f32 %v3047_v39, %v3019_v54 }
 0x5f4   : > { %v7389_v22 = vadd.f32 %v3076_v18, %v3048_v14  ;;  %v7416_v18 = vld [vmem:[%s7569_s2 + $0x9] ss:$0 sm:$0xff] }
 0x5f6   : > { %4829 = vrcp.f32 %v7389_v22 }
 0x5f7   : > { %v3021_v17 = vpop.f32.mrf.mxu3  ;;  %v2994_v33 = vpop.f32.mrf.mxu1 }
 0x5f8   : > { %v3022_v40 = vadd.f32 %v3021_v17, %v2992_v27  ;;  %v4828_v27 = vpop.eup %4827 }
 0x5fb   : > { %v3050_v16 = vpop.f32.mrf.mxu0 }
 0x5fc   : > { %v3051_v5 = vadd.f32 %v3050_v16, %v3022_v40 }
 0x5fe   : > { %v3079_v6 = vpop.f32.mrf.mxu2 }
 0x5ff   : > { %v7391_v37 = vadd.f32 %v3079_v6, %v3051_v5  ;;  %v3023_v55 = vpop.f32.mrf.mxu3  ;;  %v2997_v30 = vpop.f32.mrf.mxu1 }
 0x600   : > { %v3024_v51 = vadd.f32 %v3023_v55, %v2994_v33 }
 0x603   : > { %v3052_v25 = vpop.f32.mrf.mxu0 }
 0x604   : > { %v3053_v42 = vadd.f32 %v3052_v25, %v3024_v51 }
 0x606   : > { %v3081_v60 = vpop.f32.mrf.mxu2 }
 0x607   : > { %v7393_v29 = vadd.f32 %v3081_v60, %v3053_v42  ;;  %v2999_v11 = vpop.f32.mrf.mxu1  ;;  %v7407_v35 = vpop.permute.xlu1 %3439 }
 0x608   : > { %vm3460_vm0 = vcmp.eq.s32.totalorder %v7407_v35, 1 }
 0x609   : > { %v7409_v41 = vpop.permute.xlu0 %3436 }
 0x60a   : > { %vm3459_vm11 = vcmp.eq.s32.totalorder %v7409_v41, 1 }
 0x60b   : > { %v3026_v46 = vpop.f32.mrf.mxu3 }
 0x60c   : > { %v3027_v10 = vadd.f32 %v3026_v46, %v2997_v30  ;;  %v4830_v30 = vpop.eup %4829 }
 0x60e   : > { %v3055_v48 = vpop.f32.mrf.mxu0 }
 0x60f   : > { %v3056_v28 = vadd.f32 %v3055_v48, %v3027_v10  ;;  %v7411_v54 = vpop.permute.xlu1 %3442  ;;  %v7428_v10 = vpop.permute.xlu2 %3445 }
 0x610   : > { %vm3461_vm9 = vcmp.eq.s32.totalorder %v7411_v54, 1 }
 0x611   : > { %v3084_v44 = vpop.f32.mrf.mxu2  ;;  %v7422_v5 = vpop.permute.xlu0 %3448 }
 0x612   : > { %v3085_v38 = vadd.f32 %v3084_v44, %v3056_v28  ;;  %vm3463_vm12 = vcmp.eq.s32.totalorder %v7422_v5, 1 }
 0x613   : > { %v3028_v4 = vpop.f32.mrf.mxu3 }
 0x614   : > { %v3002_v45 = vpop.f32.mrf.mxu1  ;;  %v3029_v62 = vadd.f32 %v3028_v4, %v2999_v11  ;;  %4831 = vrcp.f32 %v3085_v38 }
 0x615   : > { %4833 = vrcp.f32 %v7391_v37 }
 0x616   : > { %v3057_v20 = vpop.f32.mrf.mxu0 }
 0x617   : > { %v3058_v1 = vadd.f32 %v3057_v20, %v3029_v62  ;;  %v7425_v60 = vpop.permute.xlu1 %3451 }
 0x618   : > { %vm3464_vm6 = vcmp.eq.s32.totalorder %v7425_v60, 1 }
 0x619   : > { %v3086_v59 = vpop.f32.mrf.mxu2 }
 0x61a   : > { %v7395_v34 = vadd.f32 %v3086_v59, %v3058_v1  ;;  %v4832_v59 = vpop.eup %4831 }
 0x61b   : > { %v4834_v37 = vpop.eup %4833 }
 0x61c   : > { %v7397_v52 = vpop.f32.mrf.mxu1 }
 0x61e   : > { %v3031_v36 = vpop.f32.mrf.mxu3 }
 0x61f   : > { %v3032_v12 = vadd.f32 %v3031_v36, %v3002_v45  ;;  %v7433_v36 = vpop.permute.xlu0 %3454 }
 0x620   : > { %vm3465_vm13 = vcmp.eq.s32.totalorder %v7433_v36, 1  ;;  %v4570_v36 = vld [vmem:[#allocation5 + $0x198] sm:$0xff] }
 0x621   : > { %v3060_v15 = vpop.f32.mrf.mxu0 }
 0x622   : > { %v3061_v63 = vadd.f32 %v3060_v15, %v3032_v12 }
 0x624   : > { %v3089_v19 = vpop.f32.mrf.mxu2  ;;  %v3215_v31 = vpop.f32.mrf.mxu1 }
 0x625   : > { %v7399_v50 = vadd.f32 %v3089_v19, %v3061_v63 }
 0x626   : > { %v7401_v2 = vpop.f32.mrf.mxu3 }
 0x629   : > { %v7403_v23 = vpop.f32.mrf.mxu0 }
 0x62c   : > { %v7405_v43 = vpop.f32.mrf.mxu2  ;;  %v3217_v21 = vpop.f32.mrf.mxu1 }
 0x62e   : > { %v3244_v13 = vpop.f32.mrf.mxu3 }
 0x62f   : > { %v3245_v26 = vadd.f32 %v3244_v13, %v3215_v31  ;;  %v3034_v13 = vadd.f32 %v7401_v2, %v7397_v52  ;;  %v4573_v52 = vld [vmem:[#allocation5 + $0x1b0] sm:$0xff] }
 0x631   : > { %v3273_v0 = vpop.f32.mrf.mxu0  ;;  %v3063_v2 = vadd.f32 %v7403_v23, %v3034_v13 }
 0x632   : > { %v3274_v7 = vadd.f32 %v3273_v0, %v3245_v26  ;;  %v7440_v0 = vpop.permute.xlu1 %3457  ;;  %v7445_v26 = vpop.permute.xlu2 %3497 }
 0x633   : > { %v3092_v23 = vadd.f32 %v7405_v43, %v3063_v2  ;;  %vm3516_vm10 = vcmp.eq.s32.totalorder %v7445_v26, 1  ;;  %v4566_v26 = vld [vmem:[#allocation5 + $0x178] sm:$0xff] }
 0x634   : > { %v3302_v8 = vpop.f32.mrf.mxu2  ;;  %v3220_v61 = vpop.f32.mrf.mxu1  ;;  %3658 = vmatpush.bf16.msrb.mxu0 %v4566_v26 }
 0x635   : > { %v3303_v32 = vadd.f32 %v3302_v8, %v3274_v7 }
 0x636   : > { %v3246_v9 = vpop.f32.mrf.mxu3 }
 0x637   : > { %v3247_v24 = vadd.f32 %v3246_v9, %v3217_v21  ;;  %v3322_v39 = vmul.f32 %v4828_v27, %v3303_v32 }
 0x639   : > { %v3275_v3 = vpop.f32.mrf.mxu0  ;;  %v7420_v40 = vadd.f32 %v7416_v18, %v3322_v39 }
 0x63a   : > { %v3276_v14 = vadd.f32 %v3275_v3, %v3247_v24  ;;  %v4574_v3 = vld [vmem:[#allocation5 + $0x1b8] sm:$0xff] }
 0x63b   : > { %v3347_v25 = vmin.f32 %v7420_v40, 0.0  ;;  %3597 = vmatpush.bf16.msrb.mxu3 %v4574_v3  ;;  %vm3339_vm14 = vcmp.gt.f32.partialorder %v7420_v40, 0.0 }
 0x63c   : > { %v3304_v53 = vpop.f32.mrf.mxu2  ;;  %v3222_v56 = vpop.f32.mrf.mxu1 }
 0x63d   : > { %v3305_v16 = vadd.f32 %v3304_v53, %v3276_v14  ;;  %v3355_v44 = vmul.f32 1.442695, %v3347_v25  ;;  %v3504_v25 = vpop.permute.xlu2 %3503 }
 0x63e   : > { %v3249_v57 = vpop.f32.mrf.mxu3  ;;  %vm3518_vm2 = vcmp.eq.s32.totalorder %v3504_v25, 1 }
 0x63f   : > { %v3250_v6 = vadd.f32 %v3249_v57, %v3220_v61  ;;  %v3323_v51 = vmul.f32 %v4830_v30, %v3305_v16  ;;  %4835 = vpow2.f32 %v3355_v44  ;;  %3598 = vmatpush.bf16.msrb.mxu3 %v4573_v52 }
 0x640   : > { %4837 = vrcp.f32 %v7395_v34 }
 0x641   : > { %v3278_v49 = vpop.f32.mrf.mxu0  ;;  %v7431_v28 = vadd.f32 %v7416_v18, %v3323_v51  ;;  %4839 = vrcp.f32 %v7393_v29 }
 0x642   : > { %v3279_v22 = vadd.f32 %v3278_v49, %v3250_v6 }
 0x643   : > { %v3348_v38 = vmin.f32 %v7431_v28, 0.0  ;;  %vm3340_vm1 = vcmp.gt.f32.partialorder %v7431_v28, 0.0 }
 0x644   : > { %v3307_v58 = vpop.f32.mrf.mxu2  ;;  %v3225_v47 = vpop.f32.mrf.mxu1 }
 0x645   : > { %v3308_v45 = vadd.f32 %v3307_v58, %v3279_v22  ;;  %v3357_v9 = vmul.f32 1.442695, %v3348_v38  ;;  %v4836_v53 = vpop.eup %4835 }
 0x646   : > { %v3251_v17 = vpop.f32.mrf.mxu3  ;;  %v4838_v24 = vpop.eup %4837  ;;  %v4343_v39 = vadd.f32 -1.0, %v4836_v53 }
 0x647   : > { %v3252_v62 = vadd.f32 %v3251_v17, %v3222_v56  ;;  %v3324_v19 = vmul.f32 %v4834_v37, %v3308_v45  ;;  %4841 = vpow2.f32 %v3357_v9  ;;  %v4840_v27 = vpop.eup %4839 }
 0x648   : > { %v7461_v51 = vsel %vm3339_vm14, %v7420_v40, %v4343_v39 }
 0x649   : > { %v3280_v33 = vpop.f32.mrf.mxu0  ;;  %v7449_v7 = vadd.f32 %v7416_v18, %v3324_v19  ;;  %v3467_v40 = vsel %vm3459_vm11, %v7461_v51, -1e+30 }
 0x64a   : > { %v3281_v31 = vadd.f32 %v3280_v33, %v3252_v62 }
 0x64b   : > { %v3349_v16 = vmin.f32 %v7449_v7, 0.0  ;;  %vm3341_vm3 = vcmp.gt.f32.partialorder %v7449_v7, 0.0 }
 0x64c   : > { %v3309_v55 = vpop.f32.mrf.mxu2  ;;  %v3227_v4 = vpop.f32.mrf.mxu1 }
 0x64d   : > { %v3310_v29 = vadd.f32 %v3309_v55, %v3281_v31  ;;  %v3359_v43 = vmul.f32 1.442695, %v3349_v16 }
 0x64e   : > { %v3254_v42 = vpop.f32.mrf.mxu3 }
 0x64f   : > { %v3255_v46 = vadd.f32 %v3254_v42, %v3225_v47  ;;  %v3492_v47 = vpop.permute.xlu0 %3491  ;;  %v3325_v33 = vmul.f32 %v4840_v27, %v3310_v29 }
 0x650   : > { %vm3514_vm5 = vcmp.eq.s32.totalorder %v3492_v47, 1 }
 0x651   : > { %v3283_v11 = vpop.f32.mrf.mxu0  ;;  %v7465_v22 = vadd.f32 %v7416_v18, %v3325_v33  ;;  %v3522_v62 = vsel %vm3514_vm5, %v7461_v51, -1e+30 }
 0x652   : > { %v3284_v48 = vadd.f32 %v3283_v11, %v3255_v46  ;;  %v4842_v46 = vpop.eup %4841 }
 0x653   : > { %v3350_v37 = vmin.f32 %v7465_v22, 0.0  ;;  %vm3342_vm5 = vcmp.gt.f32.partialorder %v7465_v22, 0.0 }
 0x654   : > { %v3312_v20 = vpop.f32.mrf.mxu2  ;;  %v3230_v56 = vpop.f32.mrf.mxu1 }
 0x655   : > { %v3313_v1 = vadd.f32 %v3312_v20, %v3284_v48 }
 0x656   : > { %v3256_v12 = vpop.f32.mrf.mxu3 }
 0x657   : > { %v3326_v15 = vmul.f32 %v4832_v59, %v3313_v1  ;;  %v3257_v63 = vadd.f32 %v3256_v12, %v3227_v4  ;;  %v3507_v53 = vpop.permute.xlu0 %3506 }
 0x658   : > { %vm3519_vm7 = vcmp.eq.s32.totalorder %v3507_v53, 1 }
 0x659   : > { %v3285_v21 = vpop.f32.mrf.mxu0  ;;  %v7443_v8 = vadd.f32 %v7416_v18, %v3326_v15  ;;  %v4344_v15 = vadd.f32 -1.0, %v4842_v46  ;;  %v4571_v46 = vld [vmem:[#allocation5 + $0x1a0] sm:$0xff] }
 0x65a   : > { %v3286_v61 = vadd.f32 %v3285_v21, %v3257_v63 }
 0x65b   : > { %v3351_v34 = vmin.f32 %v7443_v8, 0.0  ;;  %vm3343_vm4 = vcmp.gt.f32.partialorder %v7443_v8, 0.0  ;;  %v7487_v5 = vsel %vm3340_vm1, %v7431_v28, %v4344_v15  ;;  %v4564_v15 = vld [vmem:[#allocation5 + $0x168] sm:$0xff] }
 0x65c   : > { %v3314_v57 = vpop.f32.mrf.mxu2  ;;  %v3232_v20 = vpop.f32.mrf.mxu1 }
 0x65d   : > { %v3315_v49 = vadd.f32 %v3314_v57, %v3286_v61  ;;  %v3363_v32 = vmul.f32 1.442695, %v3351_v34 }
 0x65e   : > { %v3259_v58 = vpop.f32.mrf.mxu3 }
 0x65f   : > { %v3327_v14 = vmul.f32 %v4838_v24, %v3315_v49  ;;  %v3260_v17 = vadd.f32 %v3259_v58, %v3230_v56  ;;  %4843 = vpow2.f32 %v3363_v32  ;;  %v3468_v58 = vsel %vm3460_vm0, %v7487_v5, -1e+30 }
 0x660   : > { %4845 = vrcp.f32 %v7399_v50  ;;  %v3495_v50 = vpop.permute.xlu1 %3494 }
 0x661   : > { %v3288_v6 = vpop.f32.mrf.mxu0  ;;  %v7456_v55 = vadd.f32 %v7416_v18, %v3327_v14  ;;  %4847 = vrcp.f32 %v3092_v23  ;;  %vm3515_vm15 = vcmp.eq.s32.totalorder %v3495_v50, 1  ;;  %v4572_v50 = vld [vmem:[#allocation5 + $0x1a8] sm:$0xff] }
 0x662   : > { %v3289_v30 = vadd.f32 %v3288_v6, %v3260_v17  ;;  %v3523_v28 = vsel %vm3515_vm15, %v7487_v5, -1e+30  ;;  %3599 = vmatpush.bf16.msrb.mxu3 %v4572_v50  ;;  %vm8218_vm15 = vcmask 523264  }
 0x663   : > { %v3352_v42 = vmin.f32 %v7456_v55, 0.0  ;;  %vm3344_vm8 = vcmp.gt.f32.partialorder %v7456_v55, 0.0 }
 0x664   : > { %v3317_v11 = vpop.f32.mrf.mxu2 }
 0x665   : > { %v4844_v48 = vpop.eup %4843  ;;  %v3318_v44 = vadd.f32 %v3317_v11, %v3289_v30  ;;  %v3365_v4 = vmul.f32 1.442695, %v3352_v42 }
 0x666   : > { %v4846_v45 = vpop.eup %4845  ;;  %v4347_v1 = vadd.f32 -1.0, %v4844_v48  ;;  %v3261_v59 = vpop.f32.mrf.mxu3  ;;  %3600 = vmatpush.bf16.msrb.mxu3 %v4571_v46  ;;  %v4575_v46 = vld [vmem:[#allocation5 + $0x1c0] sm:$0xff] }
 0x667   : > { %v3328_v38 = vmul.f32 %v4846_v45, %v3318_v44  ;;  %v3262_v12 = vadd.f32 %v3261_v59, %v3232_v20  ;;  %4849 = vpow2.f32 %v3365_v4  ;;  %v4848_v3 = vpop.eup %4847 }
 0x668   : > { %4851 = vpow2.f32 %v3359_v43  ;;  %v7475_v63 = vsel %vm3343_vm4, %v7443_v8, %v4347_v1  ;;  %v7482_v34 = vpop.permute.xlu1 %3500  ;;  %v3361_v8 = vmul.f32 1.442695, %v3350_v37 }
 0x669   : > { %v3290_v41 = vpop.f32.mrf.mxu0  ;;  %v3337_v19 = vadd.f32 %v7416_v18, %v3328_v38  ;;  %v3471_v31 = vsel %vm3463_vm12, %v7475_v63, -1e+30  ;;  %v3526_v21 = vsel %vm3518_vm2, %v7475_v63, -1e+30  ;;  %vm3462_vm12 = vcmp.eq.s32.totalorder %v7428_v10, 1  ;;  %v4569_v38 = vld [vmem:[#allocation5 + $0x190] sm:$0xff] }
 0x66a   : > { %v3291_v13 = vadd.f32 %v3290_v41, %v3262_v12  ;;  %v3475_v61 = vmax.f32 %v3467_v40, %v3471_v31  ;;  %v3530_v9 = vmax.f32 %v3522_v62, %v3526_v21  ;;  %v3513_v40 = vpop.permute.xlu2 %3512  ;;  %v4565_v62 = vld [vmem:[#allocation5 + $0x170] sm:$0xff]  ;;  %vm3466_vm2 = vcmp.eq.s32.totalorder %v7440_v0, 1  ;;  %3601 = vmatpush.bf16.msrb.mxu3 %v4570_v36  ;;  %v4568_v10 = vld [vmem:[#allocation5 + $0x188] sm:$0xff] }
 0x66b   : > { %v3353_v29 = vmin.f32 %v3337_v19, 0.0  ;;  %vm3345_vm11 = vcmp.gt.f32.partialorder %v3337_v19, 0.0  ;;  %vm3517_vm4 = vcmp.eq.s32.totalorder %v7482_v34, 1  ;;  %vm3521_vm0 = vcmp.eq.s32.totalorder %v3513_v40, 1  ;;  %3659 = vmatpush.bf16.msrb.mxu0 %v4565_v62  ;;  %v4567_v34 = vld [vmem:[#allocation5 + $0x180] sm:$0xff] }
 0x66c   : > { %v3319_v57 = vpop.f32.mrf.mxu2 }
 0x66d   : > { %v4850_v56 = vpop.eup %4849  ;;  %v3320_v52 = vadd.f32 %v3319_v57, %v3291_v13  ;;  %v3367_v2 = vmul.f32 1.442695, %v3353_v29 }
 0x66e   : > { %v4852_v49 = vpop.eup %4851  ;;  %v4348_v32 = vadd.f32 -1.0, %v4850_v56  ;;  %3602 = vmatpush.bf16.msrb.mxu3 %v4569_v38 }
 0x66f   : > { %v3329_v24 = vmul.f32 %v4848_v3, %v3320_v52  ;;  %4853 = vpow2.f32 %v3367_v2  ;;  %v4345_v39 = vadd.f32 -1.0, %v4852_v49  ;;  %3660 = vmatpush.bf16.msrb.mxu0 %v4564_v15  ;;  %v4561_v49 = vld [vmem:[#allocation5 + $0x150] sm:$0xff] }
 0x670   : > { %4855 = vpow2.f32 %v3361_v8  ;;  %v7496_v27 = vsel %vm3344_vm8, %v7456_v55, %v4348_v32  ;;  %v3510_v16 = vpop.permute.xlu1 %3509  ;;  %v4562_v8 = vld [vmem:[#allocation5 + $0x158] sm:$0xff] }
 0x671   : > { %v3338_v14 = vadd.f32 %v7416_v18, %v3329_v24  ;;  %v3472_v60 = vsel %vm3464_vm6, %v7496_v27, -1e+30  ;;  %v3527_v17 = vsel %vm3519_vm7, %v7496_v27, -1e+30  ;;  %v7504_v55 = vsel %vm3341_vm3, %v7449_v7, %v4345_v39 }
 0x672   : > { %v3476_v47 = vmax.f32 %v3468_v58, %v3472_v60  ;;  %v3531_v33 = vmax.f32 %v3523_v28, %v3527_v17  ;;  %vm3520_vm14 = vcmp.eq.s32.totalorder %v3510_v16, 1  ;;  %v3469_v43 = vsel %vm3461_vm9, %v7504_v55, -1e+30  ;;  %3603 = vmatpush.bf16.msrb.mxu3 %v4568_v10  ;;  %v4581_v16 = vld [vmem:[#allocation5 + $0x1f0] sm:$0xff] }
 0x673   : > { %v3354_v6 = vmin.f32 %v3338_v14, 0.0  ;;  %v3524_v54 = vsel %vm3516_vm10, %v7504_v55, -1e+30  ;;  %vm3346_vm1 = vcmp.gt.f32.partialorder %v3338_v14, 0.0  ;;  %vm3545_vm6 = vcmask 1040384  }
 0x674   : > { %v3479_v35 = vmax.f32 %v3475_v61, %v3476_v47  ;;  %v3534_v23 = vmax.f32 %v3530_v9, %v3531_v33  ;;  %v4563_v61 = vld [vmem:[#allocation5 + $0x160] sm:$0xff]  ;;  %vm3737_vm3 = vcmask 9216  }
 0x675   : > { %v4854_v30 = vpop.eup %4853  ;;  %v3369_v18 = vmul.f32 1.442695, %v3354_v6  ;;  %3661 = vmatpush.bf16.msrb.mxu0 %v4563_v61  ;;  %v4559_v33 = vld [vmem:[#allocation5 + $0x140] sm:$0xff]  ;;  %v4580_v6 = vld [vmem:[#allocation5 + $0x1e8] sm:$0xff] }
 0x676   : > { %v4856_v25 = vpop.eup %4855  ;;  %v4349_v42 = vadd.f32 -1.0, %v4854_v30  ;;  %3604 = vmatpush.bf16.msrb.mxu3 %v4567_v34  ;;  %v4579_v30 = vld [vmem:[#allocation5 + $0x1e0] sm:$0xff] }
 0x677   : > { %4857 = vpow2.f32 %v3369_v18  ;;  %v4346_v7 = vadd.f32 -1.0, %v4856_v25  ;;  %v4577_v18 = vld [vmem:[#allocation5 + $0x1d0] sm:$0xff] }
 0x678   : > { %v3385_v11 = vsel %vm3345_vm11, %v3337_v19, %v4349_v42  ;;  %v4576_v42 = vld [vmem:[#allocation5 + $0x1c8] sm:$0xff] }
 0x679   : > { %v3473_v48 = vsel %vm3465_vm13, %v3385_v11, -1e+30  ;;  %v3528_v44 = vsel %vm3520_vm14, %v3385_v11, -1e+30  ;;  %v3382_v1 = vsel %vm3342_vm5, %v7465_v22, %v4346_v7  ;;  %3662 = vmatpush.bf16.msrb.mxu0 %v4562_v8 }
 0x67a   : > { %v3477_v4 = vmax.f32 %v3469_v43, %v3473_v48  ;;  %v3532_v45 = vmax.f32 %v3524_v54, %v3528_v44  ;;  %v3470_v12 = vsel %vm3462_vm12, %v3382_v1, -1e+30  ;;  %v3525_v41 = vsel %vm3517_vm4, %v3382_v1, -1e+30  ;;  %v4665_v43 = vld [vmem:[%s7569_s2 + $0xa] ss:$0 sm:$0xff] }
 0x67d   : > { %v4858_v20 = vpop.eup %4857  ;;  %3663 = vmatpush.bf16.msrb.mxu0 %v4561_v49 }
 0x67e   : > { %v4350_v59 = vadd.f32 -1.0, %v4858_v20 }
 0x680   : > { %v3386_v37 = vsel %vm3346_vm1, %v3338_v14, %v4350_v59 }
 0x681   : > { %v3474_v19 = vsel %vm3466_vm2, %v3386_v37, -1e+30  ;;  %v3529_v31 = vsel %vm3521_vm0, %v3386_v37, -1e+30  ;;  %3407 = vmatpush.msrb.mxu1 %v3386_v37 }
 0x682   : > { %v3478_v22 = vmax.f32 %v3470_v12, %v3474_v19  ;;  %v3533_v21 = vmax.f32 %v3525_v41, %v3529_v31 }
 0x683   : > { %3408 = vmatpush.msrb.mxu1 %v3385_v11 }
 0x684   : > { %v3480_v0 = vmax.f32 %v3477_v4, %v3478_v22  ;;  %v3535_v13 = vmax.f32 %v3532_v45, %v3533_v21  ;;  %v4666_v4 = vld [vmem:[%s7569_s2 + $0xb] ss:$0 sm:$0xff] }
 0x685   : > { %3409 = vmatpush.msrb.mxu1 %v7496_v27  ;;  %v4560_v27 = vld [vmem:[#allocation5 + $0x148] sm:$0xff] }
 0x686   : > { %v3481_v9 = vmax.f32 %v3479_v35, %v3480_v0  ;;  %v3536_v3 = vmax.f32 %v3534_v23, %v3535_v13  ;;  %3664 = vmatpush.bf16.msrb.mxu0 %v4560_v27 }
 0x687   : > { %3410 = vmatpush.msrb.mxu1 %v7475_v63  ;;  %v3387_v63 = vld [vmem:[%s325_s19] sm:$0x3] }
 0x688   : > { %v3482_v53 = vrot.slane %v3481_v9, 4  ;;  %v3537_v29 = vrot.slane %v3536_v3, 4 }
 0x689   : > { %3411 = vmatpush.msrb.mxu1 %v3382_v1 }
 0x68a   : > { %v3483_v57 = vmax.f32 %v3481_v9, %v3482_v53  ;;  %v3538_v56 = vmax.f32 %v3536_v3, %v3537_v29  ;;  %3665 = vmatpush.bf16.msrb.mxu0 %v4559_v33 }
 0x68b   : > { %3412 = vmatpush.msrb.mxu1 %v7504_v55  ;;  %v4578_v55 = vld [vmem:[#allocation5 + $0x1d8] sm:$0xff] }
 0x68c   : > { %v3484_v52 = vrot.slane %v3483_v57, 2  ;;  %v3539_v2 = vrot.slane %v3538_v56, 2 }
 0x68d   : > { %3413 = vmatpush.msrb.mxu1 %v7487_v5 }
 0x68e   : > { %v3485_v32 = vmax.f32 %v3483_v57, %v3484_v52  ;;  %v3540_v24 = vmax.f32 %v3538_v56, %v3539_v2 }
 0x68f   : > { %3414 = vmatpush.msrb.mxu1 %v7461_v51  ;;  %v4582_v51 = vld [vmem:[#allocation5 + $0x1f8] sm:$0xff] }
 0x690   : > { %v3486_v58 = vrot.slane %v3485_v32, 1  ;;  %v3541_v28 = vrot.slane %v3540_v24, 1  ;;  %4351 = vmatmul.msk.f32.vlgmr.msrb.gmra.mxu1 %vm8218_vm15, %v3387_v63 }
 0x691   : > { %3724 = vmatpush.bf16.msra.mxu1 %v4582_v51 }
 0x692   : > { %v3487_v39 = vmax.f32 %v3485_v32, %v3486_v58  ;;  %v3542_v14 = vmax.f32 %v3540_v24, %v3541_v28 }
 0x694   : > { %vm3543_vm7 = vcmp.gt.f32.partialorder %v3542_v14, -5e+29  ;;  %vm3488_vm8 = vcmp.gt.f32.partialorder %v3487_v39, -5e+29 }
 0x695   : > { %v3544_v60 = vsel %vm3543_vm7, %v3542_v14, 0.0  ;;  %v3489_v5 = vsel %vm3488_vm8, %v3487_v39, 0.0  ;;  %3725 = vmatpush.bf16.msra.mxu1 %v4581_v16 }
 0x696   : > { %v3546_v17 = vsel %vm3545_vm6, %v3489_v5, %v3544_v60 }
 0x697   : > { %v3548_v47 = vpack.c.bf16 %v3546_v17, %v3546_v17 }
 0x699   : > { %3605 = vmatmul.bf16.vlgmr.msrb.gmra.mxu3 %v3548_v47  ;;  %3726 = vmatpush.bf16.msra.mxu1 %v4580_v6 }
 0x69d   : > { %3727 = vmatpush.bf16.msra.mxu1 %v4579_v30 }
 0x6a1   : > { %3728 = vmatpush.bf16.msra.mxu1 %v4578_v55 }
 0x6a5   : > { %3729 = vmatpush.bf16.msra.mxu1 %v4577_v18 }
 0x6a9   : > { %3730 = vmatpush.bf16.msra.mxu1 %v4576_v42 }
 0x6ad   : > { %3731 = vmatpush.bf16.msra.mxu1 %v4575_v46 }
 0x70d   : > { %v3416_v35 = vpop.f32.mrf.mxu1 }
 0x70e   : > { %v3547_v23 = vpack.c.bf16 %v3416_v35, %v3416_v35 }
 0x710   : > { %3666 = vmatmul.bf16.vlgmr.msrb.gmra.mxu0 %v3547_v23 }
 0x71c   : > { %v3606_v50 = vpop.f32.mrf.mxu3 }
 0x724   : > { %v3608_v25 = vpop.f32.mrf.mxu3 }
 0x78d   : > { %v3667_v54 = vpop.f32.mrf.mxu0 }
 0x78e   : > { %v3668_v11 = vadd.f32 %v3667_v54, %v3606_v50 }
 0x790   : > { %v3672_v7 = vadd.f32 %v4665_v43, %v3668_v11 }
 0x792   : > { %v3673_v48 = vmax.f32 %v3672_v7, 0.0 }
 0x794   : > { %v3674_v44 = vpack.c.bf16 %v3673_v48, %v3673_v48 }
 0x795   : > { %v3669_v26 = vpop.f32.mrf.mxu0 }
 0x796   : > { %3732 = vmatmul.bf16.vlgmr.msra.gmra.mxu1 %v3674_v44 }
 0x813   : > { %v3733_v45 = vpop.f32.mrf.mxu1 }
 0x814   : > { %v3734_v40 = vadd.f32 %v4666_v4, %v3733_v45 }
 0x816   : > { %v3738_v36 = vsel %vm3737_vm3, %v3734_v40, -inf }
 0x817   : > { %3739 = vmax.xlane.f32.xlu0 %v3738_v36 }
 0x81b   : > { %v3735_v62 = vpop.f32.mrf.mxu1 }
 0x88a   : > { %v3740_v20 = vpop.xlane.xlu0 %3739 }
 0x88b   : > { %v3741_v1 = vsub.f32 %v3734_v40, %v3740_v20 }
 0x88d   : > { %v3742_v59 = vmul.f32 1.442695, %v3741_v1 }
 0x88f   : > { %4859 = vpow2.f32 %v3742_v59 }
 0x895   : > { %v4860_v38 = vpop.eup %4859 }
 0x896   : > { %v3744_v12 = vsel %vm3737_vm3, %v4860_v38, 0.0 }
 0x897   : > { %3745 = vadd.xlane.f32.xlu1 %v3744_v12 }
 0x90a   : > { %v3746_v37 = vpop.xlane.xlu1 %3745 }
 0x90b   : > { %4861 = vlog2.f32 %v3746_v37 }
 0x911   : > { %v4862_v15 = vpop.eup %4861 }
 0x912   : > { %v3748_v41 = vmul.f32 0.6931472, %v4862_v15 }
 0x914   : > { %v3749_v19 = vadd.f32 %v3748_v41, %v3740_v20 }
 0x916   : > { %v3750_v31 = vsub.f32 %v3734_v40, %v3749_v19 }
 0x918   : > { %3751 = vst.msk [vmem:[%s371_s28] sm:$0x3] %vm3737_vm3, %v3750_v31 }
 0x919   : > { %5012 = shalt.err (!%p5009_p10)
}
 0x91a   : > { %4593 = dma.vmem_to_hbm [thread:$0]  (%p5166_p12), %s3766_s21, 32, %s3768_s12, %s3753_s10  }
 0x91b PF: > { %s3779_s1 = sand.u32 1, %s5047_s24   ;;  %p8219_p11 = scmp.ge.s32.totalorder %s5059_s27, 2 }
 0x91c   : > { %s3780_s17 = scalar_lea.sflag [#allocation4], %s3779_s1 }
 0x91d   : > { %p4607_p0 = pnand %p8219_p11, %p5185_p7 }
 0x91f   : > { %p4608_p3 = pneg %p4607_p0 }
 0x921   : > { %5042 = dma.done.wait (%p4608_p3), %s3780_s17, 32  }
 0x922   : > { %5044 = vsyncadd (%p4608_p3), %s3780_s17, 4294967264  ;;  %p19_p5 = scmp.ge.s32.totalorder %s5154_s22, 4   ;;  %s8220_s24 = smov %s5051_s25 }
 0x923   : > { %s8221_s25 = smov %s5055_s26  ;;  %s8222_s26 = smov %s5171_s30 }
 0x924   : > { %s8223_s27 = smov %s5154_s22  ;;  %21 = sbr.rel (!%p19_p5) target bundleno = 8 (0x8), region = 109 }
 0x929   :  { %3786 = vsyncpa [#allocation3], 1 }
 0x92a   :  { %3788 = vsyncpa [#allocation3 + $0x1], 1 }
 0x92b   :  { %3789 = vsyncpa [#allocation6], 1 }
 0x92c   :  { %3790 = vsyncpa [#allocation4], 1 }
 0x92d   :  { %3792 = vsyncpa [#allocation4 + $0x1], 1 }

</bundles_post_ra>
